<compile_context>
chip_gen: v7x
topology: tpu7x:2x2x1
jax: 0.10.0
libtpu: 0.0.40
codegen_flags: <defaults>
</compile_context>

<pallas_src>
import functools
import math

import jax
import jax.numpy as jnp
from jax import lax
from jax.experimental import pallas as pl
from jax.experimental.pallas import tpu as pltpu


# ---------------------------------------------------------------------------
# Kernel: one DecoderLayer per grid step, layer index = pl.program_id(1).
# ---------------------------------------------------------------------------
def fused_decoder_kernel(x1_ref, x2_ref, b1_ref, b2_ref,
                         a1w_ref, a1b_ref, a1pw_ref, a1pb_ref,
                         a2w_ref, a2b_ref, a2pw_ref, a2pb_ref,
                         lng_ref, lnb_ref,
                         f1w_ref, f1b_ref, f2w_ref, f2b_ref,
                         o_ref,
                         ctx_scr, acc_scr,
                         *, n_head, head_dim, n_batch, t_q, t_kv, ffn_chunk):
    layer = pl.program_id(1)

    # Seed the resident output block with the decoder input at layer 0.
    @pl.when(layer == 0)
    def _seed():
        o_ref[...] = x1_ref[...]

    x = o_ref[...]                      # (rows_q, D) f32 carried activations
    x_enc = x2_ref[...]                 # (rows_kv, D) bf16 encoder memory (K/V)
    inv_scale = 1.0 / (math.sqrt(head_dim) + 1e-8)      # static constant

    def layer_norm(v, g, b):
        mu = jnp.mean(v, axis=-1, keepdims=True)
        var = jnp.mean(jnp.square(v - mu), axis=-1, keepdims=True)
        return (v - mu) * lax.rsqrt(var + 1e-5) * g + b

    def attention(xq, xkv_b, w_ref, b_ref, pw_ref, pb_ref, bias_ref, t_k,
                  self_attn):
        # Hoisted out of the head loop: bf16 cast of the query slab and the
        # pre-broadcast additive mask bias per batch element.
        xq_b = xq.astype(jnp.bfloat16)
        biases = [jnp.broadcast_to(bias_ref[b], (t_q, t_k))
                  for b in range(n_batch)]

        acc_scr[...] = jnp.zeros_like(acc_scr)

        def head_body(h, carry):
            # Fused per-head QKV weight (D, 3*hd); dynamic leading-axis index.
            wh = w_ref[h]               # (D, 3*hd) bf16
            bh = b_ref[h]               # (1, 3*hd) f32
            if self_attn:
                qkv = jnp.dot(xq_b, wh,
                              preferred_element_type=jnp.float32) + bh
                q = qkv[:, :head_dim]
                k = qkv[:, head_dim:2 * head_dim]
                v = qkv[:, 2 * head_dim:]
            else:
                q = jnp.dot(xq_b, wh[:, :head_dim],
                            preferred_element_type=jnp.float32) + bh[:, :head_dim]
                kv = jnp.dot(xkv_b, wh[:, head_dim:],
                             preferred_element_type=jnp.float32) + bh[:, head_dim:]
                k = kv[:, :head_dim]
                v = kv[:, head_dim:]
            for b in range(n_batch):     # static; 8-aligned f32 row slices
                qb = q[b * t_q:(b + 1) * t_q, :]
                kb = k[b * t_k:(b + 1) * t_k, :]
                vb = v[b * t_k:(b + 1) * t_k, :]
                s = jnp.dot(qb, kb.T,
                            preferred_element_type=jnp.float32) * inv_scale
                s = s + biases[b]
                m = jnp.max(s, axis=-1, keepdims=True)
                e = jnp.exp(s - m)
                p = e * pl.reciprocal(jnp.sum(e, axis=-1, keepdims=True),
                                      approx=True)
                # Per-head context via scratch row-slice stores (no concat).
                ctx_scr[b * t_q:(b + 1) * t_q, :] = jnp.dot(
                    p, vb, preferred_element_type=jnp.float32)
            # Output projection fused into the head loop; VMEM accumulator.
            acc_scr[...] += jnp.dot(ctx_scr[...].astype(jnp.bfloat16),
                                    pw_ref[h],
                                    preferred_element_type=jnp.float32)
            return carry

        lax.fori_loop(0, n_head, head_body, 0, unroll=True)
        return acc_scr[...] + pb_ref[...]

    # --- self attention + residual + LayerNorm --------------------------------
    attn1 = attention(x, None, a1w_ref, a1b_ref, a1pw_ref, a1pb_ref,
                      b1_ref, t_q, True)
    out1 = layer_norm(attn1 + x, lng_ref[0], lnb_ref[0])

    # --- cross attention + residual + LayerNorm -------------------------------
    attn2 = attention(out1, x_enc, a2w_ref, a2b_ref, a2pw_ref, a2pb_ref,
                      b2_ref, t_kv, False)
    out2 = layer_norm(attn2 + out1, lng_ref[1], lnb_ref[1])

    # --- position-wise FFN (Linear -> ReLU -> Linear), chunked over Dh --------
    out2_b = out2.astype(jnp.bfloat16)
    d_ff = f1w_ref.shape[-1]
    n_chunks = d_ff // ffn_chunk
    ffn = jnp.zeros_like(out2)
    for c in range(n_chunks):            # static; caps (rows, Dh) intermediate
        lo, hi = c * ffn_chunk, (c + 1) * ffn_chunk
        h_c = jnp.dot(out2_b, f1w_ref[:, lo:hi],
                      preferred_element_type=jnp.float32) + f1b_ref[:, lo:hi]
        h_c = jnp.maximum(h_c, 0.0)
        ffn = ffn + jnp.dot(h_c.astype(jnp.bfloat16), f2w_ref[lo:hi, :],
                            preferred_element_type=jnp.float32)
    ffn = ffn + f2b_ref[...]
    o_ref[...] = layer_norm(ffn + out2, lng_ref[2], lnb_ref[2])


# ---------------------------------------------------------------------------
# One-time weight packing (call OUTSIDE jit, at model-load time).
# ---------------------------------------------------------------------------
def pack_decoder_params(params, n_head):
    D = params[0]["f1_w"].shape[0]
    assert D % n_head == 0
    hd = D // n_head

    def heads_cols(w):                 # (D, D) in->out      -> (H, D, hd)
        return w.reshape(D, n_head, hd).transpose(1, 0, 2)

    def heads_cols_b(b):               # (1, D)              -> (H, 1, hd)
        return b.reshape(1, n_head, hd).transpose(1, 0, 2)

    def fuse_qkv_w(ws):                # (4, D, D)[0:3]      -> (H, D, 3*hd)
        return jnp.concatenate([heads_cols(ws[i]) for i in range(3)], axis=-1)

    def fuse_qkv_b(bs):                # (4, 1, D)[0:3]      -> (H, 1, 3*hd)
        return jnp.concatenate([heads_cols_b(bs[i]) for i in range(3)], axis=-1)

    def heads_rows(w):                 # proj (D, D)         -> (H, hd, D)
        return w.reshape(n_head, hd, D)

    def stack(fn):
        return jnp.stack([fn(p) for p in params], axis=0)

    bf16 = lambda a: a.astype(jnp.bfloat16)
    return dict(
        a1_qkv_w=bf16(stack(lambda p: fuse_qkv_w(p["a1_w"]))),   # (L,H,D,3hd)
        a1_qkv_b=stack(lambda p: fuse_qkv_b(p["a1_b"])),         # (L,H,1,3hd)
        a1_pw=bf16(stack(lambda p: heads_rows(p["a1_w"][3]))),   # (L,H,hd,D)
        a1_pb=stack(lambda p: p["a1_b"][3]),                     # (L,1,D)
        a2_qkv_w=bf16(stack(lambda p: fuse_qkv_w(p["a2_w"]))),
        a2_qkv_b=stack(lambda p: fuse_qkv_b(p["a2_b"])),
        a2_pw=bf16(stack(lambda p: heads_rows(p["a2_w"][3]))),
        a2_pb=stack(lambda p: p["a2_b"][3]),
        ln_g=stack(lambda p: p["ln_g"]),                         # (L,3,1,D)
        ln_b=stack(lambda p: p["ln_b"]),                         # (L,3,1,D)
        f1_w=bf16(stack(lambda p: p["f1_w"])),                   # (L,D,Dh)
        f1_b=stack(lambda p: p["f1_b"]),                         # (L,1,Dh)
        f2_w=bf16(stack(lambda p: p["f2_w"])),                   # (L,Dh,D)
        f2_b=stack(lambda p: p["f2_b"]),                         # (L,1,D)
    )


# ---------------------------------------------------------------------------
# Wrapper: whole Decoder in one pallas_call, grid = (batch_blocks, n_layer).
# ---------------------------------------------------------------------------
def decoder_forward(x1, x2, la_mask, pad_mask, packed, *, n_head,
                    batch_block=None, ffn_chunk=512):
    B, T1, D = x1.shape
    T2 = x2.shape[1]
    L = packed["f1_w"].shape[0]
    assert D % n_head == 0
    hd = D // n_head
    Dh = packed["f1_w"].shape[-1]

    # nb = 1 (default) streams the stacked weights from HBM exactly once
    # (single-TC v5e/v6e); on v7x use batch_block = B // 2 to light both TCs.
    Bb = B if batch_block is None else batch_block
    assert B % Bb == 0, "batch_block must divide batch"
    assert T1 % 8 == 0 and T2 % 8 == 0, "per-batch row slices must be 8-aligned"
    nb = B // Bb
    rows_q, rows_kv = Bb * T1, Bb * T2

    ffn_chunk = min(ffn_chunk, Dh)
    assert Dh % ffn_chunk == 0

    # Batch folded into rows; additive mask bias precomputed once (hoisted).
    x1f = x1.reshape(B * T1, D).astype(jnp.float32)
    x2f = x2.reshape(B * T2, D).astype(jnp.bfloat16)   # only ever a K/V input
    bias1 = (la_mask * -1e9).astype(jnp.float32)       # (B, T1, T1)
    bias2 = (pad_mask * -1e9).astype(jnp.float32)      # (B, 1, T2)

    kernel = functools.partial(fused_decoder_kernel, n_head=n_head,
                               head_dim=hd, n_batch=Bb, t_q=T1, t_kv=T2,
                               ffn_chunk=ffn_chunk)

    bmap2 = lambda bb, l: (bb, 0)       # resident across the layer axis
    bmap3 = lambda bb, l: (bb, 0, 0)
    lmap3 = lambda bb, l: (l, 0, 0)
    lmap4 = lambda bb, l: (l, 0, 0, 0)

    in_specs = [
        pl.BlockSpec((rows_q, D), bmap2),                       # x1 (flattened)
        pl.BlockSpec((rows_kv, D), bmap2),                      # x2 (flattened)
        pl.BlockSpec((Bb, T1, T1), bmap3),                      # self-attn bias
        pl.BlockSpec((Bb, 1, T2), bmap3),                       # cross-attn bias
        pl.BlockSpec((None, n_head, D, 3 * hd), lmap4),         # a1 fused qkv w
        pl.BlockSpec((None, n_head, 1, 3 * hd), lmap4),         # a1 fused qkv b
        pl.BlockSpec((None, n_head, hd, D), lmap4),             # a1 proj w
        pl.BlockSpec((None, 1, D), lmap3),                      # a1 proj b
        pl.BlockSpec((None, n_head, D, 3 * hd), lmap4),         # a2 fused qkv w
        pl.BlockSpec((None, n_head, 1, 3 * hd), lmap4),         # a2 fused qkv b
        pl.BlockSpec((None, n_head, hd, D), lmap4),             # a2 proj w
        pl.BlockSpec((None, 1, D), lmap3),                      # a2 proj b
        pl.BlockSpec((None, 3, 1, D), lmap4),                   # ln gamma
        pl.BlockSpec((None, 3, 1, D), lmap4),                   # ln beta
        pl.BlockSpec((None, D, Dh), lmap3),                     # ffn f1 w
        pl.BlockSpec((None, 1, Dh), lmap3),                     # ffn f1 b
        pl.BlockSpec((None, Dh, D), lmap3),                     # ffn f2 w
        pl.BlockSpec((None, 1, D), lmap3),                      # ffn f2 b
    ]
    out_spec = pl.BlockSpec((rows_q, D), bmap2)

    # Advisory cost estimate so XLA schedules surrounding ops around the call.
    per_layer_flops = (
        2 * rows_q * D * (3 * D)            # self-attn fused QKV
        + 2 * rows_q * D * D                # self-attn output projection
        + 4 * Bb * n_head * T1 * T1 * hd    # self-attn scores + context
        + 2 * rows_q * D * D                # cross-attn Q
        + 2 * rows_kv * D * (2 * D)         # cross-attn fused KV
        + 2 * rows_q * D * D                # cross-attn output projection
        + 4 * Bb * n_head * T1 * T2 * hd    # cross-attn scores + context
        + 4 * rows_q * D * Dh)              # FFN
    weight_bytes = sum(math.prod(v.shape) * v.dtype.itemsize
                       for v in packed.values())
    act_bytes = 4 * (2 * B * T1 * D + B * T1 * T1 + B * T2) + 2 * B * T2 * D
    cost = pl.CostEstimate(
        flops=int(nb * L * per_layer_flops),
        transcendentals=int(nb * L * Bb * n_head * (T1 * T1 + T1 * T2)),
        bytes_accessed=int(nb * weight_bytes + act_bytes))

    out = pl.pallas_call(
        kernel,
        out_shape=jax.ShapeDtypeStruct((B * T1, D), jnp.float32),
        grid=(nb, L),                       # batch blocks outer, layers inner
        in_specs=in_specs,
        out_specs=out_spec,
        scratch_shapes=[pltpu.VMEM((rows_q, hd), jnp.float32),   # per-head ctx
                        pltpu.VMEM((rows_q, D), jnp.float32)],   # proj accum
        compiler_params=pltpu.CompilerParams(
            dimension_semantics=("parallel", "arbitrary"),
            # Tiny at toy dims; raise toward 64-100 MiB on v6e / cap ~48-56 MiB
            # on v7x at deployment dims.
            vmem_limit_bytes=32 * 1024 * 1024,
        ),
        cost_estimate=cost,
    )(x1f, x2f, bias1, bias2,
      packed["a1_qkv_w"], packed["a1_qkv_b"], packed["a1_pw"], packed["a1_pb"],
      packed["a2_qkv_w"], packed["a2_qkv_b"], packed["a2_pw"], packed["a2_pb"],
      packed["ln_g"], packed["ln_b"],
      packed["f1_w"], packed["f1_b"], packed["f2_w"], packed["f2_b"])

    return out.reshape(B, T1, D)


# ---------------------------------------------------------------------------
# Pure-JAX f32 reference (mirrors the PyTorch module, inference mode).
# ---------------------------------------------------------------------------
def _ref_multihead(xq, xkv, w, b, mask, n_head, hd):
    q = xq @ w[0] + b[0]
    k = xkv @ w[1] + b[1]
    v = xkv @ w[2] + b[2]
    B, Tq, D = q.shape
    Tk = k.shape[1]
    qh = q.reshape(B, Tq, n_head, hd).transpose(0, 2, 1, 3)
    kh = k.reshape(B, Tk, n_head, hd).transpose(0, 2, 1, 3)
    vh = v.reshape(B, Tk, n_head, hd).transpose(0, 2, 1, 3)
    s = jnp.einsum("bhqd,bhkd->bhqk", qh, kh) / (jnp.sqrt(jnp.float32(hd)) + 1e-8)
    s = s + mask[:, None] * (-1e9)
    p = jax.nn.softmax(s, axis=-1)
    ctx = jnp.einsum("bhqk,bhkd->bhqd", p, vh).transpose(0, 2, 1, 3).reshape(B, Tq, D)
    return ctx @ w[3] + b[3]


def _ref_layer_norm(x, g, b):
    mu = jnp.mean(x, axis=-1, keepdims=True)
    var = jnp.mean((x - mu) ** 2, axis=-1, keepdims=True)
    return (x - mu) / jnp.sqrt(var + 1e-5) * g + b


def decoder_forward_ref(x1, x2, la_mask, pad_mask, params, *, n_head):
    D = x1.shape[-1]
    hd = D // n_head
    for p in params:
        attn = _ref_multihead(x1, x1, p["a1_w"], p["a1_b"], la_mask, n_head, hd)
        out1 = _ref_layer_norm(attn + x1, p["ln_g"][0], p["ln_b"][0])
        attn2 = _ref_multihead(out1, x2, p["a2_w"], p["a2_b"], pad_mask, n_head, hd)
        out2 = _ref_layer_norm(attn2 + out1, p["ln_g"][1], p["ln_b"][1])
        h = jnp.maximum(out2 @ p["f1_w"] + p["f1_b"], 0.0)
        ffn = h @ p["f2_w"] + p["f2_b"]
        x1 = _ref_layer_norm(ffn + out2, p["ln_g"][2], p["ln_b"][2])
    return x1


# ---------------------------------------------------------------------------
# Deterministic parameter init (natural layout; packed once before jit).
# ---------------------------------------------------------------------------
def init_params(key, n_layer, model_dim):
    D = model_dim
    Dh = 4 * D  # PositionWiseFFN expand_ratio = 4.0
    params = []
    for l in range(n_layer):
        kl = jax.random.fold_in(key, l)
        ks = jax.random.split(kl, 10)
        params.append(dict(
            a1_w=jax.random.normal(ks[0], (4, D, D), jnp.float32) * 0.05,
            a1_b=jax.random.normal(ks[1], (4, 1, D), jnp.float32) * 0.01,
            a2_w=jax.random.normal(ks[2], (4, D, D), jnp.float32) * 0.05,
            a2_b=jax.random.normal(ks[3], (4, 1, D), jnp.float32) * 0.01,
            ln_g=1.0 + jax.random.normal(ks[4], (3, 1, D), jnp.float32) * 0.01,
            ln_b=jax.random.normal(ks[5], (3, 1, D), jnp.float32) * 0.01,
            f1_w=jax.random.normal(ks[6], (D, Dh), jnp.float32) * 0.05,
            f1_b=jax.random.normal(ks[7], (1, Dh), jnp.float32) * 0.01,
            f2_w=jax.random.normal(ks[8], (Dh, D), jnp.float32) * 0.05,
            f2_b=jax.random.normal(ks[9], (1, D), jnp.float32) * 0.01,
        ))
    return params


if __name__ == "__main__":
    key = jax.random.PRNGKey(0)
    B, T1, T2, D = 2, 8, 8, 32
    n_head, n_layer = 4, 2

    k_x1, k_x2, k_p = jax.random.split(key, 3)
    x1 = jax.random.normal(k_x1, (B, T1, D), jnp.float32)
    x2 = jax.random.normal(k_x2, (B, T2, D), jnp.float32)

    # look-ahead mask: 1.0 above the diagonal (masked future positions)
    la_mask = jnp.broadcast_to(
        jnp.triu(jnp.ones((T1, T1), jnp.float32), k=1), (B, T1, T1))
    # pad mask: mask the last 2 encoder positions of batch element 1
    pad_mask = jnp.zeros((B, 1, T2), jnp.float32)
    pad_mask = pad_mask.at[1, 0, T2 - 2:].set(1.0)

    params = init_params(k_p, n_layer, D)
    packed = pack_decoder_params(params, n_head)       # once, OUTSIDE jit

    fwd = jax.jit(functools.partial(decoder_forward, n_head=n_head))
    out = jax.block_until_ready(fwd(x1, x2, la_mask, pad_mask, packed))

    ref = decoder_forward_ref(x1, x2, la_mask, pad_mask, params, n_head=n_head)
    assert out.shape == (B, T1, D)
    # bf16 weights / activation operands (f32 accumulation) vs f32 reference.
    assert jnp.allclose(out, ref, rtol=5e-2, atol=5e-2), "mismatch vs reference"

    print("KERNEL_OK")
</pallas_src>

<mosaic_0001>
module attributes {stable_mosaic.version = 11 : i64} {
  func.func @fused_decoder_kernel(%arg0: i32, %arg1: i32, %arg2: memref<16x32xf32, #tpu.memory_space<vmem>>, %arg3: memref<16x32xbf16, #tpu.memory_space<vmem>>, %arg4: memref<2x8x8xf32, #tpu.memory_space<vmem>>, %arg5: memref<2x1x8xf32, #tpu.memory_space<vmem>>, %arg6: memref<1x4x32x24xbf16, #tpu.memory_space<vmem>>, %arg7: memref<1x4x1x24xf32, #tpu.memory_space<vmem>>, %arg8: memref<1x4x8x32xbf16, #tpu.memory_space<vmem>>, %arg9: memref<1x1x32xf32, #tpu.memory_space<vmem>>, %arg10: memref<1x4x32x24xbf16, #tpu.memory_space<vmem>>, %arg11: memref<1x4x1x24xf32, #tpu.memory_space<vmem>>, %arg12: memref<1x4x8x32xbf16, #tpu.memory_space<vmem>>, %arg13: memref<1x1x32xf32, #tpu.memory_space<vmem>>, %arg14: memref<1x3x1x32xf32, #tpu.memory_space<vmem>>, %arg15: memref<1x3x1x32xf32, #tpu.memory_space<vmem>>, %arg16: memref<1x32x128xbf16, #tpu.memory_space<vmem>>, %arg17: memref<1x1x128xf32, #tpu.memory_space<vmem>>, %arg18: memref<1x128x32xbf16, #tpu.memory_space<vmem>>, %arg19: memref<1x1x32xf32, #tpu.memory_space<vmem>>, %arg20: memref<16x32xf32, #tpu.memory_space<vmem>>, %arg21: memref<16x8xf32, #tpu.memory_space<vmem>>, %arg22: memref<16x32xf32, #tpu.memory_space<vmem>>) attributes {dimension_semantics = [#tpu.dimension_semantics<parallel>, #tpu.dimension_semantics<arbitrary>], iteration_bounds = array<i64: 1, 2>, scalar_prefetch = 0 : i64, scratch_operands = 2 : i64, tpu.core_type = #tpu.core_type<tc>, window_params = [{transform_indices = @transform_0, window_bounds = array<i64: 16, 32>}, {transform_indices = @transform_1, window_bounds = array<i64: 16, 32>}, {transform_indices = @transform_2, window_bounds = array<i64: 2, 8, 8>}, {transform_indices = @transform_3, window_bounds = array<i64: 2, 1, 8>}, {transform_indices = @transform_4, window_bounds = array<i64: 1, 4, 32, 24>}, {transform_indices = @transform_5, window_bounds = array<i64: 1, 4, 1, 24>}, {transform_indices = @transform_6, window_bounds = array<i64: 1, 4, 8, 32>}, {transform_indices = @transform_7, window_bounds = array<i64: 1, 1, 32>}, {transform_indices = @transform_8, window_bounds = array<i64: 1, 4, 32, 24>}, {transform_indices = @transform_9, window_bounds = array<i64: 1, 4, 1, 24>}, {transform_indices = @transform_10, window_bounds = array<i64: 1, 4, 8, 32>}, {transform_indices = @transform_11, window_bounds = array<i64: 1, 1, 32>}, {transform_indices = @transform_12, window_bounds = array<i64: 1, 3, 1, 32>}, {transform_indices = @transform_13, window_bounds = array<i64: 1, 3, 1, 32>}, {transform_indices = @transform_14, window_bounds = array<i64: 1, 32, 128>}, {transform_indices = @transform_15, window_bounds = array<i64: 1, 1, 128>}, {transform_indices = @transform_16, window_bounds = array<i64: 1, 128, 32>}, {transform_indices = @transform_17, window_bounds = array<i64: 1, 1, 32>}, {transform_indices = @transform_18, window_bounds = array<i64: 16, 32>}]} {
    %c0_i32 = arith.constant 0 : i32
    %0 = arith.cmpi eq, %arg1, %c0_i32 : i32
    %1 = arith.extui %0 : i1 to i32
    %c0_i32_0 = arith.constant 0 : i32
    %2 = arith.cmpi ne, %1, %c0_i32_0 : i32
    scf.if %2 {
      %c0_343 = arith.constant 0 : index
      %c0_344 = arith.constant 0 : index
      %647 = vector.load %arg2[%c0_343, %c0_344] : memref<16x32xf32, #tpu.memory_space<vmem>>, vector<16x32xf32>
      %c0_345 = arith.constant 0 : index
      %c0_346 = arith.constant 0 : index
      %648 = vector.load %arg20[%c0_345, %c0_346] : memref<16x32xf32, #tpu.memory_space<vmem>>, vector<16x32xf32>
      tpu.vector_store %arg20[%c0_345, %c0_346], %647 {strides = array<i32>} : memref<16x32xf32, #tpu.memory_space<vmem>>, vector<16x32xf32>,
    } else {
    }
    %c0 = arith.constant 0 : index
    %c0_1 = arith.constant 0 : index
    %3 = vector.load %arg20[%c0, %c0_1] : memref<16x32xf32, #tpu.memory_space<vmem>>, vector<16x32xf32>
    %c0_2 = arith.constant 0 : index
    %c0_3 = arith.constant 0 : index
    %4 = vector.load %arg3[%c0_2, %c0_3] : memref<16x32xbf16, #tpu.memory_space<vmem>>, vector<16x32xbf16>
    %5 = arith.truncf %3 : vector<16x32xf32> to vector<16x32xbf16>
    %c0_4 = arith.constant 0 : index
    %c0_5 = arith.constant 0 : index
    %c0_6 = arith.constant 0 : index
    %6 = vector.load %arg4[%c0_4, %c0_5, %c0_6] : memref<2x8x8xf32, #tpu.memory_space<vmem>>, vector<1x8x8xf32>
    %7 = vector.shape_cast %6 : vector<1x8x8xf32> to vector<8x8xf32>
    %c1 = arith.constant 1 : index
    %c0_7 = arith.constant 0 : index
    %c0_8 = arith.constant 0 : index
    %8 = vector.load %arg4[%c1, %c0_7, %c0_8] : memref<2x8x8xf32, #tpu.memory_space<vmem>>, vector<1x8x8xf32>
    %9 = vector.shape_cast %8 : vector<1x8x8xf32> to vector<8x8xf32>
    %cst = arith.constant 0.000000e+00 : f32
    %10 = vector.broadcast %cst : f32 to vector<16x32xf32>
    %c0_9 = arith.constant 0 : index
    %c0_10 = arith.constant 0 : index
    %11 = vector.load %arg22[%c0_9, %c0_10] : memref<16x32xf32, #tpu.memory_space<vmem>>, vector<16x32xf32>
    tpu.vector_store %arg22[%c0_9, %c0_10], %10 {strides = array<i32>} : memref<16x32xf32, #tpu.memory_space<vmem>>, vector<16x32xf32>,
    %c0_i32_11 = arith.constant 0 : i32
    %c0_12 = arith.constant 0 : index
    %12 = arith.index_cast %c0_i32_11 : i32 to index
    %c0_13 = arith.constant 0 : index
    %c0_14 = arith.constant 0 : index
    %13 = vector.load %arg6[%c0_12, %12, %c0_13, %c0_14] : memref<1x4x32x24xbf16, #tpu.memory_space<vmem>>, vector<1x1x32x24xbf16>
    %14 = vector.shape_cast %13 : vector<1x1x32x24xbf16> to vector<32x24xbf16>
    %c0_15 = arith.constant 0 : index
    %15 = arith.index_cast %c0_i32_11 : i32 to index
    %c0_16 = arith.constant 0 : index
    %c0_17 = arith.constant 0 : index
    %16 = vector.load %arg7[%c0_15, %15, %c0_16, %c0_17] : memref<1x4x1x24xf32, #tpu.memory_space<vmem>>, vector<1x1x1x24xf32>
    %17 = vector.shape_cast %16 : vector<1x1x1x24xf32> to vector<1x24xf32>
    %cst_18 = arith.constant dense<0.000000e+00> : vector<16x24xf32>
    %18 = tpu.matmul %5, %14, %cst_18 {dimension_numbers = #tpu.dot_dimension_numbers<[1], [0], [0], [1], [0, 0, 1, 1], [], []>} : vector<16x32xbf16>, vector<32x24xbf16>, vector<16x24xf32> -> vector<16x24xf32>
    %19 = vector.broadcast %17 : vector<1x24xf32> to vector<16x24xf32>
    %20 = arith.addf %18, %19 : vector<16x24xf32>
    %21 = vector.extract_strided_slice %20 {offsets = [0, 0], sizes = [16, 8], strides = [1, 1]} : vector<16x24xf32> to vector<16x8xf32>
    %22 = vector.extract_strided_slice %20 {offsets = [0, 8], sizes = [16, 8], strides = [1, 1]} : vector<16x24xf32> to vector<16x8xf32>
    %23 = vector.extract_strided_slice %20 {offsets = [0, 16], sizes = [16, 8], strides = [1, 1]} : vector<16x24xf32> to vector<16x8xf32>
    %24 = vector.extract_strided_slice %21 {offsets = [0, 0], sizes = [8, 8], strides = [1, 1]} : vector<16x8xf32> to vector<8x8xf32>
    %25 = vector.extract_strided_slice %22 {offsets = [0, 0], sizes = [8, 8], strides = [1, 1]} : vector<16x8xf32> to vector<8x8xf32>
    %26 = vector.extract_strided_slice %23 {offsets = [0, 0], sizes = [8, 8], strides = [1, 1]} : vector<16x8xf32> to vector<8x8xf32>
    %27 = tpu.transpose %25, [1, 0] : vector<8x8xf32> -> vector<8x8xf32>
    %cst_19 = arith.constant dense<0.000000e+00> : vector<8x8xf32>
    %28 = tpu.matmul %24, %27, %cst_19 {dimension_numbers = #tpu.dot_dimension_numbers<[1], [0], [0], [1], [0, 0, 1, 1], [], []>} : vector<8x8xf32>, vector<8x8xf32>, vector<8x8xf32> -> vector<8x8xf32>
    %cst_20 = arith.constant 0.353553385 : f32
    %29 = vector.broadcast %cst_20 : f32 to vector<8x8xf32>
    %30 = arith.mulf %28, %29 : vector<8x8xf32>
    %31 = arith.addf %30, %7 : vector<8x8xf32>
    %cst_21 = arith.constant dense<0xFF800000> : vector<8xf32>
    %32 = vector.multi_reduction <maximumf>, %31, %cst_21 [1] : vector<8x8xf32> to vector<8xf32>
    %33 = vector.shape_cast %32 : vector<8xf32> to vector<8x1xf32>
    %34 = vector.broadcast %33 : vector<8x1xf32> to vector<8x8xf32>
    %35 = arith.subf %31, %34 : vector<8x8xf32>
    %36 = math.exp %35 : vector<8x8xf32>
    %cst_22 = arith.constant dense<0.000000e+00> : vector<8xf32>
    %37 = vector.multi_reduction <add>, %36, %cst_22 [1] : vector<8x8xf32> to vector<8xf32>
    %38 = vector.shape_cast %37 : vector<8xf32> to vector<8x1xf32>
    %39 = tpu.reciprocal %38 {approx = true} : vector<8x1xf32> -> vector<8x1xf32>
    %40 = vector.broadcast %39 : vector<8x1xf32> to vector<8x8xf32>
    %41 = arith.mulf %36, %40 : vector<8x8xf32>
    %cst_23 = arith.constant dense<0.000000e+00> : vector<8x8xf32>
    %42 = tpu.matmul %41, %26, %cst_23 {dimension_numbers = #tpu.dot_dimension_numbers<[1], [0], [0], [1], [0, 0, 1, 1], [], []>} : vector<8x8xf32>, vector<8x8xf32>, vector<8x8xf32> -> vector<8x8xf32>
    %c0_24 = arith.constant 0 : index
    %c0_25 = arith.constant 0 : index
    %43 = vector.load %arg21[%c0_24, %c0_25] : memref<16x8xf32, #tpu.memory_space<vmem>>, vector<8x8xf32>
    tpu.vector_store %arg21[%c0_24, %c0_25], %42 {strides = array<i32>} : memref<16x8xf32, #tpu.memory_space<vmem>>, vector<8x8xf32>,
    %44 = vector.extract_strided_slice %21 {offsets = [8, 0], sizes = [8, 8], strides = [1, 1]} : vector<16x8xf32> to vector<8x8xf32>
    %45 = vector.extract_strided_slice %22 {offsets = [8, 0], sizes = [8, 8], strides = [1, 1]} : vector<16x8xf32> to vector<8x8xf32>
    %46 = vector.extract_strided_slice %23 {offsets = [8, 0], sizes = [8, 8], strides = [1, 1]} : vector<16x8xf32> to vector<8x8xf32>
    %47 = tpu.transpose %45, [1, 0] : vector<8x8xf32> -> vector<8x8xf32>
    %cst_26 = arith.constant dense<0.000000e+00> : vector<8x8xf32>
    %48 = tpu.matmul %44, %47, %cst_26 {dimension_numbers = #tpu.dot_dimension_numbers<[1], [0], [0], [1], [0, 0, 1, 1], [], []>} : vector<8x8xf32>, vector<8x8xf32>, vector<8x8xf32> -> vector<8x8xf32>
    %cst_27 = arith.constant 0.353553385 : f32
    %49 = vector.broadcast %cst_27 : f32 to vector<8x8xf32>
    %50 = arith.mulf %48, %49 : vector<8x8xf32>
    %51 = arith.addf %50, %9 : vector<8x8xf32>
    %cst_28 = arith.constant dense<0xFF800000> : vector<8xf32>
    %52 = vector.multi_reduction <maximumf>, %51, %cst_28 [1] : vector<8x8xf32> to vector<8xf32>
    %53 = vector.shape_cast %52 : vector<8xf32> to vector<8x1xf32>
    %54 = vector.broadcast %53 : vector<8x1xf32> to vector<8x8xf32>
    %55 = arith.subf %51, %54 : vector<8x8xf32>
    %56 = math.exp %55 : vector<8x8xf32>
    %cst_29 = arith.constant dense<0.000000e+00> : vector<8xf32>
    %57 = vector.multi_reduction <add>, %56, %cst_29 [1] : vector<8x8xf32> to vector<8xf32>
    %58 = vector.shape_cast %57 : vector<8xf32> to vector<8x1xf32>
    %59 = tpu.reciprocal %58 {approx = true} : vector<8x1xf32> -> vector<8x1xf32>
    %60 = vector.broadcast %59 : vector<8x1xf32> to vector<8x8xf32>
    %61 = arith.mulf %56, %60 : vector<8x8xf32>
    %cst_30 = arith.constant dense<0.000000e+00> : vector<8x8xf32>
    %62 = tpu.matmul %61, %46, %cst_30 {dimension_numbers = #tpu.dot_dimension_numbers<[1], [0], [0], [1], [0, 0, 1, 1], [], []>} : vector<8x8xf32>, vector<8x8xf32>, vector<8x8xf32> -> vector<8x8xf32>
    %c8 = arith.constant 8 : index
    %c0_31 = arith.constant 0 : index
    %63 = vector.load %arg21[%c8, %c0_31] : memref<16x8xf32, #tpu.memory_space<vmem>>, vector<8x8xf32>
    tpu.vector_store %arg21[%c8, %c0_31], %62 {strides = array<i32>} : memref<16x8xf32, #tpu.memory_space<vmem>>, vector<8x8xf32>,
    %c0_32 = arith.constant 0 : index
    %c0_33 = arith.constant 0 : index
    %64 = vector.load %arg22[%c0_32, %c0_33] : memref<16x32xf32, #tpu.memory_space<vmem>>, vector<16x32xf32>
    %c0_34 = arith.constant 0 : index
    %c0_35 = arith.constant 0 : index
    %65 = vector.load %arg21[%c0_34, %c0_35] : memref<16x8xf32, #tpu.memory_space<vmem>>, vector<16x8xf32>
    %66 = arith.truncf %65 : vector<16x8xf32> to vector<16x8xbf16>
    %c0_36 = arith.constant 0 : index
    %67 = arith.index_cast %c0_i32_11 : i32 to index
    %c0_37 = arith.constant 0 : index
    %c0_38 = arith.constant 0 : index
    %68 = vector.load %arg8[%c0_36, %67, %c0_37, %c0_38] : memref<1x4x8x32xbf16, #tpu.memory_space<vmem>>, vector<1x1x8x32xbf16>
    %69 = vector.shape_cast %68 : vector<1x1x8x32xbf16> to vector<8x32xbf16>
    %cst_39 = arith.constant dense<0.000000e+00> : vector<16x32xf32>
    %70 = tpu.matmul %66, %69, %cst_39 {dimension_numbers = #tpu.dot_dimension_numbers<[1], [0], [0], [1], [0, 0, 1, 1], [], []>} : vector<16x8xbf16>, vector<8x32xbf16>, vector<16x32xf32> -> vector<16x32xf32>
    %71 = arith.addf %64, %70 : vector<16x32xf32>
    %c0_40 = arith.constant 0 : index
    %c0_41 = arith.constant 0 : index
    %72 = vector.load %arg22[%c0_40, %c0_41] : memref<16x32xf32, #tpu.memory_space<vmem>>, vector<16x32xf32>
    tpu.vector_store %arg22[%c0_40, %c0_41], %71 {strides = array<i32>} : memref<16x32xf32, #tpu.memory_space<vmem>>, vector<16x32xf32>,
    %c1_i32 = arith.constant 1 : i32
    %c0_42 = arith.constant 0 : index
    %73 = arith.index_cast %c1_i32 : i32 to index
    %c0_43 = arith.constant 0 : index
    %c0_44 = arith.constant 0 : index
    %74 = vector.load %arg6[%c0_42, %73, %c0_43, %c0_44] : memref<1x4x32x24xbf16, #tpu.memory_space<vmem>>, vector<1x1x32x24xbf16>
    %75 = vector.shape_cast %74 : vector<1x1x32x24xbf16> to vector<32x24xbf16>
    %c0_45 = arith.constant 0 : index
    %76 = arith.index_cast %c1_i32 : i32 to index
    %c0_46 = arith.constant 0 : index
    %c0_47 = arith.constant 0 : index
    %77 = vector.load %arg7[%c0_45, %76, %c0_46, %c0_47] : memref<1x4x1x24xf32, #tpu.memory_space<vmem>>, vector<1x1x1x24xf32>
    %78 = vector.shape_cast %77 : vector<1x1x1x24xf32> to vector<1x24xf32>
    %cst_48 = arith.constant dense<0.000000e+00> : vector<16x24xf32>
    %79 = tpu.matmul %5, %75, %cst_48 {dimension_numbers = #tpu.dot_dimension_numbers<[1], [0], [0], [1], [0, 0, 1, 1], [], []>} : vector<16x32xbf16>, vector<32x24xbf16>, vector<16x24xf32> -> vector<16x24xf32>
    %80 = vector.broadcast %78 : vector<1x24xf32> to vector<16x24xf32>
    %81 = arith.addf %79, %80 : vector<16x24xf32>
    %82 = vector.extract_strided_slice %81 {offsets = [0, 0], sizes = [16, 8], strides = [1, 1]} : vector<16x24xf32> to vector<16x8xf32>
    %83 = vector.extract_strided_slice %81 {offsets = [0, 8], sizes = [16, 8], strides = [1, 1]} : vector<16x24xf32> to vector<16x8xf32>
    %84 = vector.extract_strided_slice %81 {offsets = [0, 16], sizes = [16, 8], strides = [1, 1]} : vector<16x24xf32> to vector<16x8xf32>
    %85 = vector.extract_strided_slice %82 {offsets = [0, 0], sizes = [8, 8], strides = [1, 1]} : vector<16x8xf32> to vector<8x8xf32>
    %86 = vector.extract_strided_slice %83 {offsets = [0, 0], sizes = [8, 8], strides = [1, 1]} : vector<16x8xf32> to vector<8x8xf32>
    %87 = vector.extract_strided_slice %84 {offsets = [0, 0], sizes = [8, 8], strides = [1, 1]} : vector<16x8xf32> to vector<8x8xf32>
    %88 = tpu.transpose %86, [1, 0] : vector<8x8xf32> -> vector<8x8xf32>
    %cst_49 = arith.constant dense<0.000000e+00> : vector<8x8xf32>
    %89 = tpu.matmul %85, %88, %cst_49 {dimension_numbers = #tpu.dot_dimension_numbers<[1], [0], [0], [1], [0, 0, 1, 1], [], []>} : vector<8x8xf32>, vector<8x8xf32>, vector<8x8xf32> -> vector<8x8xf32>
    %cst_50 = arith.constant 0.353553385 : f32
    %90 = vector.broadcast %cst_50 : f32 to vector<8x8xf32>
    %91 = arith.mulf %89, %90 : vector<8x8xf32>
    %92 = arith.addf %91, %7 : vector<8x8xf32>
    %cst_51 = arith.constant dense<0xFF800000> : vector<8xf32>
    %93 = vector.multi_reduction <maximumf>, %92, %cst_51 [1] : vector<8x8xf32> to vector<8xf32>
    %94 = vector.shape_cast %93 : vector<8xf32> to vector<8x1xf32>
    %95 = vector.broadcast %94 : vector<8x1xf32> to vector<8x8xf32>
    %96 = arith.subf %92, %95 : vector<8x8xf32>
    %97 = math.exp %96 : vector<8x8xf32>
    %cst_52 = arith.constant dense<0.000000e+00> : vector<8xf32>
    %98 = vector.multi_reduction <add>, %97, %cst_52 [1] : vector<8x8xf32> to vector<8xf32>
    %99 = vector.shape_cast %98 : vector<8xf32> to vector<8x1xf32>
    %100 = tpu.reciprocal %99 {approx = true} : vector<8x1xf32> -> vector<8x1xf32>
    %101 = vector.broadcast %100 : vector<8x1xf32> to vector<8x8xf32>
    %102 = arith.mulf %97, %101 : vector<8x8xf32>
    %cst_53 = arith.constant dense<0.000000e+00> : vector<8x8xf32>
    %103 = tpu.matmul %102, %87, %cst_53 {dimension_numbers = #tpu.dot_dimension_numbers<[1], [0], [0], [1], [0, 0, 1, 1], [], []>} : vector<8x8xf32>, vector<8x8xf32>, vector<8x8xf32> -> vector<8x8xf32>
    %c0_54 = arith.constant 0 : index
    %c0_55 = arith.constant 0 : index
    %104 = vector.load %arg21[%c0_54, %c0_55] : memref<16x8xf32, #tpu.memory_space<vmem>>, vector<8x8xf32>
    tpu.vector_store %arg21[%c0_54, %c0_55], %103 {strides = array<i32>} : memref<16x8xf32, #tpu.memory_space<vmem>>, vector<8x8xf32>,
    %105 = vector.extract_strided_slice %82 {offsets = [8, 0], sizes = [8, 8], strides = [1, 1]} : vector<16x8xf32> to vector<8x8xf32>
    %106 = vector.extract_strided_slice %83 {offsets = [8, 0], sizes = [8, 8], strides = [1, 1]} : vector<16x8xf32> to vector<8x8xf32>
    %107 = vector.extract_strided_slice %84 {offsets = [8, 0], sizes = [8, 8], strides = [1, 1]} : vector<16x8xf32> to vector<8x8xf32>
    %108 = tpu.transpose %106, [1, 0] : vector<8x8xf32> -> vector<8x8xf32>
    %cst_56 = arith.constant dense<0.000000e+00> : vector<8x8xf32>
    %109 = tpu.matmul %105, %108, %cst_56 {dimension_numbers = #tpu.dot_dimension_numbers<[1], [0], [0], [1], [0, 0, 1, 1], [], []>} : vector<8x8xf32>, vector<8x8xf32>, vector<8x8xf32> -> vector<8x8xf32>
    %cst_57 = arith.constant 0.353553385 : f32
    %110 = vector.broadcast %cst_57 : f32 to vector<8x8xf32>
    %111 = arith.mulf %109, %110 : vector<8x8xf32>
    %112 = arith.addf %111, %9 : vector<8x8xf32>
    %cst_58 = arith.constant dense<0xFF800000> : vector<8xf32>
    %113 = vector.multi_reduction <maximumf>, %112, %cst_58 [1] : vector<8x8xf32> to vector<8xf32>
    %114 = vector.shape_cast %113 : vector<8xf32> to vector<8x1xf32>
    %115 = vector.broadcast %114 : vector<8x1xf32> to vector<8x8xf32>
    %116 = arith.subf %112, %115 : vector<8x8xf32>
    %117 = math.exp %116 : vector<8x8xf32>
    %cst_59 = arith.constant dense<0.000000e+00> : vector<8xf32>
    %118 = vector.multi_reduction <add>, %117, %cst_59 [1] : vector<8x8xf32> to vector<8xf32>
    %119 = vector.shape_cast %118 : vector<8xf32> to vector<8x1xf32>
    %120 = tpu.reciprocal %119 {approx = true} : vector<8x1xf32> -> vector<8x1xf32>
    %121 = vector.broadcast %120 : vector<8x1xf32> to vector<8x8xf32>
    %122 = arith.mulf %117, %121 : vector<8x8xf32>
    %cst_60 = arith.constant dense<0.000000e+00> : vector<8x8xf32>
    %123 = tpu.matmul %122, %107, %cst_60 {dimension_numbers = #tpu.dot_dimension_numbers<[1], [0], [0], [1], [0, 0, 1, 1], [], []>} : vector<8x8xf32>, vector<8x8xf32>, vector<8x8xf32> -> vector<8x8xf32>
    %c8_61 = arith.constant 8 : index
    %c0_62 = arith.constant 0 : index
    %124 = vector.load %arg21[%c8_61, %c0_62] : memref<16x8xf32, #tpu.memory_space<vmem>>, vector<8x8xf32>
    tpu.vector_store %arg21[%c8_61, %c0_62], %123 {strides = array<i32>} : memref<16x8xf32, #tpu.memory_space<vmem>>, vector<8x8xf32>,
    %c0_63 = arith.constant 0 : index
    %c0_64 = arith.constant 0 : index
    %125 = vector.load %arg22[%c0_63, %c0_64] : memref<16x32xf32, #tpu.memory_space<vmem>>, vector<16x32xf32>
    %c0_65 = arith.constant 0 : index
    %c0_66 = arith.constant 0 : index
    %126 = vector.load %arg21[%c0_65, %c0_66] : memref<16x8xf32, #tpu.memory_space<vmem>>, vector<16x8xf32>
    %127 = arith.truncf %126 : vector<16x8xf32> to vector<16x8xbf16>
    %c0_67 = arith.constant 0 : index
    %128 = arith.index_cast %c1_i32 : i32 to index
    %c0_68 = arith.constant 0 : index
    %c0_69 = arith.constant 0 : index
    %129 = vector.load %arg8[%c0_67, %128, %c0_68, %c0_69] : memref<1x4x8x32xbf16, #tpu.memory_space<vmem>>, vector<1x1x8x32xbf16>
    %130 = vector.shape_cast %129 : vector<1x1x8x32xbf16> to vector<8x32xbf16>
    %cst_70 = arith.constant dense<0.000000e+00> : vector<16x32xf32>
    %131 = tpu.matmul %127, %130, %cst_70 {dimension_numbers = #tpu.dot_dimension_numbers<[1], [0], [0], [1], [0, 0, 1, 1], [], []>} : vector<16x8xbf16>, vector<8x32xbf16>, vector<16x32xf32> -> vector<16x32xf32>
    %132 = arith.addf %125, %131 : vector<16x32xf32>
    %c0_71 = arith.constant 0 : index
    %c0_72 = arith.constant 0 : index
    %133 = vector.load %arg22[%c0_71, %c0_72] : memref<16x32xf32, #tpu.memory_space<vmem>>, vector<16x32xf32>
    tpu.vector_store %arg22[%c0_71, %c0_72], %132 {strides = array<i32>} : memref<16x32xf32, #tpu.memory_space<vmem>>, vector<16x32xf32>,
    %c2_i32 = arith.constant 2 : i32
    %c0_73 = arith.constant 0 : index
    %134 = arith.index_cast %c2_i32 : i32 to index
    %c0_74 = arith.constant 0 : index
    %c0_75 = arith.constant 0 : index
    %135 = vector.load %arg6[%c0_73, %134, %c0_74, %c0_75] : memref<1x4x32x24xbf16, #tpu.memory_space<vmem>>, vector<1x1x32x24xbf16>
    %136 = vector.shape_cast %135 : vector<1x1x32x24xbf16> to vector<32x24xbf16>
    %c0_76 = arith.constant 0 : index
    %137 = arith.index_cast %c2_i32 : i32 to index
    %c0_77 = arith.constant 0 : index
    %c0_78 = arith.constant 0 : index
    %138 = vector.load %arg7[%c0_76, %137, %c0_77, %c0_78] : memref<1x4x1x24xf32, #tpu.memory_space<vmem>>, vector<1x1x1x24xf32>
    %139 = vector.shape_cast %138 : vector<1x1x1x24xf32> to vector<1x24xf32>
    %cst_79 = arith.constant dense<0.000000e+00> : vector<16x24xf32>
    %140 = tpu.matmul %5, %136, %cst_79 {dimension_numbers = #tpu.dot_dimension_numbers<[1], [0], [0], [1], [0, 0, 1, 1], [], []>} : vector<16x32xbf16>, vector<32x24xbf16>, vector<16x24xf32> -> vector<16x24xf32>
    %141 = vector.broadcast %139 : vector<1x24xf32> to vector<16x24xf32>
    %142 = arith.addf %140, %141 : vector<16x24xf32>
    %143 = vector.extract_strided_slice %142 {offsets = [0, 0], sizes = [16, 8], strides = [1, 1]} : vector<16x24xf32> to vector<16x8xf32>
    %144 = vector.extract_strided_slice %142 {offsets = [0, 8], sizes = [16, 8], strides = [1, 1]} : vector<16x24xf32> to vector<16x8xf32>
    %145 = vector.extract_strided_slice %142 {offsets = [0, 16], sizes = [16, 8], strides = [1, 1]} : vector<16x24xf32> to vector<16x8xf32>
    %146 = vector.extract_strided_slice %143 {offsets = [0, 0], sizes = [8, 8], strides = [1, 1]} : vector<16x8xf32> to vector<8x8xf32>
    %147 = vector.extract_strided_slice %144 {offsets = [0, 0], sizes = [8, 8], strides = [1, 1]} : vector<16x8xf32> to vector<8x8xf32>
    %148 = vector.extract_strided_slice %145 {offsets = [0, 0], sizes = [8, 8], strides = [1, 1]} : vector<16x8xf32> to vector<8x8xf32>
    %149 = tpu.transpose %147, [1, 0] : vector<8x8xf32> -> vector<8x8xf32>
    %cst_80 = arith.constant dense<0.000000e+00> : vector<8x8xf32>
    %150 = tpu.matmul %146, %149, %cst_80 {dimension_numbers = #tpu.dot_dimension_numbers<[1], [0], [0], [1], [0, 0, 1, 1], [], []>} : vector<8x8xf32>, vector<8x8xf32>, vector<8x8xf32> -> vector<8x8xf32>
    %cst_81 = arith.constant 0.353553385 : f32
    %151 = vector.broadcast %cst_81 : f32 to vector<8x8xf32>
    %152 = arith.mulf %150, %151 : vector<8x8xf32>
    %153 = arith.addf %152, %7 : vector<8x8xf32>
    %cst_82 = arith.constant dense<0xFF800000> : vector<8xf32>
    %154 = vector.multi_reduction <maximumf>, %153, %cst_82 [1] : vector<8x8xf32> to vector<8xf32>
    %155 = vector.shape_cast %154 : vector<8xf32> to vector<8x1xf32>
    %156 = vector.broadcast %155 : vector<8x1xf32> to vector<8x8xf32>
    %157 = arith.subf %153, %156 : vector<8x8xf32>
    %158 = math.exp %157 : vector<8x8xf32>
    %cst_83 = arith.constant dense<0.000000e+00> : vector<8xf32>
    %159 = vector.multi_reduction <add>, %158, %cst_83 [1] : vector<8x8xf32> to vector<8xf32>
    %160 = vector.shape_cast %159 : vector<8xf32> to vector<8x1xf32>
    %161 = tpu.reciprocal %160 {approx = true} : vector<8x1xf32> -> vector<8x1xf32>
    %162 = vector.broadcast %161 : vector<8x1xf32> to vector<8x8xf32>
    %163 = arith.mulf %158, %162 : vector<8x8xf32>
    %cst_84 = arith.constant dense<0.000000e+00> : vector<8x8xf32>
    %164 = tpu.matmul %163, %148, %cst_84 {dimension_numbers = #tpu.dot_dimension_numbers<[1], [0], [0], [1], [0, 0, 1, 1], [], []>} : vector<8x8xf32>, vector<8x8xf32>, vector<8x8xf32> -> vector<8x8xf32>
    %c0_85 = arith.constant 0 : index
    %c0_86 = arith.constant 0 : index
    %165 = vector.load %arg21[%c0_85, %c0_86] : memref<16x8xf32, #tpu.memory_space<vmem>>, vector<8x8xf32>
    tpu.vector_store %arg21[%c0_85, %c0_86], %164 {strides = array<i32>} : memref<16x8xf32, #tpu.memory_space<vmem>>, vector<8x8xf32>,
    %166 = vector.extract_strided_slice %143 {offsets = [8, 0], sizes = [8, 8], strides = [1, 1]} : vector<16x8xf32> to vector<8x8xf32>
    %167 = vector.extract_strided_slice %144 {offsets = [8, 0], sizes = [8, 8], strides = [1, 1]} : vector<16x8xf32> to vector<8x8xf32>
    %168 = vector.extract_strided_slice %145 {offsets = [8, 0], sizes = [8, 8], strides = [1, 1]} : vector<16x8xf32> to vector<8x8xf32>
    %169 = tpu.transpose %167, [1, 0] : vector<8x8xf32> -> vector<8x8xf32>
    %cst_87 = arith.constant dense<0.000000e+00> : vector<8x8xf32>
    %170 = tpu.matmul %166, %169, %cst_87 {dimension_numbers = #tpu.dot_dimension_numbers<[1], [0], [0], [1], [0, 0, 1, 1], [], []>} : vector<8x8xf32>, vector<8x8xf32>, vector<8x8xf32> -> vector<8x8xf32>
    %cst_88 = arith.constant 0.353553385 : f32
    %171 = vector.broadcast %cst_88 : f32 to vector<8x8xf32>
    %172 = arith.mulf %170, %171 : vector<8x8xf32>
    %173 = arith.addf %172, %9 : vector<8x8xf32>
    %cst_89 = arith.constant dense<0xFF800000> : vector<8xf32>
    %174 = vector.multi_reduction <maximumf>, %173, %cst_89 [1] : vector<8x8xf32> to vector<8xf32>
    %175 = vector.shape_cast %174 : vector<8xf32> to vector<8x1xf32>
    %176 = vector.broadcast %175 : vector<8x1xf32> to vector<8x8xf32>
    %177 = arith.subf %173, %176 : vector<8x8xf32>
    %178 = math.exp %177 : vector<8x8xf32>
    %cst_90 = arith.constant dense<0.000000e+00> : vector<8xf32>
    %179 = vector.multi_reduction <add>, %178, %cst_90 [1] : vector<8x8xf32> to vector<8xf32>
    %180 = vector.shape_cast %179 : vector<8xf32> to vector<8x1xf32>
    %181 = tpu.reciprocal %180 {approx = true} : vector<8x1xf32> -> vector<8x1xf32>
    %182 = vector.broadcast %181 : vector<8x1xf32> to vector<8x8xf32>
    %183 = arith.mulf %178, %182 : vector<8x8xf32>
    %cst_91 = arith.constant dense<0.000000e+00> : vector<8x8xf32>
    %184 = tpu.matmul %183, %168, %cst_91 {dimension_numbers = #tpu.dot_dimension_numbers<[1], [0], [0], [1], [0, 0, 1, 1], [], []>} : vector<8x8xf32>, vector<8x8xf32>, vector<8x8xf32> -> vector<8x8xf32>
    %c8_92 = arith.constant 8 : index
    %c0_93 = arith.constant 0 : index
    %185 = vector.load %arg21[%c8_92, %c0_93] : memref<16x8xf32, #tpu.memory_space<vmem>>, vector<8x8xf32>
    tpu.vector_store %arg21[%c8_92, %c0_93], %184 {strides = array<i32>} : memref<16x8xf32, #tpu.memory_space<vmem>>, vector<8x8xf32>,
    %c0_94 = arith.constant 0 : index
    %c0_95 = arith.constant 0 : index
    %186 = vector.load %arg22[%c0_94, %c0_95] : memref<16x32xf32, #tpu.memory_space<vmem>>, vector<16x32xf32>
    %c0_96 = arith.constant 0 : index
    %c0_97 = arith.constant 0 : index
    %187 = vector.load %arg21[%c0_96, %c0_97] : memref<16x8xf32, #tpu.memory_space<vmem>>, vector<16x8xf32>
    %188 = arith.truncf %187 : vector<16x8xf32> to vector<16x8xbf16>
    %c0_98 = arith.constant 0 : index
    %189 = arith.index_cast %c2_i32 : i32 to index
    %c0_99 = arith.constant 0 : index
    %c0_100 = arith.constant 0 : index
    %190 = vector.load %arg8[%c0_98, %189, %c0_99, %c0_100] : memref<1x4x8x32xbf16, #tpu.memory_space<vmem>>, vector<1x1x8x32xbf16>
    %191 = vector.shape_cast %190 : vector<1x1x8x32xbf16> to vector<8x32xbf16>
    %cst_101 = arith.constant dense<0.000000e+00> : vector<16x32xf32>
    %192 = tpu.matmul %188, %191, %cst_101 {dimension_numbers = #tpu.dot_dimension_numbers<[1], [0], [0], [1], [0, 0, 1, 1], [], []>} : vector<16x8xbf16>, vector<8x32xbf16>, vector<16x32xf32> -> vector<16x32xf32>
    %193 = arith.addf %186, %192 : vector<16x32xf32>
    %c0_102 = arith.constant 0 : index
    %c0_103 = arith.constant 0 : index
    %194 = vector.load %arg22[%c0_102, %c0_103] : memref<16x32xf32, #tpu.memory_space<vmem>>, vector<16x32xf32>
    tpu.vector_store %arg22[%c0_102, %c0_103], %193 {strides = array<i32>} : memref<16x32xf32, #tpu.memory_space<vmem>>, vector<16x32xf32>,
    %c3_i32 = arith.constant 3 : i32
    %c0_104 = arith.constant 0 : index
    %195 = arith.index_cast %c3_i32 : i32 to index
    %c0_105 = arith.constant 0 : index
    %c0_106 = arith.constant 0 : index
    %196 = vector.load %arg6[%c0_104, %195, %c0_105, %c0_106] : memref<1x4x32x24xbf16, #tpu.memory_space<vmem>>, vector<1x1x32x24xbf16>
    %197 = vector.shape_cast %196 : vector<1x1x32x24xbf16> to vector<32x24xbf16>
    %c0_107 = arith.constant 0 : index
    %198 = arith.index_cast %c3_i32 : i32 to index
    %c0_108 = arith.constant 0 : index
    %c0_109 = arith.constant 0 : index
    %199 = vector.load %arg7[%c0_107, %198, %c0_108, %c0_109] : memref<1x4x1x24xf32, #tpu.memory_space<vmem>>, vector<1x1x1x24xf32>
    %200 = vector.shape_cast %199 : vector<1x1x1x24xf32> to vector<1x24xf32>
    %cst_110 = arith.constant dense<0.000000e+00> : vector<16x24xf32>
    %201 = tpu.matmul %5, %197, %cst_110 {dimension_numbers = #tpu.dot_dimension_numbers<[1], [0], [0], [1], [0, 0, 1, 1], [], []>} : vector<16x32xbf16>, vector<32x24xbf16>, vector<16x24xf32> -> vector<16x24xf32>
    %202 = vector.broadcast %200 : vector<1x24xf32> to vector<16x24xf32>
    %203 = arith.addf %201, %202 : vector<16x24xf32>
    %204 = vector.extract_strided_slice %203 {offsets = [0, 0], sizes = [16, 8], strides = [1, 1]} : vector<16x24xf32> to vector<16x8xf32>
    %205 = vector.extract_strided_slice %203 {offsets = [0, 8], sizes = [16, 8], strides = [1, 1]} : vector<16x24xf32> to vector<16x8xf32>
    %206 = vector.extract_strided_slice %203 {offsets = [0, 16], sizes = [16, 8], strides = [1, 1]} : vector<16x24xf32> to vector<16x8xf32>
    %207 = vector.extract_strided_slice %204 {offsets = [0, 0], sizes = [8, 8], strides = [1, 1]} : vector<16x8xf32> to vector<8x8xf32>
    %208 = vector.extract_strided_slice %205 {offsets = [0, 0], sizes = [8, 8], strides = [1, 1]} : vector<16x8xf32> to vector<8x8xf32>
    %209 = vector.extract_strided_slice %206 {offsets = [0, 0], sizes = [8, 8], strides = [1, 1]} : vector<16x8xf32> to vector<8x8xf32>
    %210 = tpu.transpose %208, [1, 0] : vector<8x8xf32> -> vector<8x8xf32>
    %cst_111 = arith.constant dense<0.000000e+00> : vector<8x8xf32>
    %211 = tpu.matmul %207, %210, %cst_111 {dimension_numbers = #tpu.dot_dimension_numbers<[1], [0], [0], [1], [0, 0, 1, 1], [], []>} : vector<8x8xf32>, vector<8x8xf32>, vector<8x8xf32> -> vector<8x8xf32>
    %cst_112 = arith.constant 0.353553385 : f32
    %212 = vector.broadcast %cst_112 : f32 to vector<8x8xf32>
    %213 = arith.mulf %211, %212 : vector<8x8xf32>
    %214 = arith.addf %213, %7 : vector<8x8xf32>
    %cst_113 = arith.constant dense<0xFF800000> : vector<8xf32>
    %215 = vector.multi_reduction <maximumf>, %214, %cst_113 [1] : vector<8x8xf32> to vector<8xf32>
    %216 = vector.shape_cast %215 : vector<8xf32> to vector<8x1xf32>
    %217 = vector.broadcast %216 : vector<8x1xf32> to vector<8x8xf32>
    %218 = arith.subf %214, %217 : vector<8x8xf32>
    %219 = math.exp %218 : vector<8x8xf32>
    %cst_114 = arith.constant dense<0.000000e+00> : vector<8xf32>
    %220 = vector.multi_reduction <add>, %219, %cst_114 [1] : vector<8x8xf32> to vector<8xf32>
    %221 = vector.shape_cast %220 : vector<8xf32> to vector<8x1xf32>
    %222 = tpu.reciprocal %221 {approx = true} : vector<8x1xf32> -> vector<8x1xf32>
    %223 = vector.broadcast %222 : vector<8x1xf32> to vector<8x8xf32>
    %224 = arith.mulf %219, %223 : vector<8x8xf32>
    %cst_115 = arith.constant dense<0.000000e+00> : vector<8x8xf32>
    %225 = tpu.matmul %224, %209, %cst_115 {dimension_numbers = #tpu.dot_dimension_numbers<[1], [0], [0], [1], [0, 0, 1, 1], [], []>} : vector<8x8xf32>, vector<8x8xf32>, vector<8x8xf32> -> vector<8x8xf32>
    %c0_116 = arith.constant 0 : index
    %c0_117 = arith.constant 0 : index
    %226 = vector.load %arg21[%c0_116, %c0_117] : memref<16x8xf32, #tpu.memory_space<vmem>>, vector<8x8xf32>
    tpu.vector_store %arg21[%c0_116, %c0_117], %225 {strides = array<i32>} : memref<16x8xf32, #tpu.memory_space<vmem>>, vector<8x8xf32>,
    %227 = vector.extract_strided_slice %204 {offsets = [8, 0], sizes = [8, 8], strides = [1, 1]} : vector<16x8xf32> to vector<8x8xf32>
    %228 = vector.extract_strided_slice %205 {offsets = [8, 0], sizes = [8, 8], strides = [1, 1]} : vector<16x8xf32> to vector<8x8xf32>
    %229 = vector.extract_strided_slice %206 {offsets = [8, 0], sizes = [8, 8], strides = [1, 1]} : vector<16x8xf32> to vector<8x8xf32>
    %230 = tpu.transpose %228, [1, 0] : vector<8x8xf32> -> vector<8x8xf32>
    %cst_118 = arith.constant dense<0.000000e+00> : vector<8x8xf32>
    %231 = tpu.matmul %227, %230, %cst_118 {dimension_numbers = #tpu.dot_dimension_numbers<[1], [0], [0], [1], [0, 0, 1, 1], [], []>} : vector<8x8xf32>, vector<8x8xf32>, vector<8x8xf32> -> vector<8x8xf32>
    %cst_119 = arith.constant 0.353553385 : f32
    %232 = vector.broadcast %cst_119 : f32 to vector<8x8xf32>
    %233 = arith.mulf %231, %232 : vector<8x8xf32>
    %234 = arith.addf %233, %9 : vector<8x8xf32>
    %cst_120 = arith.constant dense<0xFF800000> : vector<8xf32>
    %235 = vector.multi_reduction <maximumf>, %234, %cst_120 [1] : vector<8x8xf32> to vector<8xf32>
    %236 = vector.shape_cast %235 : vector<8xf32> to vector<8x1xf32>
    %237 = vector.broadcast %236 : vector<8x1xf32> to vector<8x8xf32>
    %238 = arith.subf %234, %237 : vector<8x8xf32>
    %239 = math.exp %238 : vector<8x8xf32>
    %cst_121 = arith.constant dense<0.000000e+00> : vector<8xf32>
    %240 = vector.multi_reduction <add>, %239, %cst_121 [1] : vector<8x8xf32> to vector<8xf32>
    %241 = vector.shape_cast %240 : vector<8xf32> to vector<8x1xf32>
    %242 = tpu.reciprocal %241 {approx = true} : vector<8x1xf32> -> vector<8x1xf32>
    %243 = vector.broadcast %242 : vector<8x1xf32> to vector<8x8xf32>
    %244 = arith.mulf %239, %243 : vector<8x8xf32>
    %cst_122 = arith.constant dense<0.000000e+00> : vector<8x8xf32>
    %245 = tpu.matmul %244, %229, %cst_122 {dimension_numbers = #tpu.dot_dimension_numbers<[1], [0], [0], [1], [0, 0, 1, 1], [], []>} : vector<8x8xf32>, vector<8x8xf32>, vector<8x8xf32> -> vector<8x8xf32>
    %c8_123 = arith.constant 8 : index
    %c0_124 = arith.constant 0 : index
    %246 = vector.load %arg21[%c8_123, %c0_124] : memref<16x8xf32, #tpu.memory_space<vmem>>, vector<8x8xf32>
    tpu.vector_store %arg21[%c8_123, %c0_124], %245 {strides = array<i32>} : memref<16x8xf32, #tpu.memory_space<vmem>>, vector<8x8xf32>,
    %c0_125 = arith.constant 0 : index
    %c0_126 = arith.constant 0 : index
    %247 = vector.load %arg22[%c0_125, %c0_126] : memref<16x32xf32, #tpu.memory_space<vmem>>, vector<16x32xf32>
    %c0_127 = arith.constant 0 : index
    %c0_128 = arith.constant 0 : index
    %248 = vector.load %arg21[%c0_127, %c0_128] : memref<16x8xf32, #tpu.memory_space<vmem>>, vector<16x8xf32>
    %249 = arith.truncf %248 : vector<16x8xf32> to vector<16x8xbf16>
    %c0_129 = arith.constant 0 : index
    %250 = arith.index_cast %c3_i32 : i32 to index
    %c0_130 = arith.constant 0 : index
    %c0_131 = arith.constant 0 : index
    %251 = vector.load %arg8[%c0_129, %250, %c0_130, %c0_131] : memref<1x4x8x32xbf16, #tpu.memory_space<vmem>>, vector<1x1x8x32xbf16>
    %252 = vector.shape_cast %251 : vector<1x1x8x32xbf16> to vector<8x32xbf16>
    %cst_132 = arith.constant dense<0.000000e+00> : vector<16x32xf32>
    %253 = tpu.matmul %249, %252, %cst_132 {dimension_numbers = #tpu.dot_dimension_numbers<[1], [0], [0], [1], [0, 0, 1, 1], [], []>} : vector<16x8xbf16>, vector<8x32xbf16>, vector<16x32xf32> -> vector<16x32xf32>
    %254 = arith.addf %247, %253 : vector<16x32xf32>
    %c0_133 = arith.constant 0 : index
    %c0_134 = arith.constant 0 : index
    %255 = vector.load %arg22[%c0_133, %c0_134] : memref<16x32xf32, #tpu.memory_space<vmem>>, vector<16x32xf32>
    tpu.vector_store %arg22[%c0_133, %c0_134], %254 {strides = array<i32>} : memref<16x32xf32, #tpu.memory_space<vmem>>, vector<16x32xf32>,
    %c4_i32 = arith.constant 4 : i32
    %c0_135 = arith.constant 0 : index
    %c0_136 = arith.constant 0 : index
    %256 = vector.load %arg22[%c0_135, %c0_136] : memref<16x32xf32, #tpu.memory_space<vmem>>, vector<16x32xf32>
    %c0_137 = arith.constant 0 : index
    %c0_138 = arith.constant 0 : index
    %c0_139 = arith.constant 0 : index
    %257 = vector.load %arg9[%c0_137, %c0_138, %c0_139] : memref<1x1x32xf32, #tpu.memory_space<vmem>>, vector<1x1x32xf32>
    %258 = vector.shape_cast %257 : vector<1x1x32xf32> to vector<1x32xf32>
    %259 = vector.broadcast %258 : vector<1x32xf32> to vector<16x32xf32>
    %260 = arith.addf %256, %259 : vector<16x32xf32>
    %261 = arith.addf %260, %3 : vector<16x32xf32>
    %c0_140 = arith.constant 0 : index
    %c0_141 = arith.constant 0 : index
    %c0_142 = arith.constant 0 : index
    %c0_143 = arith.constant 0 : index
    %262 = vector.load %arg14[%c0_140, %c0_141, %c0_142, %c0_143] : memref<1x3x1x32xf32, #tpu.memory_space<vmem>>, vector<1x1x1x32xf32>
    %263 = vector.shape_cast %262 : vector<1x1x1x32xf32> to vector<1x32xf32>
    %c0_144 = arith.constant 0 : index
    %c0_145 = arith.constant 0 : index
    %c0_146 = arith.constant 0 : index
    %c0_147 = arith.constant 0 : index
    %264 = vector.load %arg15[%c0_144, %c0_145, %c0_146, %c0_147] : memref<1x3x1x32xf32, #tpu.memory_space<vmem>>, vector<1x1x1x32xf32>
    %265 = vector.shape_cast %264 : vector<1x1x1x32xf32> to vector<1x32xf32>
    %cst_148 = arith.constant dense<0.000000e+00> : vector<16xf32>
    %266 = vector.multi_reduction <add>, %261, %cst_148 [1] : vector<16x32xf32> to vector<16xf32>
    %267 = vector.shape_cast %266 : vector<16xf32> to vector<16x1xf32>
    %cst_149 = arith.constant 3.200000e+01 : f32
    %268 = vector.broadcast %cst_149 : f32 to vector<16x1xf32>
    %269 = arith.divf %267, %268 : vector<16x1xf32>
    %270 = vector.broadcast %269 : vector<16x1xf32> to vector<16x32xf32>
    %271 = arith.subf %261, %270 : vector<16x32xf32>
    %272 = arith.mulf %271, %271 : vector<16x32xf32>
    %cst_150 = arith.constant dense<0.000000e+00> : vector<16xf32>
    %273 = vector.multi_reduction <add>, %272, %cst_150 [1] : vector<16x32xf32> to vector<16xf32>
    %274 = vector.shape_cast %273 : vector<16xf32> to vector<16x1xf32>
    %cst_151 = arith.constant 3.200000e+01 : f32
    %275 = vector.broadcast %cst_151 : f32 to vector<16x1xf32>
    %276 = arith.divf %274, %275 : vector<16x1xf32>
    %277 = vector.broadcast %269 : vector<16x1xf32> to vector<16x32xf32>
    %278 = arith.subf %261, %277 : vector<16x32xf32>
    %cst_152 = arith.constant 9.99999974E-6 : f32
    %279 = vector.broadcast %cst_152 : f32 to vector<16x1xf32>
    %280 = arith.addf %276, %279 : vector<16x1xf32>
    %281 = math.rsqrt %280 : vector<16x1xf32>
    %282 = vector.broadcast %281 : vector<16x1xf32> to vector<16x32xf32>
    %283 = arith.mulf %278, %282 : vector<16x32xf32>
    %284 = vector.broadcast %263 : vector<1x32xf32> to vector<16x32xf32>
    %285 = arith.mulf %283, %284 : vector<16x32xf32>
    %286 = vector.broadcast %265 : vector<1x32xf32> to vector<16x32xf32>
    %287 = arith.addf %285, %286 : vector<16x32xf32>
    %288 = arith.truncf %287 : vector<16x32xf32> to vector<16x32xbf16>
    %c0_153 = arith.constant 0 : index
    %c0_154 = arith.constant 0 : index
    %c0_155 = arith.constant 0 : index
    %289 = vector.load %arg5[%c0_153, %c0_154, %c0_155] : memref<2x1x8xf32, #tpu.memory_space<vmem>>, vector<1x1x8xf32>
    %290 = vector.shape_cast %289 : vector<1x1x8xf32> to vector<1x8xf32>
    %291 = vector.shape_cast %290 : vector<1x8xf32> to vector<1x8xf32>
    %292 = vector.broadcast %291 : vector<1x8xf32> to vector<8x8xf32>
    %c1_156 = arith.constant 1 : index
    %c0_157 = arith.constant 0 : index
    %c0_158 = arith.constant 0 : index
    %293 = vector.load %arg5[%c1_156, %c0_157, %c0_158] : memref<2x1x8xf32, #tpu.memory_space<vmem>>, vector<1x1x8xf32>
    %294 = vector.shape_cast %293 : vector<1x1x8xf32> to vector<1x8xf32>
    %295 = vector.shape_cast %294 : vector<1x8xf32> to vector<1x8xf32>
    %296 = vector.broadcast %295 : vector<1x8xf32> to vector<8x8xf32>
    %cst_159 = arith.constant 0.000000e+00 : f32
    %297 = vector.broadcast %cst_159 : f32 to vector<16x32xf32>
    %c0_160 = arith.constant 0 : index
    %c0_161 = arith.constant 0 : index
    %298 = vector.load %arg22[%c0_160, %c0_161] : memref<16x32xf32, #tpu.memory_space<vmem>>, vector<16x32xf32>
    tpu.vector_store %arg22[%c0_160, %c0_161], %297 {strides = array<i32>} : memref<16x32xf32, #tpu.memory_space<vmem>>, vector<16x32xf32>,
    %c0_i32_162 = arith.constant 0 : i32
    %c0_163 = arith.constant 0 : index
    %299 = arith.index_cast %c0_i32_162 : i32 to index
    %c0_164 = arith.constant 0 : index
    %c0_165 = arith.constant 0 : index
    %300 = vector.load %arg10[%c0_163, %299, %c0_164, %c0_165] : memref<1x4x32x24xbf16, #tpu.memory_space<vmem>>, vector<1x1x32x24xbf16>
    %301 = vector.shape_cast %300 : vector<1x1x32x24xbf16> to vector<32x24xbf16>
    %c0_166 = arith.constant 0 : index
    %302 = arith.index_cast %c0_i32_162 : i32 to index
    %c0_167 = arith.constant 0 : index
    %c0_168 = arith.constant 0 : index
    %303 = vector.load %arg11[%c0_166, %302, %c0_167, %c0_168] : memref<1x4x1x24xf32, #tpu.memory_space<vmem>>, vector<1x1x1x24xf32>
    %304 = vector.shape_cast %303 : vector<1x1x1x24xf32> to vector<1x24xf32>
    %305 = vector.extract_strided_slice %301 {offsets = [0, 0], sizes = [32, 8], strides = [1, 1]} : vector<32x24xbf16> to vector<32x8xbf16>
    %cst_169 = arith.constant dense<0.000000e+00> : vector<16x8xf32>
    %306 = tpu.matmul %288, %305, %cst_169 {dimension_numbers = #tpu.dot_dimension_numbers<[1], [0], [0], [1], [0, 0, 1, 1], [], []>} : vector<16x32xbf16>, vector<32x8xbf16>, vector<16x8xf32> -> vector<16x8xf32>
    %307 = vector.extract_strided_slice %304 {offsets = [0, 0], sizes = [1, 8], strides = [1, 1]} : vector<1x24xf32> to vector<1x8xf32>
    %308 = vector.broadcast %307 : vector<1x8xf32> to vector<16x8xf32>
    %309 = arith.addf %306, %308 : vector<16x8xf32>
    %310 = vector.extract_strided_slice %301 {offsets = [0, 8], sizes = [32, 16], strides = [1, 1]} : vector<32x24xbf16> to vector<32x16xbf16>
    %cst_170 = arith.constant dense<0.000000e+00> : vector<16x16xf32>
    %311 = tpu.matmul %4, %310, %cst_170 {dimension_numbers = #tpu.dot_dimension_numbers<[1], [0], [0], [1], [0, 0, 1, 1], [], []>} : vector<16x32xbf16>, vector<32x16xbf16>, vector<16x16xf32> -> vector<16x16xf32>
    %312 = vector.extract_strided_slice %304 {offsets = [0, 8], sizes = [1, 16], strides = [1, 1]} : vector<1x24xf32> to vector<1x16xf32>
    %313 = vector.broadcast %312 : vector<1x16xf32> to vector<16x16xf32>
    %314 = arith.addf %311, %313 : vector<16x16xf32>
    %315 = vector.extract_strided_slice %314 {offsets = [0, 0], sizes = [16, 8], strides = [1, 1]} : vector<16x16xf32> to vector<16x8xf32>
    %316 = vector.extract_strided_slice %314 {offsets = [0, 8], sizes = [16, 8], strides = [1, 1]} : vector<16x16xf32> to vector<16x8xf32>
    %317 = vector.extract_strided_slice %309 {offsets = [0, 0], sizes = [8, 8], strides = [1, 1]} : vector<16x8xf32> to vector<8x8xf32>
    %318 = vector.extract_strided_slice %315 {offsets = [0, 0], sizes = [8, 8], strides = [1, 1]} : vector<16x8xf32> to vector<8x8xf32>
    %319 = vector.extract_strided_slice %316 {offsets = [0, 0], sizes = [8, 8], strides = [1, 1]} : vector<16x8xf32> to vector<8x8xf32>
    %320 = tpu.transpose %318, [1, 0] : vector<8x8xf32> -> vector<8x8xf32>
    %cst_171 = arith.constant dense<0.000000e+00> : vector<8x8xf32>
    %321 = tpu.matmul %317, %320, %cst_171 {dimension_numbers = #tpu.dot_dimension_numbers<[1], [0], [0], [1], [0, 0, 1, 1], [], []>} : vector<8x8xf32>, vector<8x8xf32>, vector<8x8xf32> -> vector<8x8xf32>
    %cst_172 = arith.constant 0.353553385 : f32
    %322 = vector.broadcast %cst_172 : f32 to vector<8x8xf32>
    %323 = arith.mulf %321, %322 : vector<8x8xf32>
    %324 = arith.addf %323, %292 : vector<8x8xf32>
    %cst_173 = arith.constant dense<0xFF800000> : vector<8xf32>
    %325 = vector.multi_reduction <maximumf>, %324, %cst_173 [1] : vector<8x8xf32> to vector<8xf32>
    %326 = vector.shape_cast %325 : vector<8xf32> to vector<8x1xf32>
    %327 = vector.broadcast %326 : vector<8x1xf32> to vector<8x8xf32>
    %328 = arith.subf %324, %327 : vector<8x8xf32>
    %329 = math.exp %328 : vector<8x8xf32>
    %cst_174 = arith.constant dense<0.000000e+00> : vector<8xf32>
    %330 = vector.multi_reduction <add>, %329, %cst_174 [1] : vector<8x8xf32> to vector<8xf32>
    %331 = vector.shape_cast %330 : vector<8xf32> to vector<8x1xf32>
    %332 = tpu.reciprocal %331 {approx = true} : vector<8x1xf32> -> vector<8x1xf32>
    %333 = vector.broadcast %332 : vector<8x1xf32> to vector<8x8xf32>
    %334 = arith.mulf %329, %333 : vector<8x8xf32>
    %cst_175 = arith.constant dense<0.000000e+00> : vector<8x8xf32>
    %335 = tpu.matmul %334, %319, %cst_175 {dimension_numbers = #tpu.dot_dimension_numbers<[1], [0], [0], [1], [0, 0, 1, 1], [], []>} : vector<8x8xf32>, vector<8x8xf32>, vector<8x8xf32> -> vector<8x8xf32>
    %c0_176 = arith.constant 0 : index
    %c0_177 = arith.constant 0 : index
    %336 = vector.load %arg21[%c0_176, %c0_177] : memref<16x8xf32, #tpu.memory_space<vmem>>, vector<8x8xf32>
    tpu.vector_store %arg21[%c0_176, %c0_177], %335 {strides = array<i32>} : memref<16x8xf32, #tpu.memory_space<vmem>>, vector<8x8xf32>,
    %337 = vector.extract_strided_slice %309 {offsets = [8, 0], sizes = [8, 8], strides = [1, 1]} : vector<16x8xf32> to vector<8x8xf32>
    %338 = vector.extract_strided_slice %315 {offsets = [8, 0], sizes = [8, 8], strides = [1, 1]} : vector<16x8xf32> to vector<8x8xf32>
    %339 = vector.extract_strided_slice %316 {offsets = [8, 0], sizes = [8, 8], strides = [1, 1]} : vector<16x8xf32> to vector<8x8xf32>
    %340 = tpu.transpose %338, [1, 0] : vector<8x8xf32> -> vector<8x8xf32>
    %cst_178 = arith.constant dense<0.000000e+00> : vector<8x8xf32>
    %341 = tpu.matmul %337, %340, %cst_178 {dimension_numbers = #tpu.dot_dimension_numbers<[1], [0], [0], [1], [0, 0, 1, 1], [], []>} : vector<8x8xf32>, vector<8x8xf32>, vector<8x8xf32> -> vector<8x8xf32>
    %cst_179 = arith.constant 0.353553385 : f32
    %342 = vector.broadcast %cst_179 : f32 to vector<8x8xf32>
    %343 = arith.mulf %341, %342 : vector<8x8xf32>
    %344 = arith.addf %343, %296 : vector<8x8xf32>
    %cst_180 = arith.constant dense<0xFF800000> : vector<8xf32>
    %345 = vector.multi_reduction <maximumf>, %344, %cst_180 [1] : vector<8x8xf32> to vector<8xf32>
    %346 = vector.shape_cast %345 : vector<8xf32> to vector<8x1xf32>
    %347 = vector.broadcast %346 : vector<8x1xf32> to vector<8x8xf32>
    %348 = arith.subf %344, %347 : vector<8x8xf32>
    %349 = math.exp %348 : vector<8x8xf32>
    %cst_181 = arith.constant dense<0.000000e+00> : vector<8xf32>
    %350 = vector.multi_reduction <add>, %349, %cst_181 [1] : vector<8x8xf32> to vector<8xf32>
    %351 = vector.shape_cast %350 : vector<8xf32> to vector<8x1xf32>
    %352 = tpu.reciprocal %351 {approx = true} : vector<8x1xf32> -> vector<8x1xf32>
    %353 = vector.broadcast %352 : vector<8x1xf32> to vector<8x8xf32>
    %354 = arith.mulf %349, %353 : vector<8x8xf32>
    %cst_182 = arith.constant dense<0.000000e+00> : vector<8x8xf32>
    %355 = tpu.matmul %354, %339, %cst_182 {dimension_numbers = #tpu.dot_dimension_numbers<[1], [0], [0], [1], [0, 0, 1, 1], [], []>} : vector<8x8xf32>, vector<8x8xf32>, vector<8x8xf32> -> vector<8x8xf32>
    %c8_183 = arith.constant 8 : index
    %c0_184 = arith.constant 0 : index
    %356 = vector.load %arg21[%c8_183, %c0_184] : memref<16x8xf32, #tpu.memory_space<vmem>>, vector<8x8xf32>
    tpu.vector_store %arg21[%c8_183, %c0_184], %355 {strides = array<i32>} : memref<16x8xf32, #tpu.memory_space<vmem>>, vector<8x8xf32>,
    %c0_185 = arith.constant 0 : index
    %c0_186 = arith.constant 0 : index
    %357 = vector.load %arg22[%c0_185, %c0_186] : memref<16x32xf32, #tpu.memory_space<vmem>>, vector<16x32xf32>
    %c0_187 = arith.constant 0 : index
    %c0_188 = arith.constant 0 : index
    %358 = vector.load %arg21[%c0_187, %c0_188] : memref<16x8xf32, #tpu.memory_space<vmem>>, vector<16x8xf32>
    %359 = arith.truncf %358 : vector<16x8xf32> to vector<16x8xbf16>
    %c0_189 = arith.constant 0 : index
    %360 = arith.index_cast %c0_i32_162 : i32 to index
    %c0_190 = arith.constant 0 : index
    %c0_191 = arith.constant 0 : index
    %361 = vector.load %arg12[%c0_189, %360, %c0_190, %c0_191] : memref<1x4x8x32xbf16, #tpu.memory_space<vmem>>, vector<1x1x8x32xbf16>
    %362 = vector.shape_cast %361 : vector<1x1x8x32xbf16> to vector<8x32xbf16>
    %cst_192 = arith.constant dense<0.000000e+00> : vector<16x32xf32>
    %363 = tpu.matmul %359, %362, %cst_192 {dimension_numbers = #tpu.dot_dimension_numbers<[1], [0], [0], [1], [0, 0, 1, 1], [], []>} : vector<16x8xbf16>, vector<8x32xbf16>, vector<16x32xf32> -> vector<16x32xf32>
    %364 = arith.addf %357, %363 : vector<16x32xf32>
    %c0_193 = arith.constant 0 : index
    %c0_194 = arith.constant 0 : index
    %365 = vector.load %arg22[%c0_193, %c0_194] : memref<16x32xf32, #tpu.memory_space<vmem>>, vector<16x32xf32>
    tpu.vector_store %arg22[%c0_193, %c0_194], %364 {strides = array<i32>} : memref<16x32xf32, #tpu.memory_space<vmem>>, vector<16x32xf32>,
    %c1_i32_195 = arith.constant 1 : i32
    %c0_196 = arith.constant 0 : index
    %366 = arith.index_cast %c1_i32_195 : i32 to index
    %c0_197 = arith.constant 0 : index
    %c0_198 = arith.constant 0 : index
    %367 = vector.load %arg10[%c0_196, %366, %c0_197, %c0_198] : memref<1x4x32x24xbf16, #tpu.memory_space<vmem>>, vector<1x1x32x24xbf16>
    %368 = vector.shape_cast %367 : vector<1x1x32x24xbf16> to vector<32x24xbf16>
    %c0_199 = arith.constant 0 : index
    %369 = arith.index_cast %c1_i32_195 : i32 to index
    %c0_200 = arith.constant 0 : index
    %c0_201 = arith.constant 0 : index
    %370 = vector.load %arg11[%c0_199, %369, %c0_200, %c0_201] : memref<1x4x1x24xf32, #tpu.memory_space<vmem>>, vector<1x1x1x24xf32>
    %371 = vector.shape_cast %370 : vector<1x1x1x24xf32> to vector<1x24xf32>
    %372 = vector.extract_strided_slice %368 {offsets = [0, 0], sizes = [32, 8], strides = [1, 1]} : vector<32x24xbf16> to vector<32x8xbf16>
    %cst_202 = arith.constant dense<0.000000e+00> : vector<16x8xf32>
    %373 = tpu.matmul %288, %372, %cst_202 {dimension_numbers = #tpu.dot_dimension_numbers<[1], [0], [0], [1], [0, 0, 1, 1], [], []>} : vector<16x32xbf16>, vector<32x8xbf16>, vector<16x8xf32> -> vector<16x8xf32>
    %374 = vector.extract_strided_slice %371 {offsets = [0, 0], sizes = [1, 8], strides = [1, 1]} : vector<1x24xf32> to vector<1x8xf32>
    %375 = vector.broadcast %374 : vector<1x8xf32> to vector<16x8xf32>
    %376 = arith.addf %373, %375 : vector<16x8xf32>
    %377 = vector.extract_strided_slice %368 {offsets = [0, 8], sizes = [32, 16], strides = [1, 1]} : vector<32x24xbf16> to vector<32x16xbf16>
    %cst_203 = arith.constant dense<0.000000e+00> : vector<16x16xf32>
    %378 = tpu.matmul %4, %377, %cst_203 {dimension_numbers = #tpu.dot_dimension_numbers<[1], [0], [0], [1], [0, 0, 1, 1], [], []>} : vector<16x32xbf16>, vector<32x16xbf16>, vector<16x16xf32> -> vector<16x16xf32>
    %379 = vector.extract_strided_slice %371 {offsets = [0, 8], sizes = [1, 16], strides = [1, 1]} : vector<1x24xf32> to vector<1x16xf32>
    %380 = vector.broadcast %379 : vector<1x16xf32> to vector<16x16xf32>
    %381 = arith.addf %378, %380 : vector<16x16xf32>
    %382 = vector.extract_strided_slice %381 {offsets = [0, 0], sizes = [16, 8], strides = [1, 1]} : vector<16x16xf32> to vector<16x8xf32>
    %383 = vector.extract_strided_slice %381 {offsets = [0, 8], sizes = [16, 8], strides = [1, 1]} : vector<16x16xf32> to vector<16x8xf32>
    %384 = vector.extract_strided_slice %376 {offsets = [0, 0], sizes = [8, 8], strides = [1, 1]} : vector<16x8xf32> to vector<8x8xf32>
    %385 = vector.extract_strided_slice %382 {offsets = [0, 0], sizes = [8, 8], strides = [1, 1]} : vector<16x8xf32> to vector<8x8xf32>
    %386 = vector.extract_strided_slice %383 {offsets = [0, 0], sizes = [8, 8], strides = [1, 1]} : vector<16x8xf32> to vector<8x8xf32>
    %387 = tpu.transpose %385, [1, 0] : vector<8x8xf32> -> vector<8x8xf32>
    %cst_204 = arith.constant dense<0.000000e+00> : vector<8x8xf32>
    %388 = tpu.matmul %384, %387, %cst_204 {dimension_numbers = #tpu.dot_dimension_numbers<[1], [0], [0], [1], [0, 0, 1, 1], [], []>} : vector<8x8xf32>, vector<8x8xf32>, vector<8x8xf32> -> vector<8x8xf32>
    %cst_205 = arith.constant 0.353553385 : f32
    %389 = vector.broadcast %cst_205 : f32 to vector<8x8xf32>
    %390 = arith.mulf %388, %389 : vector<8x8xf32>
    %391 = arith.addf %390, %292 : vector<8x8xf32>
    %cst_206 = arith.constant dense<0xFF800000> : vector<8xf32>
    %392 = vector.multi_reduction <maximumf>, %391, %cst_206 [1] : vector<8x8xf32> to vector<8xf32>
    %393 = vector.shape_cast %392 : vector<8xf32> to vector<8x1xf32>
    %394 = vector.broadcast %393 : vector<8x1xf32> to vector<8x8xf32>
    %395 = arith.subf %391, %394 : vector<8x8xf32>
    %396 = math.exp %395 : vector<8x8xf32>
    %cst_207 = arith.constant dense<0.000000e+00> : vector<8xf32>
    %397 = vector.multi_reduction <add>, %396, %cst_207 [1] : vector<8x8xf32> to vector<8xf32>
    %398 = vector.shape_cast %397 : vector<8xf32> to vector<8x1xf32>
    %399 = tpu.reciprocal %398 {approx = true} : vector<8x1xf32> -> vector<8x1xf32>
    %400 = vector.broadcast %399 : vector<8x1xf32> to vector<8x8xf32>
    %401 = arith.mulf %396, %400 : vector<8x8xf32>
    %cst_208 = arith.constant dense<0.000000e+00> : vector<8x8xf32>
    %402 = tpu.matmul %401, %386, %cst_208 {dimension_numbers = #tpu.dot_dimension_numbers<[1], [0], [0], [1], [0, 0, 1, 1], [], []>} : vector<8x8xf32>, vector<8x8xf32>, vector<8x8xf32> -> vector<8x8xf32>
    %c0_209 = arith.constant 0 : index
    %c0_210 = arith.constant 0 : index
    %403 = vector.load %arg21[%c0_209, %c0_210] : memref<16x8xf32, #tpu.memory_space<vmem>>, vector<8x8xf32>
    tpu.vector_store %arg21[%c0_209, %c0_210], %402 {strides = array<i32>} : memref<16x8xf32, #tpu.memory_space<vmem>>, vector<8x8xf32>,
    %404 = vector.extract_strided_slice %376 {offsets = [8, 0], sizes = [8, 8], strides = [1, 1]} : vector<16x8xf32> to vector<8x8xf32>
    %405 = vector.extract_strided_slice %382 {offsets = [8, 0], sizes = [8, 8], strides = [1, 1]} : vector<16x8xf32> to vector<8x8xf32>
    %406 = vector.extract_strided_slice %383 {offsets = [8, 0], sizes = [8, 8], strides = [1, 1]} : vector<16x8xf32> to vector<8x8xf32>
    %407 = tpu.transpose %405, [1, 0] : vector<8x8xf32> -> vector<8x8xf32>
    %cst_211 = arith.constant dense<0.000000e+00> : vector<8x8xf32>
    %408 = tpu.matmul %404, %407, %cst_211 {dimension_numbers = #tpu.dot_dimension_numbers<[1], [0], [0], [1], [0, 0, 1, 1], [], []>} : vector<8x8xf32>, vector<8x8xf32>, vector<8x8xf32> -> vector<8x8xf32>
    %cst_212 = arith.constant 0.353553385 : f32
    %409 = vector.broadcast %cst_212 : f32 to vector<8x8xf32>
    %410 = arith.mulf %408, %409 : vector<8x8xf32>
    %411 = arith.addf %410, %296 : vector<8x8xf32>
    %cst_213 = arith.constant dense<0xFF800000> : vector<8xf32>
    %412 = vector.multi_reduction <maximumf>, %411, %cst_213 [1] : vector<8x8xf32> to vector<8xf32>
    %413 = vector.shape_cast %412 : vector<8xf32> to vector<8x1xf32>
    %414 = vector.broadcast %413 : vector<8x1xf32> to vector<8x8xf32>
    %415 = arith.subf %411, %414 : vector<8x8xf32>
    %416 = math.exp %415 : vector<8x8xf32>
    %cst_214 = arith.constant dense<0.000000e+00> : vector<8xf32>
    %417 = vector.multi_reduction <add>, %416, %cst_214 [1] : vector<8x8xf32> to vector<8xf32>
    %418 = vector.shape_cast %417 : vector<8xf32> to vector<8x1xf32>
    %419 = tpu.reciprocal %418 {approx = true} : vector<8x1xf32> -> vector<8x1xf32>
    %420 = vector.broadcast %419 : vector<8x1xf32> to vector<8x8xf32>
    %421 = arith.mulf %416, %420 : vector<8x8xf32>
    %cst_215 = arith.constant dense<0.000000e+00> : vector<8x8xf32>
    %422 = tpu.matmul %421, %406, %cst_215 {dimension_numbers = #tpu.dot_dimension_numbers<[1], [0], [0], [1], [0, 0, 1, 1], [], []>} : vector<8x8xf32>, vector<8x8xf32>, vector<8x8xf32> -> vector<8x8xf32>
    %c8_216 = arith.constant 8 : index
    %c0_217 = arith.constant 0 : index
    %423 = vector.load %arg21[%c8_216, %c0_217] : memref<16x8xf32, #tpu.memory_space<vmem>>, vector<8x8xf32>
    tpu.vector_store %arg21[%c8_216, %c0_217], %422 {strides = array<i32>} : memref<16x8xf32, #tpu.memory_space<vmem>>, vector<8x8xf32>,
    %c0_218 = arith.constant 0 : index
    %c0_219 = arith.constant 0 : index
    %424 = vector.load %arg22[%c0_218, %c0_219] : memref<16x32xf32, #tpu.memory_space<vmem>>, vector<16x32xf32>
    %c0_220 = arith.constant 0 : index
    %c0_221 = arith.constant 0 : index
    %425 = vector.load %arg21[%c0_220, %c0_221] : memref<16x8xf32, #tpu.memory_space<vmem>>, vector<16x8xf32>
    %426 = arith.truncf %425 : vector<16x8xf32> to vector<16x8xbf16>
    %c0_222 = arith.constant 0 : index
    %427 = arith.index_cast %c1_i32_195 : i32 to index
    %c0_223 = arith.constant 0 : index
    %c0_224 = arith.constant 0 : index
    %428 = vector.load %arg12[%c0_222, %427, %c0_223, %c0_224] : memref<1x4x8x32xbf16, #tpu.memory_space<vmem>>, vector<1x1x8x32xbf16>
    %429 = vector.shape_cast %428 : vector<1x1x8x32xbf16> to vector<8x32xbf16>
    %cst_225 = arith.constant dense<0.000000e+00> : vector<16x32xf32>
    %430 = tpu.matmul %426, %429, %cst_225 {dimension_numbers = #tpu.dot_dimension_numbers<[1], [0], [0], [1], [0, 0, 1, 1], [], []>} : vector<16x8xbf16>, vector<8x32xbf16>, vector<16x32xf32> -> vector<16x32xf32>
    %431 = arith.addf %424, %430 : vector<16x32xf32>
    %c0_226 = arith.constant 0 : index
    %c0_227 = arith.constant 0 : index
    %432 = vector.load %arg22[%c0_226, %c0_227] : memref<16x32xf32, #tpu.memory_space<vmem>>, vector<16x32xf32>
    tpu.vector_store %arg22[%c0_226, %c0_227], %431 {strides = array<i32>} : memref<16x32xf32, #tpu.memory_space<vmem>>, vector<16x32xf32>,
    %c2_i32_228 = arith.constant 2 : i32
    %c0_229 = arith.constant 0 : index
    %433 = arith.index_cast %c2_i32_228 : i32 to index
    %c0_230 = arith.constant 0 : index
    %c0_231 = arith.constant 0 : index
    %434 = vector.load %arg10[%c0_229, %433, %c0_230, %c0_231] : memref<1x4x32x24xbf16, #tpu.memory_space<vmem>>, vector<1x1x32x24xbf16>
    %435 = vector.shape_cast %434 : vector<1x1x32x24xbf16> to vector<32x24xbf16>
    %c0_232 = arith.constant 0 : index
    %436 = arith.index_cast %c2_i32_228 : i32 to index
    %c0_233 = arith.constant 0 : index
    %c0_234 = arith.constant 0 : index
    %437 = vector.load %arg11[%c0_232, %436, %c0_233, %c0_234] : memref<1x4x1x24xf32, #tpu.memory_space<vmem>>, vector<1x1x1x24xf32>
    %438 = vector.shape_cast %437 : vector<1x1x1x24xf32> to vector<1x24xf32>
    %439 = vector.extract_strided_slice %435 {offsets = [0, 0], sizes = [32, 8], strides = [1, 1]} : vector<32x24xbf16> to vector<32x8xbf16>
    %cst_235 = arith.constant dense<0.000000e+00> : vector<16x8xf32>
    %440 = tpu.matmul %288, %439, %cst_235 {dimension_numbers = #tpu.dot_dimension_numbers<[1], [0], [0], [1], [0, 0, 1, 1], [], []>} : vector<16x32xbf16>, vector<32x8xbf16>, vector<16x8xf32> -> vector<16x8xf32>
    %441 = vector.extract_strided_slice %438 {offsets = [0, 0], sizes = [1, 8], strides = [1, 1]} : vector<1x24xf32> to vector<1x8xf32>
    %442 = vector.broadcast %441 : vector<1x8xf32> to vector<16x8xf32>
    %443 = arith.addf %440, %442 : vector<16x8xf32>
    %444 = vector.extract_strided_slice %435 {offsets = [0, 8], sizes = [32, 16], strides = [1, 1]} : vector<32x24xbf16> to vector<32x16xbf16>
    %cst_236 = arith.constant dense<0.000000e+00> : vector<16x16xf32>
    %445 = tpu.matmul %4, %444, %cst_236 {dimension_numbers = #tpu.dot_dimension_numbers<[1], [0], [0], [1], [0, 0, 1, 1], [], []>} : vector<16x32xbf16>, vector<32x16xbf16>, vector<16x16xf32> -> vector<16x16xf32>
    %446 = vector.extract_strided_slice %438 {offsets = [0, 8], sizes = [1, 16], strides = [1, 1]} : vector<1x24xf32> to vector<1x16xf32>
    %447 = vector.broadcast %446 : vector<1x16xf32> to vector<16x16xf32>
    %448 = arith.addf %445, %447 : vector<16x16xf32>
    %449 = vector.extract_strided_slice %448 {offsets = [0, 0], sizes = [16, 8], strides = [1, 1]} : vector<16x16xf32> to vector<16x8xf32>
    %450 = vector.extract_strided_slice %448 {offsets = [0, 8], sizes = [16, 8], strides = [1, 1]} : vector<16x16xf32> to vector<16x8xf32>
    %451 = vector.extract_strided_slice %443 {offsets = [0, 0], sizes = [8, 8], strides = [1, 1]} : vector<16x8xf32> to vector<8x8xf32>
    %452 = vector.extract_strided_slice %449 {offsets = [0, 0], sizes = [8, 8], strides = [1, 1]} : vector<16x8xf32> to vector<8x8xf32>
    %453 = vector.extract_strided_slice %450 {offsets = [0, 0], sizes = [8, 8], strides = [1, 1]} : vector<16x8xf32> to vector<8x8xf32>
    %454 = tpu.transpose %452, [1, 0] : vector<8x8xf32> -> vector<8x8xf32>
    %cst_237 = arith.constant dense<0.000000e+00> : vector<8x8xf32>
    %455 = tpu.matmul %451, %454, %cst_237 {dimension_numbers = #tpu.dot_dimension_numbers<[1], [0], [0], [1], [0, 0, 1, 1], [], []>} : vector<8x8xf32>, vector<8x8xf32>, vector<8x8xf32> -> vector<8x8xf32>
    %cst_238 = arith.constant 0.353553385 : f32
    %456 = vector.broadcast %cst_238 : f32 to vector<8x8xf32>
    %457 = arith.mulf %455, %456 : vector<8x8xf32>
    %458 = arith.addf %457, %292 : vector<8x8xf32>
    %cst_239 = arith.constant dense<0xFF800000> : vector<8xf32>
    %459 = vector.multi_reduction <maximumf>, %458, %cst_239 [1] : vector<8x8xf32> to vector<8xf32>
    %460 = vector.shape_cast %459 : vector<8xf32> to vector<8x1xf32>
    %461 = vector.broadcast %460 : vector<8x1xf32> to vector<8x8xf32>
    %462 = arith.subf %458, %461 : vector<8x8xf32>
    %463 = math.exp %462 : vector<8x8xf32>
    %cst_240 = arith.constant dense<0.000000e+00> : vector<8xf32>
    %464 = vector.multi_reduction <add>, %463, %cst_240 [1] : vector<8x8xf32> to vector<8xf32>
    %465 = vector.shape_cast %464 : vector<8xf32> to vector<8x1xf32>
    %466 = tpu.reciprocal %465 {approx = true} : vector<8x1xf32> -> vector<8x1xf32>
    %467 = vector.broadcast %466 : vector<8x1xf32> to vector<8x8xf32>
    %468 = arith.mulf %463, %467 : vector<8x8xf32>
    %cst_241 = arith.constant dense<0.000000e+00> : vector<8x8xf32>
    %469 = tpu.matmul %468, %453, %cst_241 {dimension_numbers = #tpu.dot_dimension_numbers<[1], [0], [0], [1], [0, 0, 1, 1], [], []>} : vector<8x8xf32>, vector<8x8xf32>, vector<8x8xf32> -> vector<8x8xf32>
    %c0_242 = arith.constant 0 : index
    %c0_243 = arith.constant 0 : index
    %470 = vector.load %arg21[%c0_242, %c0_243] : memref<16x8xf32, #tpu.memory_space<vmem>>, vector<8x8xf32>
    tpu.vector_store %arg21[%c0_242, %c0_243], %469 {strides = array<i32>} : memref<16x8xf32, #tpu.memory_space<vmem>>, vector<8x8xf32>,
    %471 = vector.extract_strided_slice %443 {offsets = [8, 0], sizes = [8, 8], strides = [1, 1]} : vector<16x8xf32> to vector<8x8xf32>
    %472 = vector.extract_strided_slice %449 {offsets = [8, 0], sizes = [8, 8], strides = [1, 1]} : vector<16x8xf32> to vector<8x8xf32>
    %473 = vector.extract_strided_slice %450 {offsets = [8, 0], sizes = [8, 8], strides = [1, 1]} : vector<16x8xf32> to vector<8x8xf32>
    %474 = tpu.transpose %472, [1, 0] : vector<8x8xf32> -> vector<8x8xf32>
    %cst_244 = arith.constant dense<0.000000e+00> : vector<8x8xf32>
    %475 = tpu.matmul %471, %474, %cst_244 {dimension_numbers = #tpu.dot_dimension_numbers<[1], [0], [0], [1], [0, 0, 1, 1], [], []>} : vector<8x8xf32>, vector<8x8xf32>, vector<8x8xf32> -> vector<8x8xf32>
    %cst_245 = arith.constant 0.353553385 : f32
    %476 = vector.broadcast %cst_245 : f32 to vector<8x8xf32>
    %477 = arith.mulf %475, %476 : vector<8x8xf32>
    %478 = arith.addf %477, %296 : vector<8x8xf32>
    %cst_246 = arith.constant dense<0xFF800000> : vector<8xf32>
    %479 = vector.multi_reduction <maximumf>, %478, %cst_246 [1] : vector<8x8xf32> to vector<8xf32>
    %480 = vector.shape_cast %479 : vector<8xf32> to vector<8x1xf32>
    %481 = vector.broadcast %480 : vector<8x1xf32> to vector<8x8xf32>
    %482 = arith.subf %478, %481 : vector<8x8xf32>
    %483 = math.exp %482 : vector<8x8xf32>
    %cst_247 = arith.constant dense<0.000000e+00> : vector<8xf32>
    %484 = vector.multi_reduction <add>, %483, %cst_247 [1] : vector<8x8xf32> to vector<8xf32>
    %485 = vector.shape_cast %484 : vector<8xf32> to vector<8x1xf32>
    %486 = tpu.reciprocal %485 {approx = true} : vector<8x1xf32> -> vector<8x1xf32>
    %487 = vector.broadcast %486 : vector<8x1xf32> to vector<8x8xf32>
    %488 = arith.mulf %483, %487 : vector<8x8xf32>
    %cst_248 = arith.constant dense<0.000000e+00> : vector<8x8xf32>
    %489 = tpu.matmul %488, %473, %cst_248 {dimension_numbers = #tpu.dot_dimension_numbers<[1], [0], [0], [1], [0, 0, 1, 1], [], []>} : vector<8x8xf32>, vector<8x8xf32>, vector<8x8xf32> -> vector<8x8xf32>
    %c8_249 = arith.constant 8 : index
    %c0_250 = arith.constant 0 : index
    %490 = vector.load %arg21[%c8_249, %c0_250] : memref<16x8xf32, #tpu.memory_space<vmem>>, vector<8x8xf32>
    tpu.vector_store %arg21[%c8_249, %c0_250], %489 {strides = array<i32>} : memref<16x8xf32, #tpu.memory_space<vmem>>, vector<8x8xf32>,
    %c0_251 = arith.constant 0 : index
    %c0_252 = arith.constant 0 : index
    %491 = vector.load %arg22[%c0_251, %c0_252] : memref<16x32xf32, #tpu.memory_space<vmem>>, vector<16x32xf32>
    %c0_253 = arith.constant 0 : index
    %c0_254 = arith.constant 0 : index
    %492 = vector.load %arg21[%c0_253, %c0_254] : memref<16x8xf32, #tpu.memory_space<vmem>>, vector<16x8xf32>
    %493 = arith.truncf %492 : vector<16x8xf32> to vector<16x8xbf16>
    %c0_255 = arith.constant 0 : index
    %494 = arith.index_cast %c2_i32_228 : i32 to index
    %c0_256 = arith.constant 0 : index
    %c0_257 = arith.constant 0 : index
    %495 = vector.load %arg12[%c0_255, %494, %c0_256, %c0_257] : memref<1x4x8x32xbf16, #tpu.memory_space<vmem>>, vector<1x1x8x32xbf16>
    %496 = vector.shape_cast %495 : vector<1x1x8x32xbf16> to vector<8x32xbf16>
    %cst_258 = arith.constant dense<0.000000e+00> : vector<16x32xf32>
    %497 = tpu.matmul %493, %496, %cst_258 {dimension_numbers = #tpu.dot_dimension_numbers<[1], [0], [0], [1], [0, 0, 1, 1], [], []>} : vector<16x8xbf16>, vector<8x32xbf16>, vector<16x32xf32> -> vector<16x32xf32>
    %498 = arith.addf %491, %497 : vector<16x32xf32>
    %c0_259 = arith.constant 0 : index
    %c0_260 = arith.constant 0 : index
    %499 = vector.load %arg22[%c0_259, %c0_260] : memref<16x32xf32, #tpu.memory_space<vmem>>, vector<16x32xf32>
    tpu.vector_store %arg22[%c0_259, %c0_260], %498 {strides = array<i32>} : memref<16x32xf32, #tpu.memory_space<vmem>>, vector<16x32xf32>,
    %c3_i32_261 = arith.constant 3 : i32
    %c0_262 = arith.constant 0 : index
    %500 = arith.index_cast %c3_i32_261 : i32 to index
    %c0_263 = arith.constant 0 : index
    %c0_264 = arith.constant 0 : index
    %501 = vector.load %arg10[%c0_262, %500, %c0_263, %c0_264] : memref<1x4x32x24xbf16, #tpu.memory_space<vmem>>, vector<1x1x32x24xbf16>
    %502 = vector.shape_cast %501 : vector<1x1x32x24xbf16> to vector<32x24xbf16>
    %c0_265 = arith.constant 0 : index
    %503 = arith.index_cast %c3_i32_261 : i32 to index
    %c0_266 = arith.constant 0 : index
    %c0_267 = arith.constant 0 : index
    %504 = vector.load %arg11[%c0_265, %503, %c0_266, %c0_267] : memref<1x4x1x24xf32, #tpu.memory_space<vmem>>, vector<1x1x1x24xf32>
    %505 = vector.shape_cast %504 : vector<1x1x1x24xf32> to vector<1x24xf32>
    %506 = vector.extract_strided_slice %502 {offsets = [0, 0], sizes = [32, 8], strides = [1, 1]} : vector<32x24xbf16> to vector<32x8xbf16>
    %cst_268 = arith.constant dense<0.000000e+00> : vector<16x8xf32>
    %507 = tpu.matmul %288, %506, %cst_268 {dimension_numbers = #tpu.dot_dimension_numbers<[1], [0], [0], [1], [0, 0, 1, 1], [], []>} : vector<16x32xbf16>, vector<32x8xbf16>, vector<16x8xf32> -> vector<16x8xf32>
    %508 = vector.extract_strided_slice %505 {offsets = [0, 0], sizes = [1, 8], strides = [1, 1]} : vector<1x24xf32> to vector<1x8xf32>
    %509 = vector.broadcast %508 : vector<1x8xf32> to vector<16x8xf32>
    %510 = arith.addf %507, %509 : vector<16x8xf32>
    %511 = vector.extract_strided_slice %502 {offsets = [0, 8], sizes = [32, 16], strides = [1, 1]} : vector<32x24xbf16> to vector<32x16xbf16>
    %cst_269 = arith.constant dense<0.000000e+00> : vector<16x16xf32>
    %512 = tpu.matmul %4, %511, %cst_269 {dimension_numbers = #tpu.dot_dimension_numbers<[1], [0], [0], [1], [0, 0, 1, 1], [], []>} : vector<16x32xbf16>, vector<32x16xbf16>, vector<16x16xf32> -> vector<16x16xf32>
    %513 = vector.extract_strided_slice %505 {offsets = [0, 8], sizes = [1, 16], strides = [1, 1]} : vector<1x24xf32> to vector<1x16xf32>
    %514 = vector.broadcast %513 : vector<1x16xf32> to vector<16x16xf32>
    %515 = arith.addf %512, %514 : vector<16x16xf32>
    %516 = vector.extract_strided_slice %515 {offsets = [0, 0], sizes = [16, 8], strides = [1, 1]} : vector<16x16xf32> to vector<16x8xf32>
    %517 = vector.extract_strided_slice %515 {offsets = [0, 8], sizes = [16, 8], strides = [1, 1]} : vector<16x16xf32> to vector<16x8xf32>
    %518 = vector.extract_strided_slice %510 {offsets = [0, 0], sizes = [8, 8], strides = [1, 1]} : vector<16x8xf32> to vector<8x8xf32>
    %519 = vector.extract_strided_slice %516 {offsets = [0, 0], sizes = [8, 8], strides = [1, 1]} : vector<16x8xf32> to vector<8x8xf32>
    %520 = vector.extract_strided_slice %517 {offsets = [0, 0], sizes = [8, 8], strides = [1, 1]} : vector<16x8xf32> to vector<8x8xf32>
    %521 = tpu.transpose %519, [1, 0] : vector<8x8xf32> -> vector<8x8xf32>
    %cst_270 = arith.constant dense<0.000000e+00> : vector<8x8xf32>
    %522 = tpu.matmul %518, %521, %cst_270 {dimension_numbers = #tpu.dot_dimension_numbers<[1], [0], [0], [1], [0, 0, 1, 1], [], []>} : vector<8x8xf32>, vector<8x8xf32>, vector<8x8xf32> -> vector<8x8xf32>
    %cst_271 = arith.constant 0.353553385 : f32
    %523 = vector.broadcast %cst_271 : f32 to vector<8x8xf32>
    %524 = arith.mulf %522, %523 : vector<8x8xf32>
    %525 = arith.addf %524, %292 : vector<8x8xf32>
    %cst_272 = arith.constant dense<0xFF800000> : vector<8xf32>
    %526 = vector.multi_reduction <maximumf>, %525, %cst_272 [1] : vector<8x8xf32> to vector<8xf32>
    %527 = vector.shape_cast %526 : vector<8xf32> to vector<8x1xf32>
    %528 = vector.broadcast %527 : vector<8x1xf32> to vector<8x8xf32>
    %529 = arith.subf %525, %528 : vector<8x8xf32>
    %530 = math.exp %529 : vector<8x8xf32>
    %cst_273 = arith.constant dense<0.000000e+00> : vector<8xf32>
    %531 = vector.multi_reduction <add>, %530, %cst_273 [1] : vector<8x8xf32> to vector<8xf32>
    %532 = vector.shape_cast %531 : vector<8xf32> to vector<8x1xf32>
    %533 = tpu.reciprocal %532 {approx = true} : vector<8x1xf32> -> vector<8x1xf32>
    %534 = vector.broadcast %533 : vector<8x1xf32> to vector<8x8xf32>
    %535 = arith.mulf %530, %534 : vector<8x8xf32>
    %cst_274 = arith.constant dense<0.000000e+00> : vector<8x8xf32>
    %536 = tpu.matmul %535, %520, %cst_274 {dimension_numbers = #tpu.dot_dimension_numbers<[1], [0], [0], [1], [0, 0, 1, 1], [], []>} : vector<8x8xf32>, vector<8x8xf32>, vector<8x8xf32> -> vector<8x8xf32>
    %c0_275 = arith.constant 0 : index
    %c0_276 = arith.constant 0 : index
    %537 = vector.load %arg21[%c0_275, %c0_276] : memref<16x8xf32, #tpu.memory_space<vmem>>, vector<8x8xf32>
    tpu.vector_store %arg21[%c0_275, %c0_276], %536 {strides = array<i32>} : memref<16x8xf32, #tpu.memory_space<vmem>>, vector<8x8xf32>,
    %538 = vector.extract_strided_slice %510 {offsets = [8, 0], sizes = [8, 8], strides = [1, 1]} : vector<16x8xf32> to vector<8x8xf32>
    %539 = vector.extract_strided_slice %516 {offsets = [8, 0], sizes = [8, 8], strides = [1, 1]} : vector<16x8xf32> to vector<8x8xf32>
    %540 = vector.extract_strided_slice %517 {offsets = [8, 0], sizes = [8, 8], strides = [1, 1]} : vector<16x8xf32> to vector<8x8xf32>
    %541 = tpu.transpose %539, [1, 0] : vector<8x8xf32> -> vector<8x8xf32>
    %cst_277 = arith.constant dense<0.000000e+00> : vector<8x8xf32>
    %542 = tpu.matmul %538, %541, %cst_277 {dimension_numbers = #tpu.dot_dimension_numbers<[1], [0], [0], [1], [0, 0, 1, 1], [], []>} : vector<8x8xf32>, vector<8x8xf32>, vector<8x8xf32> -> vector<8x8xf32>
    %cst_278 = arith.constant 0.353553385 : f32
    %543 = vector.broadcast %cst_278 : f32 to vector<8x8xf32>
    %544 = arith.mulf %542, %543 : vector<8x8xf32>
    %545 = arith.addf %544, %296 : vector<8x8xf32>
    %cst_279 = arith.constant dense<0xFF800000> : vector<8xf32>
    %546 = vector.multi_reduction <maximumf>, %545, %cst_279 [1] : vector<8x8xf32> to vector<8xf32>
    %547 = vector.shape_cast %546 : vector<8xf32> to vector<8x1xf32>
    %548 = vector.broadcast %547 : vector<8x1xf32> to vector<8x8xf32>
    %549 = arith.subf %545, %548 : vector<8x8xf32>
    %550 = math.exp %549 : vector<8x8xf32>
    %cst_280 = arith.constant dense<0.000000e+00> : vector<8xf32>
    %551 = vector.multi_reduction <add>, %550, %cst_280 [1] : vector<8x8xf32> to vector<8xf32>
    %552 = vector.shape_cast %551 : vector<8xf32> to vector<8x1xf32>
    %553 = tpu.reciprocal %552 {approx = true} : vector<8x1xf32> -> vector<8x1xf32>
    %554 = vector.broadcast %553 : vector<8x1xf32> to vector<8x8xf32>
    %555 = arith.mulf %550, %554 : vector<8x8xf32>
    %cst_281 = arith.constant dense<0.000000e+00> : vector<8x8xf32>
    %556 = tpu.matmul %555, %540, %cst_281 {dimension_numbers = #tpu.dot_dimension_numbers<[1], [0], [0], [1], [0, 0, 1, 1], [], []>} : vector<8x8xf32>, vector<8x8xf32>, vector<8x8xf32> -> vector<8x8xf32>
    %c8_282 = arith.constant 8 : index
    %c0_283 = arith.constant 0 : index
    %557 = vector.load %arg21[%c8_282, %c0_283] : memref<16x8xf32, #tpu.memory_space<vmem>>, vector<8x8xf32>
    tpu.vector_store %arg21[%c8_282, %c0_283], %556 {strides = array<i32>} : memref<16x8xf32, #tpu.memory_space<vmem>>, vector<8x8xf32>,
    %c0_284 = arith.constant 0 : index
    %c0_285 = arith.constant 0 : index
    %558 = vector.load %arg22[%c0_284, %c0_285] : memref<16x32xf32, #tpu.memory_space<vmem>>, vector<16x32xf32>
    %c0_286 = arith.constant 0 : index
    %c0_287 = arith.constant 0 : index
    %559 = vector.load %arg21[%c0_286, %c0_287] : memref<16x8xf32, #tpu.memory_space<vmem>>, vector<16x8xf32>
    %560 = arith.truncf %559 : vector<16x8xf32> to vector<16x8xbf16>
    %c0_288 = arith.constant 0 : index
    %561 = arith.index_cast %c3_i32_261 : i32 to index
    %c0_289 = arith.constant 0 : index
    %c0_290 = arith.constant 0 : index
    %562 = vector.load %arg12[%c0_288, %561, %c0_289, %c0_290] : memref<1x4x8x32xbf16, #tpu.memory_space<vmem>>, vector<1x1x8x32xbf16>
    %563 = vector.shape_cast %562 : vector<1x1x8x32xbf16> to vector<8x32xbf16>
    %cst_291 = arith.constant dense<0.000000e+00> : vector<16x32xf32>
    %564 = tpu.matmul %560, %563, %cst_291 {dimension_numbers = #tpu.dot_dimension_numbers<[1], [0], [0], [1], [0, 0, 1, 1], [], []>} : vector<16x8xbf16>, vector<8x32xbf16>, vector<16x32xf32> -> vector<16x32xf32>
    %565 = arith.addf %558, %564 : vector<16x32xf32>
    %c0_292 = arith.constant 0 : index
    %c0_293 = arith.constant 0 : index
    %566 = vector.load %arg22[%c0_292, %c0_293] : memref<16x32xf32, #tpu.memory_space<vmem>>, vector<16x32xf32>
    tpu.vector_store %arg22[%c0_292, %c0_293], %565 {strides = array<i32>} : memref<16x32xf32, #tpu.memory_space<vmem>>, vector<16x32xf32>,
    %c4_i32_294 = arith.constant 4 : i32
    %c0_295 = arith.constant 0 : index
    %c0_296 = arith.constant 0 : index
    %567 = vector.load %arg22[%c0_295, %c0_296] : memref<16x32xf32, #tpu.memory_space<vmem>>, vector<16x32xf32>
    %c0_297 = arith.constant 0 : index
    %c0_298 = arith.constant 0 : index
    %c0_299 = arith.constant 0 : index
    %568 = vector.load %arg13[%c0_297, %c0_298, %c0_299] : memref<1x1x32xf32, #tpu.memory_space<vmem>>, vector<1x1x32xf32>
    %569 = vector.shape_cast %568 : vector<1x1x32xf32> to vector<1x32xf32>
    %570 = vector.broadcast %569 : vector<1x32xf32> to vector<16x32xf32>
    %571 = arith.addf %567, %570 : vector<16x32xf32>
    %572 = arith.addf %571, %287 : vector<16x32xf32>
    %c0_300 = arith.constant 0 : index
    %c1_301 = arith.constant 1 : index
    %c0_302 = arith.constant 0 : index
    %c0_303 = arith.constant 0 : index
    %573 = vector.load %arg14[%c0_300, %c1_301, %c0_302, %c0_303] : memref<1x3x1x32xf32, #tpu.memory_space<vmem>>, vector<1x1x1x32xf32>
    %574 = vector.shape_cast %573 : vector<1x1x1x32xf32> to vector<1x32xf32>
    %c0_304 = arith.constant 0 : index
    %c1_305 = arith.constant 1 : index
    %c0_306 = arith.constant 0 : index
    %c0_307 = arith.constant 0 : index
    %575 = vector.load %arg15[%c0_304, %c1_305, %c0_306, %c0_307] : memref<1x3x1x32xf32, #tpu.memory_space<vmem>>, vector<1x1x1x32xf32>
    %576 = vector.shape_cast %575 : vector<1x1x1x32xf32> to vector<1x32xf32>
    %cst_308 = arith.constant dense<0.000000e+00> : vector<16xf32>
    %577 = vector.multi_reduction <add>, %572, %cst_308 [1] : vector<16x32xf32> to vector<16xf32>
    %578 = vector.shape_cast %577 : vector<16xf32> to vector<16x1xf32>
    %cst_309 = arith.constant 3.200000e+01 : f32
    %579 = vector.broadcast %cst_309 : f32 to vector<16x1xf32>
    %580 = arith.divf %578, %579 : vector<16x1xf32>
    %581 = vector.broadcast %580 : vector<16x1xf32> to vector<16x32xf32>
    %582 = arith.subf %572, %581 : vector<16x32xf32>
    %583 = arith.mulf %582, %582 : vector<16x32xf32>
    %cst_310 = arith.constant dense<0.000000e+00> : vector<16xf32>
    %584 = vector.multi_reduction <add>, %583, %cst_310 [1] : vector<16x32xf32> to vector<16xf32>
    %585 = vector.shape_cast %584 : vector<16xf32> to vector<16x1xf32>
    %cst_311 = arith.constant 3.200000e+01 : f32
    %586 = vector.broadcast %cst_311 : f32 to vector<16x1xf32>
    %587 = arith.divf %585, %586 : vector<16x1xf32>
    %588 = vector.broadcast %580 : vector<16x1xf32> to vector<16x32xf32>
    %589 = arith.subf %572, %588 : vector<16x32xf32>
    %cst_312 = arith.constant 9.99999974E-6 : f32
    %590 = vector.broadcast %cst_312 : f32 to vector<16x1xf32>
    %591 = arith.addf %587, %590 : vector<16x1xf32>
    %592 = math.rsqrt %591 : vector<16x1xf32>
    %593 = vector.broadcast %592 : vector<16x1xf32> to vector<16x32xf32>
    %594 = arith.mulf %589, %593 : vector<16x32xf32>
    %595 = vector.broadcast %574 : vector<1x32xf32> to vector<16x32xf32>
    %596 = arith.mulf %594, %595 : vector<16x32xf32>
    %597 = vector.broadcast %576 : vector<1x32xf32> to vector<16x32xf32>
    %598 = arith.addf %596, %597 : vector<16x32xf32>
    %599 = arith.truncf %598 : vector<16x32xf32> to vector<16x32xbf16>
    %cst_313 = arith.constant 0.000000e+00 : f32
    %600 = vector.broadcast %cst_313 : f32 to vector<16x32xf32>
    %c0_314 = arith.constant 0 : index
    %c0_315 = arith.constant 0 : index
    %c0_316 = arith.constant 0 : index
    %601 = vector.load %arg16[%c0_314, %c0_315, %c0_316] : memref<1x32x128xbf16, #tpu.memory_space<vmem>>, vector<1x32x128xbf16>
    %602 = vector.shape_cast %601 : vector<1x32x128xbf16> to vector<32x128xbf16>
    %cst_317 = arith.constant dense<0.000000e+00> : vector<16x128xf32>
    %603 = tpu.matmul %599, %602, %cst_317 {dimension_numbers = #tpu.dot_dimension_numbers<[1], [0], [0], [1], [0, 0, 1, 1], [], []>} : vector<16x32xbf16>, vector<32x128xbf16>, vector<16x128xf32> -> vector<16x128xf32>
    %c0_318 = arith.constant 0 : index
    %c0_319 = arith.constant 0 : index
    %c0_320 = arith.constant 0 : index
    %604 = vector.load %arg17[%c0_318, %c0_319, %c0_320] : memref<1x1x128xf32, #tpu.memory_space<vmem>>, vector<1x1x128xf32>
    %605 = vector.shape_cast %604 : vector<1x1x128xf32> to vector<1x128xf32>
    %606 = vector.broadcast %605 : vector<1x128xf32> to vector<16x128xf32>
    %607 = arith.addf %603, %606 : vector<16x128xf32>
    %cst_321 = arith.constant 0.000000e+00 : f32
    %608 = vector.broadcast %cst_321 : f32 to vector<16x128xf32>
    %609 = arith.maximumf %607, %608 : vector<16x128xf32>
    %610 = arith.truncf %609 : vector<16x128xf32> to vector<16x128xbf16>
    %c0_322 = arith.constant 0 : index
    %c0_323 = arith.constant 0 : index
    %c0_324 = arith.constant 0 : index
    %611 = vector.load %arg18[%c0_322, %c0_323, %c0_324] : memref<1x128x32xbf16, #tpu.memory_space<vmem>>, vector<1x128x32xbf16>
    %612 = vector.shape_cast %611 : vector<1x128x32xbf16> to vector<128x32xbf16>
    %cst_325 = arith.constant dense<0.000000e+00> : vector<16x32xf32>
    %613 = tpu.matmul %610, %612, %cst_325 {dimension_numbers = #tpu.dot_dimension_numbers<[1], [0], [0], [1], [0, 0, 1, 1], [], []>} : vector<16x128xbf16>, vector<128x32xbf16>, vector<16x32xf32> -> vector<16x32xf32>
    %614 = arith.addf %600, %613 : vector<16x32xf32>
    %c0_326 = arith.constant 0 : index
    %c0_327 = arith.constant 0 : index
    %c0_328 = arith.constant 0 : index
    %615 = vector.load %arg19[%c0_326, %c0_327, %c0_328] : memref<1x1x32xf32, #tpu.memory_space<vmem>>, vector<1x1x32xf32>
    %616 = vector.shape_cast %615 : vector<1x1x32xf32> to vector<1x32xf32>
    %617 = vector.broadcast %616 : vector<1x32xf32> to vector<16x32xf32>
    %618 = arith.addf %614, %617 : vector<16x32xf32>
    %619 = arith.addf %618, %598 : vector<16x32xf32>
    %c0_329 = arith.constant 0 : index
    %c2 = arith.constant 2 : index
    %c0_330 = arith.constant 0 : index
    %c0_331 = arith.constant 0 : index
    %620 = vector.load %arg14[%c0_329, %c2, %c0_330, %c0_331] : memref<1x3x1x32xf32, #tpu.memory_space<vmem>>, vector<1x1x1x32xf32>
    %621 = vector.shape_cast %620 : vector<1x1x1x32xf32> to vector<1x32xf32>
    %c0_332 = arith.constant 0 : index
    %c2_333 = arith.constant 2 : index
    %c0_334 = arith.constant 0 : index
    %c0_335 = arith.constant 0 : index
    %622 = vector.load %arg15[%c0_332, %c2_333, %c0_334, %c0_335] : memref<1x3x1x32xf32, #tpu.memory_space<vmem>>, vector<1x1x1x32xf32>
    %623 = vector.shape_cast %622 : vector<1x1x1x32xf32> to vector<1x32xf32>
    %cst_336 = arith.constant dense<0.000000e+00> : vector<16xf32>
    %624 = vector.multi_reduction <add>, %619, %cst_336 [1] : vector<16x32xf32> to vector<16xf32>
    %625 = vector.shape_cast %624 : vector<16xf32> to vector<16x1xf32>
    %cst_337 = arith.constant 3.200000e+01 : f32
    %626 = vector.broadcast %cst_337 : f32 to vector<16x1xf32>
    %627 = arith.divf %625, %626 : vector<16x1xf32>
    %628 = vector.broadcast %627 : vector<16x1xf32> to vector<16x32xf32>
    %629 = arith.subf %619, %628 : vector<16x32xf32>
    %630 = arith.mulf %629, %629 : vector<16x32xf32>
    %cst_338 = arith.constant dense<0.000000e+00> : vector<16xf32>
    %631 = vector.multi_reduction <add>, %630, %cst_338 [1] : vector<16x32xf32> to vector<16xf32>
    %632 = vector.shape_cast %631 : vector<16xf32> to vector<16x1xf32>
    %cst_339 = arith.constant 3.200000e+01 : f32
    %633 = vector.broadcast %cst_339 : f32 to vector<16x1xf32>
    %634 = arith.divf %632, %633 : vector<16x1xf32>
    %635 = vector.broadcast %627 : vector<16x1xf32> to vector<16x32xf32>
    %636 = arith.subf %619, %635 : vector<16x32xf32>
    %cst_340 = arith.constant 9.99999974E-6 : f32
    %637 = vector.broadcast %cst_340 : f32 to vector<16x1xf32>
    %638 = arith.addf %634, %637 : vector<16x1xf32>
    %639 = math.rsqrt %638 : vector<16x1xf32>
    %640 = vector.broadcast %639 : vector<16x1xf32> to vector<16x32xf32>
    %641 = arith.mulf %636, %640 : vector<16x32xf32>
    %642 = vector.broadcast %621 : vector<1x32xf32> to vector<16x32xf32>
    %643 = arith.mulf %641, %642 : vector<16x32xf32>
    %644 = vector.broadcast %623 : vector<1x32xf32> to vector<16x32xf32>
    %645 = arith.addf %643, %644 : vector<16x32xf32>
    %c0_341 = arith.constant 0 : index
    %c0_342 = arith.constant 0 : index
    %646 = vector.load %arg20[%c0_341, %c0_342] : memref<16x32xf32, #tpu.memory_space<vmem>>, vector<16x32xf32>
    tpu.vector_store %arg20[%c0_341, %c0_342], %645 {strides = array<i32>} : memref<16x32xf32, #tpu.memory_space<vmem>>, vector<16x32xf32>,
    return
  }
  func.func @transform_0(%arg0: i32, %arg1: i32) -> (i32, i32) {
    %c0_i32 = arith.constant 0 : i32
    %c0_i32_0 = arith.constant 0 : i32
    return %arg0, %c0_i32 : i32, i32
  }
  func.func @transform_1(%arg0: i32, %arg1: i32) -> (i32, i32) {
    %c0_i32 = arith.constant 0 : i32
    %c0_i32_0 = arith.constant 0 : i32
    return %arg0, %c0_i32 : i32, i32
  }
  func.func @transform_2(%arg0: i32, %arg1: i32) -> (i32, i32, i32) {
    %c0_i32 = arith.constant 0 : i32
    %c0_i32_0 = arith.constant 0 : i32
    %c0_i32_1 = arith.constant 0 : i32
    return %arg0, %c0_i32, %c0_i32_0 : i32, i32, i32
  }
  func.func @transform_3(%arg0: i32, %arg1: i32) -> (i32, i32, i32) {
    %c0_i32 = arith.constant 0 : i32
    %c0_i32_0 = arith.constant 0 : i32
    %c0_i32_1 = arith.constant 0 : i32
    return %arg0, %c0_i32, %c0_i32_0 : i32, i32, i32
  }
  func.func @transform_4(%arg0: i32, %arg1: i32) -> (i32, i32, i32, i32) {
    %c0_i32 = arith.constant 0 : i32
    %c0_i32_0 = arith.constant 0 : i32
    %c0_i32_1 = arith.constant 0 : i32
    %c0_i32_2 = arith.constant 0 : i32
    return %arg1, %c0_i32, %c0_i32_0, %c0_i32_1 : i32, i32, i32, i32
  }
  func.func @transform_5(%arg0: i32, %arg1: i32) -> (i32, i32, i32, i32) {
    %c0_i32 = arith.constant 0 : i32
    %c0_i32_0 = arith.constant 0 : i32
    %c0_i32_1 = arith.constant 0 : i32
    %c0_i32_2 = arith.constant 0 : i32
    return %arg1, %c0_i32, %c0_i32_0, %c0_i32_1 : i32, i32, i32, i32
  }
  func.func @transform_6(%arg0: i32, %arg1: i32) -> (i32, i32, i32, i32) {
    %c0_i32 = arith.constant 0 : i32
    %c0_i32_0 = arith.constant 0 : i32
    %c0_i32_1 = arith.constant 0 : i32
    %c0_i32_2 = arith.constant 0 : i32
    return %arg1, %c0_i32, %c0_i32_0, %c0_i32_1 : i32, i32, i32, i32
  }
  func.func @transform_7(%arg0: i32, %arg1: i32) -> (i32, i32, i32) {
    %c0_i32 = arith.constant 0 : i32
    %c0_i32_0 = arith.constant 0 : i32
    %c0_i32_1 = arith.constant 0 : i32
    return %arg1, %c0_i32, %c0_i32_0 : i32, i32, i32
  }
  func.func @transform_8(%arg0: i32, %arg1: i32) -> (i32, i32, i32, i32) {
    %c0_i32 = arith.constant 0 : i32
    %c0_i32_0 = arith.constant 0 : i32
    %c0_i32_1 = arith.constant 0 : i32
    %c0_i32_2 = arith.constant 0 : i32
    return %arg1, %c0_i32, %c0_i32_0, %c0_i32_1 : i32, i32, i32, i32
  }
  func.func @transform_9(%arg0: i32, %arg1: i32) -> (i32, i32, i32, i32) {
    %c0_i32 = arith.constant 0 : i32
    %c0_i32_0 = arith.constant 0 : i32
    %c0_i32_1 = arith.constant 0 : i32
    %c0_i32_2 = arith.constant 0 : i32
    return %arg1, %c0_i32, %c0_i32_0, %c0_i32_1 : i32, i32, i32, i32
  }
  func.func @transform_10(%arg0: i32, %arg1: i32) -> (i32, i32, i32, i32) {
    %c0_i32 = arith.constant 0 : i32
    %c0_i32_0 = arith.constant 0 : i32
    %c0_i32_1 = arith.constant 0 : i32
    %c0_i32_2 = arith.constant 0 : i32
    return %arg1, %c0_i32, %c0_i32_0, %c0_i32_1 : i32, i32, i32, i32
  }
  func.func @transform_11(%arg0: i32, %arg1: i32) -> (i32, i32, i32) {
    %c0_i32 = arith.constant 0 : i32
    %c0_i32_0 = arith.constant 0 : i32
    %c0_i32_1 = arith.constant 0 : i32
    return %arg1, %c0_i32, %c0_i32_0 : i32, i32, i32
  }
  func.func @transform_12(%arg0: i32, %arg1: i32) -> (i32, i32, i32, i32) {
    %c0_i32 = arith.constant 0 : i32
    %c0_i32_0 = arith.constant 0 : i32
    %c0_i32_1 = arith.constant 0 : i32
    %c0_i32_2 = arith.constant 0 : i32
    return %arg1, %c0_i32, %c0_i32_0, %c0_i32_1 : i32, i32, i32, i32
  }
  func.func @transform_13(%arg0: i32, %arg1: i32) -> (i32, i32, i32, i32) {
    %c0_i32 = arith.constant 0 : i32
    %c0_i32_0 = arith.constant 0 : i32
    %c0_i32_1 = arith.constant 0 : i32
    %c0_i32_2 = arith.constant 0 : i32
    return %arg1, %c0_i32, %c0_i32_0, %c0_i32_1 : i32, i32, i32, i32
  }
  func.func @transform_14(%arg0: i32, %arg1: i32) -> (i32, i32, i32) {
    %c0_i32 = arith.constant 0 : i32
    %c0_i32_0 = arith.constant 0 : i32
    %c0_i32_1 = arith.constant 0 : i32
    return %arg1, %c0_i32, %c0_i32_0 : i32, i32, i32
  }
  func.func @transform_15(%arg0: i32, %arg1: i32) -> (i32, i32, i32) {
    %c0_i32 = arith.constant 0 : i32
    %c0_i32_0 = arith.constant 0 : i32
    %c0_i32_1 = arith.constant 0 : i32
    return %arg1, %c0_i32, %c0_i32_0 : i32, i32, i32
  }
  func.func @transform_16(%arg0: i32, %arg1: i32) -> (i32, i32, i32) {
    %c0_i32 = arith.constant 0 : i32
    %c0_i32_0 = arith.constant 0 : i32
    %c0_i32_1 = arith.constant 0 : i32
    return %arg1, %c0_i32, %c0_i32_0 : i32, i32, i32
  }
  func.func @transform_17(%arg0: i32, %arg1: i32) -> (i32, i32, i32) {
    %c0_i32 = arith.constant 0 : i32
    %c0_i32_0 = arith.constant 0 : i32
    %c0_i32_1 = arith.constant 0 : i32
    return %arg1, %c0_i32, %c0_i32_0 : i32, i32, i32
  }
  func.func @transform_18(%arg0: i32, %arg1: i32) -> (i32, i32) {
    %c0_i32 = arith.constant 0 : i32
    %c0_i32_0 = arith.constant 0 : i32
    return %arg0, %c0_i32 : i32, i32
  }
}

</mosaic_0001>

<bundles_post_ra>
// kernel: decoder_forward.1
= control target key start
LH: loop header
LB: loop body
LE: loop exit
PB: predicated region body
PF: predicated region fallthrough
CT: control target
= control target key end

     0   :  { %s7016_s0 = inlined_call_operand.vmem [shape: f32[16,32], index: 0, kind: input, shape index: {}]   ;;  %s7017_s1 = inlined_call_operand.vmem [shape: bf16[16,32], index: 1, kind: input, shape index: {}]   ;;  %s7018_s2 = inlined_call_operand.vmem [shape: f32[2,8,8], index: 2, kind: input, shape index: {}]   ;;  %s7019_s3 = inlined_call_operand.vmem [shape: f32[2,1,8], index: 3, kind: input, shape index: {}]   ;;  %s7020_s4 = inlined_call_operand.vmem [shape: bf16[2,4,32,24], index: 4, kind: input, shape index: {}]   ;;  %s7021_s5 = inlined_call_operand.vmem [shape: f32[2,4,1,24], index: 5, kind: input, shape index: {}]   ;;  %s7022_s6 = inlined_call_operand.vmem [shape: bf16[2,4,8,32], index: 6, kind: input, shape index: {}]   ;;  %s7023_s7 = inlined_call_operand.vmem [shape: f32[2,1,32], index: 7, kind: input, shape index: {}]   ;;  %s7024_s8 = inlined_call_operand.vmem [shape: bf16[2,4,32,24], index: 8, kind: input, shape index: {}]   ;;  %s7025_s9 = inlined_call_operand.vmem [shape: f32[2,4,1,24], index: 9, kind: input, shape index: {}]   ;;  %s7026_s10 = inlined_call_operand.vmem [shape: bf16[2,4,8,32], index: 10, kind: input, shape index: {}]   ;;  %s7027_s11 = inlined_call_operand.vmem [shape: f32[2,1,32], index: 11, kind: input, shape index: {}]   ;;  %s7028_s12 = inlined_call_operand.vmem [shape: f32[2,3,1,32], index: 12, kind: input, shape index: {}]   ;;  %s7029_s13 = inlined_call_operand.vmem [shape: f32[2,3,1,32], index: 13, kind: input, shape index: {}]   ;;  %s7030_s14 = inlined_call_operand.vmem [shape: bf16[2,32,128], index: 14, kind: input, shape index: {}]   ;;  %s7031_s15 = inlined_call_operand.vmem [shape: f32[2,1,128], index: 15, kind: input, shape index: {}]   ;;  %s7032_s16 = inlined_call_operand.vmem [shape: bf16[2,128,32], index: 16, kind: input, shape index: {}]   ;;  %s7033_s17 = inlined_call_operand.vmem [shape: f32[2,1,32], index: 17, kind: input, shape index: {}]   ;;  %s7034_s18 = inlined_call_operand.hbm [shape: f32[16,32], index: 18, kind: output, shape index: {}]  }
   0x1   :  { %7043 = sst [smem:[#allocation12_spill]] %s7016_s0 }
   0x2   :  { %7044 = sst [smem:[#allocation13_spill]] %s7017_s1 }
   0x3   :  { %7045 = sst [smem:[#allocation14_spill]] %s7018_s2 }
   0x4   :  { %7046 = sst [smem:[#allocation15_spill]] %s7019_s3 }
   0x5   :  { %7047 = sst [smem:[#allocation16_spill]] %s7020_s4 }
   0x6   :  { %7048 = sst [smem:[#allocation17_spill]] %s7021_s5 }
   0x7   :  { %7049 = sst [smem:[#allocation18_spill]] %s7022_s6 }
   0x8   :  { %7050 = sst [smem:[#allocation19_spill]] %s7023_s7 }
   0x9   :  { %7051 = sst [smem:[#allocation20_spill]] %s7024_s8 }
   0xa   :  { %7052 = sst [smem:[#allocation21_spill]] %s7025_s9 }
   0xb   :  { %7053 = sst [smem:[#allocation22_spill]] %s7034_s18 }
   0xc   :  { %23 = vsyncpa [#allocation5], 0  ;;  %s6355_s27 = smov 0   ;;  %s6357_s28 = smov 0  }
   0xd   :  { %s6359_s29 = smov 0  }
   0xe LB: > { %7054 = sst [smem:[#allocation7_spill]] %s6243_s27  ;;  %s38_s0 = sadd.s32 1, %s6247_s28  ;;  %s6251_s29 = sphi %s6359_s29, %s29_s29   ;;  %s6247_s28 = sphi %s6357_s28, %s7081_s28   ;;  %s6243_s27 = sphi %s6355_s27, %s7080_s27  }
   0xf   : > { %7055 = sst [smem:[#allocation8_spill]] %s6247_s28  ;;  %p39_p0 = scmp.ge.s32.totalorder %s38_s0, 2 }
  0x10   : > { %7056 = sst [smem:[#allocation9_spill]] %s6251_s29  ;;  %p5414_p1 = scmp.ge.s32.totalorder %s6251_s29, 1 }
  0x11   : > { %p686_p2 = scmp.lt.s32.totalorder %s6251_s29, 3  ;;  %s7083_s0 = smov (%p39_p0, %s38_s0), 0 }
  0x12   : > { %7057 = sst [smem:[#allocation10_spill]] %s7083_s0 }
  0x13   : > { %p687_p3 = pnand %p5414_p1, %p686_p2 }
  0x15   : > { %690 = sbr.rel (%p687_p3) target bundleno = 10081 (0x2761), region = 92 }
  0x1c   : > { %p830_p4 = scmp.lt.s32.totalorder %s6243_s27, 1  ;;  %s7058_s4 = sld [smem:[#allocation16_spill]] }
  0x1d   : > { %s7060_s5 = sld [smem:[#allocation17_spill]]  ;;  %s7062_s6 = sld [smem:[#allocation18_spill]] }
  0x1e   : > { %s6378_s19 = scalar_select %p830_p4, %s6243_s27, 1 }
  0x1f   : > { %s7063_s8 = sld [smem:[#allocation20_spill]]  ;;  %s7064_s9 = sld [smem:[#allocation21_spill]] }
  0x20   : > { %s5592_s1 = sshll.u32 %s6378_s19, 6  ;;  %s5417_s20 = sshll.u32 %s6378_s19, 2 }
  0x21   : > { %s5593_s26 = sshll.u32 %s6378_s19, 4  ;;  %s6058_s29 = smul.u32 3, %s6378_s19 }
  0x22   : > { %s6385_s2 = scalar_lea.vmem %s7058_s4, %s5592_s1  ;;  %s6415_s30 = scalar_lea.vmem %s7026_s10, %s5593_s26 }
  0x23   : > { %7059 = sst [smem:[#allocation11_spill]] %s6385_s2  ;;  %s6390_s25 = scalar_lea.vmem %s7060_s5, %s5417_s20 }
  0x24   : > { %s6400_s3 = scalar_lea.vmem %s7062_s6, %s5593_s26  ;;  %s6425_s27 = scalar_lea.vmem %s7030_s14, %s5593_s26 }
  0x25   : > { %s6405_s22 = scalar_lea.vmem %s7063_s8, %s5592_s1  ;;  %s6410_s23 = scalar_lea.vmem %s7064_s9, %s5417_s20 }
  0x26   : > { %s6434_s5 = scalar_lea.vmem %s7028_s12, %s6058_s29  ;;  %s6439_s28 = scalar_lea.vmem %s7029_s13, %s6058_s29 }
  0x27   : > { %s6444_s6 = scalar_lea.vmem %s7032_s16, %s5592_s1  ;;  %s887_s8 = scalar_lea.vmem %s7033_s17, %s6378_s19 }
  0x28   : > { %s7065_s21 = sld [smem:[#allocation7_spill]] }
  0x2e   : > { %p5429_p5 = scmp.ne.s32.totalorder %s7065_s21, 0 }
  0x2f   : > { %s7066_s4 = sld [smem:[#allocation12_spill]] (!%p5429_p5)  ;;  %vm896_vm0 = vcmask (!%p5429_p5), 261120  }
  0x30   : > { %893 = sbr.rel (%p5429_p5) target bundleno = 55 (0x37), region = 96 }
  0x35   : > { %v894_v0 = vld [vmem:[%s7066_s4] sm:$0xff] (!%p5429_p5)  ;;  %v895_v1 = vld [vmem:[%s7066_s4 + $0x8] sm:$0xff] (!%p5429_p5) }
  0x36   : > { %897 = vst.msk [vmem:[#allocation4] sm:$0xff] (!%p5429_p5), %vm896_vm0, %v894_v0  ;;  %898 = vst.msk [vmem:[#allocation4 + $0x8] sm:$0xff] (!%p5429_p5), %vm896_vm0, %v895_v1 }
  0x37 PF: > { %s7067_s1 = sld [smem:[#allocation11_spill]]  ;;  %v6253_v3 = vmov 0.0   ;;  %vm6254_vm1 = vmmov 0   ;;  %vm907_vm2 = vcmask 261120   ;;  %v5431_v8 = vld [vmem:[%s6390_s25] ss:$0 sm:$0xff] }
  0x38   : > { %5726 = vmatprep.subr.bf16.mxu1 %v6253_v3  ;;  %5749 = vmatprep.subr.mxu0 %v6253_v3  ;;  %908 = vst.msk [vmem:[#allocation3] sm:$0xff] %vm907_vm2, %v6253_v3  ;;  %909 = vst.msk [vmem:[#allocation3 + $0x8] sm:$0xff] %vm907_vm2, %v6253_v3  ;;  %s6255_s18 = smov 112   ;;  %s6256_s24 = smov 120   ;;  %vm980_vm3 = vcmask 64512   ;;  %vm1321_vm4 = vcmask 1043456  }
  0x39   : > { %5730 = vmatprep.mubr.msk.bf16.mxu1 %vm6254_vm1, %v6253_v3  ;;  %5751 = vmatprep.mubr.msk.f32.mxu0 %vm6254_vm1, %v6253_v3  ;;  %s7068_s26 = sld [smem:[#allocation14_spill]]  ;;  %v1317_v51 = vld [vmem:[%s6400_s3] sm:$0xf]  ;;  %s7069_s2 = sld [smem:[#allocation19_spill]] }
  0x3a   : > { %v1323_v52 = vsel %vm1321_vm4, %v1317_v51, 0  ;;  %v5447_v55 = vld [vmem:[%s6390_s25 + $0x1] ss:$0 sm:$0xff]  ;;  %s7072_s21 = sld [smem:[#allocation15_spill]] }
  0x3d   : > { %v6096_v2 = vld [vmem:[%s7067_s1] sm:$0xff]   ;;  %v6097_v4 = vld [vmem:[%s7067_s1 + $0x8] sm:$0xff]   ;;  %v6098_v48 = vld [vmem:[%s7067_s1 + $0x10] sm:$0xff]  }
  0x3e   : > { %5727 = vmatpush3.bf16.msra.mxu1 %v6096_v2  ;;  %v6463_v5 = vld [vmem:[#allocation4] sm:$0xff]  ;;  %v6465_v6 = vld [vmem:[#allocation4 + $0x8] sm:$0xff]  ;;  %v6099_v50 = vld [vmem:[%s7067_s1 + $0x18] sm:$0xff]  }
  0x3f   : > { %5728 = vmatprep.subr.bf16.mxu1 %v6253_v3  ;;  %v6476_v7 = vpack.c.bf16 %v6465_v6, %v6463_v5  ;;  %v6495_v18 = vld [vmem:[%s7068_s26] sm:$0xff]  ;;  %v6513_v35 = vld [vmem:[%s7068_s26 + $0x8] sm:$0xff]  ;;  %s7070_s9 = scalar_lea.vmem %s7069_s2, %s6378_s19 }
  0x42   : > { %5729 = vmatpush3.bf16.msra.mxu1 %v6097_v4  ;;  %v1312_v4 = vld [vmem:[#allocation3] sm:$0xff] }
  0x43   : > { %5734 = vmatprep.subr.mxu1 %v6253_v3 }
  0x45   : > { %5731 = vmatmul.mubr.msk.bf16.vlgmr.msra.gmra.mrb[0].mxu1 %vm907_vm2, %v6476_v7 }
  0x46   : > { %5736 = vmatprep.mubr.msk.f32.mxu1 %vm6254_vm1, %v6253_v3 }
 0x118   : > { %v970_v9 = vpop.f32.mrb[0].mxu1 }
 0x119   : > { %v971_v10 = vadd.f32 %v5431_v8, %v970_v9  ;;  %v5732_v11 = vpop.f32.mrb[1].mxu1  ;;  %v1313_v9 = vld [vmem:[#allocation3 + $0x8] sm:$0xff] }
 0x11a   : > { %v973_v12 = vpop.f32.mrb[2].mxu1 }
 0x11b   : > { %v974_v13 = vadd.f32 %v5431_v8, %v973_v12  ;;  %1068 = vrot.lane.b32.xlu1 %v971_v10, %s6255_s18  ;;  %978 = vrot.lane.b32.xlu0 %v971_v10, %s6256_s24  ;;  %v5733_v14 = vpop.f32.mrb[3].mxu1 }
 0x18d   : > { %v979_v15 = vpop.permute.xlu0 %978  ;;  %v1069_v16 = vpop.permute.xlu1 %1068 }
 0x18e   : > { %5735 = vmatpush3.xpose.msk.msra.mxu1 %vm980_vm3, %v979_v15 }
 0x18f   : > { %5739 = vmatprep.subr.mxu1 %v6253_v3 }
 0x191   : > { %5737 = vmatmul.mubr.msk.f32.vlgmr.msra.gmra.mrb[4].mxu1 %vm980_vm3, %v971_v10 }
 0x192   : > { %5740 = vmatpush3.msra.mxu1 %v1069_v16  ;;  %5741 = vmatprep.mubr.msk.f32.mxu1 %vm6254_vm1, %v6253_v3 }
 0x193   : > { %5744 = vmatprep.subr.mxu1 %v6253_v3 }
 0x264   : > { %v1051_v17 = vpop.f32.mrb[4].mxu1 }
 0x265   : > { %v1055_v19 = vmul.f32 0.35355338, %v1051_v17  ;;  %v5738_v20 = vpop.f32.mrb[5].mxu1 }
 0x267   : > { %v1056_v21 = vadd.f32 %v1055_v19, %v6495_v18 }
 0x269   : > { %v1057_v22 = vsel %vm980_vm3, %v1056_v21, -inf }
 0x26a   : > { %1058 = vmax.xlane.f32.xlu0 %v1057_v22 }
 0x2f7   : > { %v1059_v23 = vpop.xlane.xlu0 %1058 }
 0x2f8   : > { %v1060_v24 = vsub.f32 %v1056_v21, %v1059_v23 }
 0x2fa   : > { %v1061_v25 = vmul.f32 1.442695, %v1060_v24 }
 0x2fc   : > { %6123 = vpow2.f32 %v1061_v25 }
 0x306   : > { %v6124_v26 = vpop.eup %6123 }
 0x307   : > { %v1063_v27 = vsel %vm980_vm3, %v6124_v26, 0.0 }
 0x308   : > { %1064 = vadd.xlane.f32.xlu1 %v1063_v27 }
 0x319   : > { %1146 = vrot.lane.b32.xlu1 %v974_v13, %s6256_s24 }
 0x395   : > { %v1065_v28 = vpop.xlane.xlu1 %1064 }
 0x396   : > { %6125 = vrcp.f32 %v1065_v28 }
 0x399   : > { %v1147_v31 = vpop.permute.xlu1 %1146 }
 0x3a0   : > { %v6126_v29 = vpop.eup %6125 }
 0x3a1   : > { %v1067_v30 = vmul.f32 %v6126_v29, %v6124_v26 }
 0x3a3   : > { %5742 = vmatmul.mubr.msk.f32.vlgmr.msra.gmra.mrb[6].mxu1 %vm980_vm3, %v1067_v30 }
 0x3a4   : > { %5745 = vmatpush3.xpose.msk.msra.mxu1 %vm980_vm3, %v1147_v31  ;;  %5746 = vmatprep.mubr.msk.f32.mxu1 %vm6254_vm1, %v6253_v3 }
 0x3a5   : > { %5754 = vmatprep.subr.bf16.mxu1 %v6253_v3 }
 0x3a7   : > { %5747 = vmatmul.mubr.msk.f32.vlgmr.msra.gmra.mrb[8].mxu1 %vm980_vm3, %v974_v13 }
 0x3a8   : > { %5756 = vmatprep.mubr.msk.bf16.mxu1 %vm6254_vm1, %v6253_v3  ;;  %5755 = vmatpush3.bf16.msra.mxu1 %v1323_v52 }
 0x3a9   : > { %5768 = vmatprep.subr.mxu1 %v6253_v3 }
 0x476   : > { %v1140_v32 = vpop.f32.mrb[6].mxu1 }
 0x477   : > { %1144 = vst.msk [vmem:[#allocation2] sm:$0xff] %vm980_vm3, %v1140_v32  ;;  %v5743_v33 = vpop.f32.mrb[7].mxu1 }
 0x47a   : > { %v1218_v34 = vpop.f32.mrb[8].mxu1 }
 0x47b   : > { %v1222_v36 = vmul.f32 0.35355338, %v1218_v34  ;;  %v5748_v37 = vpop.f32.mrb[9].mxu1 }
 0x47d   : > { %v1223_v38 = vadd.f32 %v6513_v35, %v1222_v36 }
 0x47e   : > { %v1314_v57 = vld [vmem:[#allocation2] sm:$0xff] }
 0x47f   : > { %v1224_v39 = vsel %vm980_vm3, %v1223_v38, -inf }
 0x480   : > { %1225 = vmax.xlane.f32.xlu1 %v1224_v39 }
 0x50d   : > { %v1226_v40 = vpop.xlane.xlu1 %1225 }
 0x50e   : > { %v1227_v41 = vsub.f32 %v1223_v38, %v1226_v40 }
 0x510   : > { %v1228_v42 = vmul.f32 1.442695, %v1227_v41 }
 0x512   : > { %6127 = vpow2.f32 %v1228_v42 }
 0x51c   : > { %v6128_v43 = vpop.eup %6127 }
 0x51d   : > { %v1230_v44 = vsel %vm980_vm3, %v6128_v43, 0.0 }
 0x51e   : > { %1231 = vadd.xlane.f32.xlu0 %v1230_v44  ;;  %v6100_v44 = vld [vmem:[%s7067_s1 + $0x20] sm:$0xff]  }
 0x534   : > { %1235 = vrot.lane.b32.xlu0 %v974_v13, %s6255_s18 }
 0x5ab   : > { %v1232_v45 = vpop.xlane.xlu0 %1231 }
 0x5ac   : > { %6129 = vrcp.f32 %v1232_v45 }
 0x5af   : > { %v1236_v46 = vpop.permute.xlu0 %1235 }
 0x5b0   : > { %5750 = vmatpush3.msra.mxu0 %v1236_v46  ;;  %v6101_v46 = vld [vmem:[%s7067_s1 + $0x28] sm:$0xff]  }
 0x5b1   : > { %5760 = vmatprep.subr.bf16.mxu0 %v6253_v3 }
 0x5b6   : > { %v6130_v47 = vpop.eup %6129 }
 0x5b7   : > { %v1234_v49 = vmul.f32 %v6130_v47, %v6128_v43  ;;  %v5457_v47 = vld [vmem:[%s6400_s3 + $0x4] sm:$0xf] }
 0x5b9   : > { %5752 = vmatmul.mubr.msk.f32.vlgmr.msra.gmra.mrb[0].mxu0 %vm980_vm3, %v1234_v49 }
 0x5ba   : > { %5761 = vmatpush3.bf16.msra.mxu0 %v6098_v48  ;;  %5764 = vmatprep.mubr.msk.bf16.mxu0 %vm6254_vm1, %v6253_v3  ;;  %v1781_v48 = vsel %vm1321_vm4, %v5457_v47, 0 }
 0x5bb   : > { %5762 = vmatprep.subr.bf16.mxu0 %v6253_v3 }
 0x5be   : > { %5763 = vmatpush3.bf16.msra.mxu0 %v6099_v50 }
 0x5bf   : > { %5778 = vmatprep.subr.mxu0 %v6253_v3 }
 0x5c1   : > { %5765 = vmatmul.mubr.msk.bf16.vlgmr.msra.gmra.mrb[4].mxu0 %vm907_vm2, %v6476_v7 }
 0x5c2   : > { %5780 = vmatprep.mubr.msk.f32.mxu0 %vm6254_vm1, %v6253_v3 }
 0x68c   : > { %v1307_v53 = vpop.f32.mrb[0].mxu0 }
 0x68d   : > { %1311 = vst.msk [vmem:[#allocation2 + $0x8] sm:$0xff] %vm980_vm3, %v1307_v53  ;;  %v5753_v54 = vpop.f32.mrb[1].mxu0  ;;  %v5464_v53 = vld [vmem:[%s6390_s25 + $0x2] ss:$0 sm:$0xff] }
 0x694   : > { %v1429_v56 = vpop.f32.mrb[4].mxu0  ;;  %v1315_v58 = vld [vmem:[#allocation2 + $0x8] sm:$0xff] }
 0x695   : > { %v1430_v59 = vadd.f32 %v5447_v55, %v1429_v56  ;;  %v5766_v60 = vpop.f32.mrb[5].mxu0  ;;  %v1316_v61 = vpack.c.bf16 %v1315_v58, %v1314_v57 }
 0x696   : > { %v1432_v62 = vpop.f32.mrb[6].mxu0 }
 0x697   : > { %v1433_v63 = vadd.f32 %v5447_v55, %v1432_v62  ;;  %1437 = vrot.lane.b32.xlu0 %v1430_v59, %s6256_s24  ;;  %v5767_v0 = vpop.f32.mrb[7].mxu0  ;;  %5757 = vmatmul.mubr.msk.bf16.vlgmr.msra.gmra.mrb[12].mxu1 %vm980_vm3, %v1316_v61 }
 0x698   : > { %5770 = vmatprep.mubr.msk.f32.mxu1 %vm6254_vm1, %v6253_v3 }
 0x699   : > { %1604 = vrot.lane.b32.xlu1 %v1433_v63, %s6256_s24 }
 0x709   : > { %v1438_v1 = vpop.permute.xlu0 %1437 }
 0x70a   : > { %5769 = vmatpush3.xpose.msk.msra.mxu1 %vm980_vm3, %v1438_v1 }
 0x70b   : > { %v1605_v2 = vpop.permute.xlu1 %1604  ;;  %5773 = vmatprep.subr.mxu1 %v6253_v3 }
 0x70c   : > { %5779 = vmatpush3.xpose.msk.msra.mxu0 %vm980_vm3, %v1605_v2 }
 0x70d   : > { %5771 = vmatmul.mubr.msk.f32.vlgmr.msra.gmra.mrb[10].mxu1 %vm980_vm3, %v1430_v59  ;;  %5788 = vmatprep.subr.bf16.mxu0 %v6253_v3 }
 0x70e   : > { %5775 = vmatprep.mubr.msk.f32.mxu1 %vm6254_vm1, %v6253_v3 }
 0x70f   : > { %5781 = vmatmul.mubr.msk.f32.vlgmr.msra.gmra.mrb[2].mxu0 %vm980_vm3, %v1433_v63 }
 0x710   : > { %5790 = vmatprep.mubr.msk.bf16.mxu0 %vm6254_vm1, %v6253_v3  ;;  %5789 = vmatpush3.bf16.msra.mxu0 %v1781_v48 }
 0x711   : > { %5802 = vmatprep.subr.mxu0 %v6253_v3 }
 0x76a   : > { %v1359_v8 = vpop.f32.mrb[12].mxu1 }
 0x76b   : > { %v1366_v10 = vadd.f32 %v1359_v8, %v1312_v4  ;;  %v5758_v11 = vpop.f32.mrb[13].mxu1 }
 0x76c   : > { %v1362_v12 = vpop.f32.mrb[14].mxu1 }
 0x76d   : > { %1368 = vst.msk [vmem:[#allocation3] sm:$0xff] %vm907_vm2, %v1366_v10  ;;  %v1367_v13 = vadd.f32 %v1362_v12, %v1313_v9  ;;  %v5759_v14 = vpop.f32.mrb[15].mxu1 }
 0x76f   : > { %1369 = vst.msk [vmem:[#allocation3 + $0x8] sm:$0xff] %vm907_vm2, %v1367_v13 }
 0x774   : > { %v1770_v1 = vld [vmem:[#allocation3] sm:$0xff] }
 0x776   : > { %v1771_v9 = vld [vmem:[#allocation3 + $0x8] sm:$0xff] }
 0x7e0   : > { %v1509_v15 = vpop.f32.mrb[10].mxu1 }
 0x7e1   : > { %v1513_v16 = vmul.f32 0.35355338, %v1509_v15  ;;  %v5772_v17 = vpop.f32.mrb[11].mxu1 }
 0x7e2   : > { %v1676_v19 = vpop.f32.mrb[2].mxu0 }
 0x7e3   : > { %v1680_v20 = vmul.f32 0.35355338, %v1676_v19  ;;  %v5782_v21 = vpop.f32.mrb[3].mxu0  ;;  %v1514_v22 = vadd.f32 %v1513_v16, %v6495_v18 }
 0x7e5   : > { %v1515_v23 = vsel %vm980_vm3, %v1514_v22, -inf  ;;  %v1681_v24 = vadd.f32 %v6513_v35, %v1680_v20 }
 0x7e6   : > { %1516 = vmax.xlane.f32.xlu0 %v1515_v23 }
 0x7e7   : > { %v1682_v25 = vsel %vm980_vm3, %v1681_v24, -inf }
 0x7e8   : > { %1683 = vmax.xlane.f32.xlu1 %v1682_v25 }
 0x7f9   : > { %1693 = vrot.lane.b32.xlu1 %v1433_v63, %s6255_s18 }
 0x873   : > { %v1517_v26 = vpop.xlane.xlu0 %1516 }
 0x874   : > { %v1518_v27 = vsub.f32 %v1514_v22, %v1517_v26 }
 0x875   : > { %v1684_v28 = vpop.xlane.xlu1 %1683 }
 0x876   : > { %v1519_v29 = vmul.f32 1.442695, %v1518_v27  ;;  %v1685_v30 = vsub.f32 %v1681_v24, %v1684_v28 }
 0x878   : > { %6131 = vpow2.f32 %v1519_v29  ;;  %v1686_v31 = vmul.f32 1.442695, %v1685_v30 }
 0x879   : > { %v1694_v42 = vpop.permute.xlu1 %1693 }
 0x87a   : > { %6133 = vpow2.f32 %v1686_v31 }
 0x882   : > { %v6132_v32 = vpop.eup %6131 }
 0x883   : > { %v1521_v33 = vsel %vm980_vm3, %v6132_v32, 0.0 }
 0x884   : > { %v6134_v34 = vpop.eup %6133  ;;  %1522 = vadd.xlane.f32.xlu0 %v1521_v33 }
 0x885   : > { %v1688_v36 = vsel %vm980_vm3, %v6134_v34, 0.0 }
 0x888   : > { %1689 = vadd.xlane.f32.xlu0 %v1688_v36 }
 0x89e   : > { %1526 = vrot.lane.b32.xlu0 %v1430_v59, %s6255_s18 }
 0x911   : > { %v1523_v37 = vpop.xlane.xlu0 %1522 }
 0x912   : > { %6135 = vrcp.f32 %v1523_v37 }
 0x915   : > { %v1690_v38 = vpop.xlane.xlu0 %1689 }
 0x916   : > { %6137 = vrcp.f32 %v1690_v38 }
 0x919   : > { %v1527_v39 = vpop.permute.xlu0 %1526 }
 0x91a   : > { %5774 = vmatpush3.msra.mxu1 %v1527_v39 }
 0x91b   : > { %5783 = vmatprep.subr.mxu1 %v6253_v3 }
 0x91c   : > { %v6136_v40 = vpop.eup %6135 }
 0x91d   : > { %v1525_v41 = vmul.f32 %v6136_v40, %v6132_v32 }
 0x91f   : > { %5776 = vmatmul.mubr.msk.f32.vlgmr.msra.gmra.mrb[16].mxu1 %vm980_vm3, %v1525_v41 }
 0x920   : > { %v6138_v43 = vpop.eup %6137  ;;  %5784 = vmatpush3.msra.mxu1 %v1694_v42  ;;  %5785 = vmatprep.mubr.msk.f32.mxu1 %vm6254_vm1, %v6253_v3  ;;  %v6102_v42 = vld [vmem:[%s7067_s1 + $0x30] sm:$0xff]  }
 0x921   : > { %v1692_v45 = vmul.f32 %v6138_v43, %v6134_v34  ;;  %5794 = vmatprep.subr.bf16.mxu1 %v6253_v3 }
 0x923   : > { %5786 = vmatmul.mubr.msk.f32.vlgmr.msra.gmra.mrb[18].mxu1 %vm980_vm3, %v1692_v45  ;;  %v5474_v45 = vld [vmem:[%s6400_s3 + $0x8] sm:$0xf] }
 0x924   : > { %5795 = vmatpush3.bf16.msra.mxu1 %v6100_v44  ;;  %5798 = vmatprep.mubr.msk.bf16.mxu1 %vm6254_vm1, %v6253_v3  ;;  %v6103_v44 = vld [vmem:[%s7067_s1 + $0x38] sm:$0xff]  }
 0x925   : > { %5796 = vmatprep.subr.bf16.mxu1 %v6253_v3 }
 0x928   : > { %5797 = vmatpush3.bf16.msra.mxu1 %v6101_v46  ;;  %v2239_v46 = vsel %vm1321_vm4, %v5474_v45, 0 }
 0x929   : > { %5812 = vmatprep.subr.mxu1 %v6253_v3 }
 0x92b   : > { %5799 = vmatmul.mubr.msk.bf16.vlgmr.msra.gmra.mrb[20].mxu1 %vm907_vm2, %v6476_v7 }
 0x92c   : > { %5814 = vmatprep.mubr.msk.f32.mxu1 %vm6254_vm1, %v6253_v3 }
 0x9f2   : > { %v1598_v49 = vpop.f32.mrb[16].mxu1 }
 0x9f3   : > { %1602 = vst.msk [vmem:[#allocation2] sm:$0xff] %vm980_vm3, %v1598_v49  ;;  %v5777_v50 = vpop.f32.mrb[17].mxu1 }
 0x9f6   : > { %v1765_v51 = vpop.f32.mrb[18].mxu1 }
 0x9f7   : > { %1769 = vst.msk [vmem:[#allocation2 + $0x8] sm:$0xff] %vm980_vm3, %v1765_v51  ;;  %v5787_v52 = vpop.f32.mrb[19].mxu1  ;;  %v5481_v51 = vld [vmem:[%s6390_s25 + $0x3] ss:$0 sm:$0xff]  ;;  %s7074_s25 = scalar_lea.vmem %s7031_s15, %s6378_s19 }
 0x9fa   : > { %v1772_v55 = vld [vmem:[#allocation2] sm:$0xff] }
 0x9fe   : > { %v1887_v54 = vpop.f32.mrb[20].mxu1  ;;  %v1773_v56 = vld [vmem:[#allocation2 + $0x8] sm:$0xff] }
 0x9ff   : > { %v1888_v57 = vadd.f32 %v5464_v53, %v1887_v54  ;;  %v5800_v58 = vpop.f32.mrb[21].mxu1  ;;  %v1774_v59 = vpack.c.bf16 %v1773_v56, %v1772_v55 }
 0xa00   : > { %v1890_v60 = vpop.f32.mrb[22].mxu1 }
 0xa01   : > { %1895 = vrot.lane.b32.xlu0 %v1888_v57, %s6256_s24  ;;  %v5801_v61 = vpop.f32.mrb[23].mxu1  ;;  %5791 = vmatmul.mubr.msk.bf16.vlgmr.msra.gmra.mrb[8].mxu0 %vm980_vm3, %v1774_v59  ;;  %v1891_v62 = vadd.f32 %v5464_v53, %v1890_v60 }
 0xa02   : > { %5804 = vmatprep.mubr.msk.f32.mxu0 %vm6254_vm1, %v6253_v3 }
 0xa05   : > { %2062 = vrot.lane.b32.xlu0 %v1891_v62, %s6256_s24 }
 0xa73   : > { %v1896_v63 = vpop.permute.xlu0 %1895 }
 0xa74   : > { %5803 = vmatpush3.xpose.msk.msra.mxu0 %vm980_vm3, %v1896_v63 }
 0xa75   : > { %5807 = vmatprep.subr.mxu0 %v6253_v3 }
 0xa77   : > { %5805 = vmatmul.mubr.msk.f32.vlgmr.msra.gmra.mrb[12].mxu0 %vm980_vm3, %v1888_v57  ;;  %v2063_v0 = vpop.permute.xlu0 %2062 }
 0xa78   : > { %5813 = vmatpush3.xpose.msk.msra.mxu1 %vm980_vm3, %v2063_v0  ;;  %5809 = vmatprep.mubr.msk.f32.mxu0 %vm6254_vm1, %v6253_v3 }
 0xa79   : > { %5822 = vmatprep.subr.bf16.mxu1 %v6253_v3 }
 0xa7b   : > { %5815 = vmatmul.mubr.msk.f32.vlgmr.msra.gmra.mrb[24].mxu1 %vm980_vm3, %v1891_v62 }
 0xa7c   : > { %5824 = vmatprep.mubr.msk.bf16.mxu1 %vm6254_vm1, %v6253_v3  ;;  %5823 = vmatpush3.bf16.msra.mxu1 %v2239_v46 }
 0xa7d   : > { %5836 = vmatprep.subr.mxu1 %v6253_v3 }
 0xad4   : > { %v1817_v2 = vpop.f32.mrb[8].mxu0 }
 0xad5   : > { %v1824_v4 = vadd.f32 %v1817_v2, %v1770_v1  ;;  %v5792_v8 = vpop.f32.mrb[9].mxu0 }
 0xad6   : > { %v1820_v10 = vpop.f32.mrb[10].mxu0 }
 0xad7   : > { %1826 = vst.msk [vmem:[#allocation3] sm:$0xff] %vm907_vm2, %v1824_v4  ;;  %v1825_v11 = vadd.f32 %v1820_v10, %v1771_v9  ;;  %v5793_v12 = vpop.f32.mrb[11].mxu0 }
 0xad9   : > { %1827 = vst.msk [vmem:[#allocation3 + $0x8] sm:$0xff] %vm907_vm2, %v1825_v11 }
 0xae0   : > { %v2229_v2 = vld [vmem:[#allocation3 + $0x8] sm:$0xff] }
 0xb4a   : > { %v1967_v13 = vpop.f32.mrb[12].mxu0 }
 0xb4b   : > { %v1971_v14 = vmul.f32 0.35355338, %v1967_v13  ;;  %v5806_v15 = vpop.f32.mrb[13].mxu0 }
 0xb4d   : > { %v1972_v16 = vadd.f32 %v1971_v14, %v6495_v18 }
 0xb4e   : > { %v2134_v17 = vpop.f32.mrb[24].mxu1 }
 0xb4f   : > { %v2138_v19 = vmul.f32 0.35355338, %v2134_v17  ;;  %v5816_v20 = vpop.f32.mrb[25].mxu1  ;;  %v1973_v21 = vsel %vm980_vm3, %v1972_v16, -inf }
 0xb50   : > { %1974 = vmax.xlane.f32.xlu1 %v1973_v21 }
 0xb51   : > { %v2139_v22 = vadd.f32 %v6513_v35, %v2138_v19 }
 0xb53   : > { %v2140_v23 = vsel %vm980_vm3, %v2139_v22, -inf }
 0xb54   : > { %2141 = vmax.xlane.f32.xlu0 %v2140_v23 }
 0xbdd   : > { %v1975_v24 = vpop.xlane.xlu1 %1974 }
 0xbde   : > { %v1976_v25 = vsub.f32 %v1972_v16, %v1975_v24 }
 0xbe0   : > { %v1977_v26 = vmul.f32 1.442695, %v1976_v25 }
 0xbe1   : > { %v2142_v27 = vpop.xlane.xlu0 %2141 }
 0xbe2   : > { %6139 = vpow2.f32 %v1977_v26  ;;  %v2143_v28 = vsub.f32 %v2139_v22, %v2142_v27 }
 0xbe4   : > { %v2144_v29 = vmul.f32 1.442695, %v2143_v28 }
 0xbe6   : > { %6141 = vpow2.f32 %v2144_v29 }
 0xbec   : > { %v6140_v30 = vpop.eup %6139 }
 0xbed   : > { %v1979_v31 = vsel %vm980_vm3, %v6140_v30, 0.0 }
 0xbee   : > { %1980 = vadd.xlane.f32.xlu0 %v1979_v31 }
 0xbf0   : > { %v6142_v32 = vpop.eup %6141 }
 0xbf1   : > { %v2146_v33 = vsel %vm980_vm3, %v6142_v32, 0.0 }
 0xbf2   : > { %2147 = vadd.xlane.f32.xlu1 %v2146_v33 }
 0xc03   : > { %2151 = vrot.lane.b32.xlu1 %v1891_v62, %s6255_s18  ;;  %v2228_v62 = vld [vmem:[#allocation3] sm:$0xff] }
 0xc04   : > { %1984 = vrot.lane.b32.xlu0 %v1888_v57, %s6255_s18 }
 0xc7b   : > { %v1981_v34 = vpop.xlane.xlu0 %1980 }
 0xc7c   : > { %6143 = vrcp.f32 %v1981_v34 }
 0xc7f   : > { %v2148_v36 = vpop.xlane.xlu1 %2147  ;;  %v1985_v37 = vpop.permute.xlu0 %1984 }
 0xc80   : > { %6145 = vrcp.f32 %v2148_v36  ;;  %5808 = vmatpush3.msra.mxu0 %v1985_v37 }
 0xc81   : > { %5817 = vmatprep.subr.mxu0 %v6253_v3 }
 0xc83   : > { %v2152_v40 = vpop.permute.xlu1 %2151 }
 0xc86   : > { %v6144_v38 = vpop.eup %6143 }
 0xc87   : > { %v1983_v39 = vmul.f32 %v6144_v38, %v6140_v30  ;;  %v5491_v38 = vld [vmem:[%s6400_s3 + $0xc] sm:$0xf] }
 0xc89   : > { %5810 = vmatmul.mubr.msk.f32.vlgmr.msra.gmra.mrb[14].mxu0 %vm980_vm3, %v1983_v39  ;;  %v2697_v39 = vsel %vm1321_vm4, %v5491_v38, 0 }
 0xc8a   : > { %v6146_v41 = vpop.eup %6145  ;;  %5818 = vmatpush3.msra.mxu0 %v2152_v40  ;;  %5819 = vmatprep.mubr.msk.f32.mxu0 %vm6254_vm1, %v6253_v3 }
 0xc8b   : > { %v2150_v43 = vmul.f32 %v6146_v41, %v6142_v32  ;;  %5828 = vmatprep.subr.bf16.mxu0 %v6253_v3 }
 0xc8d   : > { %5820 = vmatmul.mubr.msk.f32.vlgmr.msra.gmra.mrb[16].mxu0 %vm980_vm3, %v2150_v43 }
 0xc8e   : > { %5829 = vmatpush3.bf16.msra.mxu0 %v6102_v42  ;;  %5832 = vmatprep.mubr.msk.bf16.mxu0 %vm6254_vm1, %v6253_v3 }
 0xc8f   : > { %5830 = vmatprep.subr.bf16.mxu0 %v6253_v3 }
 0xc92   : > { %5831 = vmatpush3.bf16.msra.mxu0 %v6103_v44 }
 0xc93   : > { %5846 = vmatprep.subr.mxu0 %v6253_v3 }
 0xc95   : > { %5833 = vmatmul.mubr.msk.bf16.vlgmr.msra.gmra.mrb[20].mxu0 %vm907_vm2, %v6476_v7 }
 0xc96   : > { %5848 = vmatprep.mubr.msk.f32.mxu0 %vm6254_vm1, %v6253_v3 }
 0xd5c   : > { %v2056_v47 = vpop.f32.mrb[14].mxu0 }
 0xd5d   : > { %2060 = vst.msk [vmem:[#allocation2] sm:$0xff] %vm980_vm3, %v2056_v47  ;;  %v5811_v48 = vpop.f32.mrb[15].mxu0 }
 0xd60   : > { %v2223_v49 = vpop.f32.mrb[16].mxu0 }
 0xd61   : > { %2227 = vst.msk [vmem:[#allocation2 + $0x8] sm:$0xff] %vm980_vm3, %v2223_v49  ;;  %v5821_v50 = vpop.f32.mrb[17].mxu0 }
 0xd64   : > { %v2230_v7 = vld [vmem:[#allocation2] sm:$0xff] }
 0xd68   : > { %v2345_v52 = vpop.f32.mrb[20].mxu0  ;;  %v2231_v53 = vld [vmem:[#allocation2 + $0x8] sm:$0xff] }
 0xd69   : > { %v2346_v54 = vadd.f32 %v5481_v51, %v2345_v52  ;;  %v5834_v55 = vpop.f32.mrb[21].mxu0  ;;  %v2232_v56 = vpack.c.bf16 %v2231_v53, %v2230_v7 }
 0xd6a   : > { %v2348_v57 = vpop.f32.mrb[22].mxu0 }
 0xd6b   : > { %v2349_v58 = vadd.f32 %v5481_v51, %v2348_v57  ;;  %2353 = vrot.lane.b32.xlu1 %v2346_v54, %s6256_s24  ;;  %v5835_v59 = vpop.f32.mrb[23].mxu0  ;;  %5825 = vmatmul.mubr.msk.bf16.vlgmr.msra.gmra.mrb[28].mxu1 %vm980_vm3, %v2232_v56 }
 0xd6c   : > { %5838 = vmatprep.mubr.msk.f32.mxu1 %vm6254_vm1, %v6253_v3 }
 0xd6d   : > { %2520 = vrot.lane.b32.xlu0 %v2349_v58, %s6256_s24 }
 0xddd   : > { %v2354_v60 = vpop.permute.xlu1 %2353 }
 0xdde   : > { %5837 = vmatpush3.xpose.msk.msra.mxu1 %vm980_vm3, %v2354_v60 }
 0xddf   : > { %v2521_v61 = vpop.permute.xlu0 %2520  ;;  %5841 = vmatprep.subr.mxu1 %v6253_v3 }
 0xde0   : > { %5847 = vmatpush3.xpose.msk.msra.mxu0 %vm980_vm3, %v2521_v61 }
 0xde1   : > { %5839 = vmatmul.mubr.msk.f32.vlgmr.msra.gmra.mrb[26].mxu1 %vm980_vm3, %v2346_v54  ;;  %5856 = vmatprep.subr.bf16.mxu0 %v6253_v3 }
 0xde2   : > { %5843 = vmatprep.mubr.msk.f32.mxu1 %vm6254_vm1, %v6253_v3 }
 0xde3   : > { %5849 = vmatmul.mubr.msk.f32.vlgmr.msra.gmra.mrb[18].mxu0 %vm980_vm3, %v2349_v58 }
 0xde4   : > { %5858 = vmatprep.mubr.msk.bf16.mxu0 %vm6254_vm1, %v6253_v3  ;;  %5857 = vmatpush3.bf16.msra.mxu0 %v2697_v39 }
 0xde5   : > { %5870 = vmatprep.subr.bf16.mxu0 %v6253_v3 }
 0xe3e   : > { %v2275_v63 = vpop.f32.mrb[28].mxu1 }
 0xe3f   : > { %v2282_v0 = vadd.f32 %v2275_v63, %v2228_v62  ;;  %v5826_v1 = vpop.f32.mrb[29].mxu1  ;;  %v6104_v63 = vld [vmem:[%s6405_s22] sm:$0xff]  }
 0xe40   : > { %v2278_v4 = vpop.f32.mrb[30].mxu1 }
 0xe41   : > { %2284 = vst.msk [vmem:[#allocation3] sm:$0xff] %vm907_vm2, %v2282_v0  ;;  %v2283_v8 = vadd.f32 %v2278_v4, %v2229_v2  ;;  %v5827_v9 = vpop.f32.mrb[31].mxu1  ;;  %v6105_v0 = vld [vmem:[%s6405_s22 + $0x8] sm:$0xff]  }
 0xe43   : > { %2285 = vst.msk [vmem:[#allocation3 + $0x8] sm:$0xff] %vm907_vm2, %v2283_v8 }
 0xe48   : > { %v2686_v47 = vld [vmem:[#allocation3] sm:$0xff] }
 0xe4a   : > { %v2687_v51 = vld [vmem:[#allocation3 + $0x8] sm:$0xff] }
 0xeb4   : > { %v2425_v10 = vpop.f32.mrb[26].mxu1 }
 0xeb5   : > { %v2429_v11 = vmul.f32 0.35355338, %v2425_v10  ;;  %v5840_v12 = vpop.f32.mrb[27].mxu1 }
 0xeb6   : > { %v2592_v13 = vpop.f32.mrb[18].mxu0 }
 0xeb7   : > { %v2596_v14 = vmul.f32 0.35355338, %v2592_v13  ;;  %v5850_v15 = vpop.f32.mrb[19].mxu0  ;;  %v2430_v16 = vadd.f32 %v2429_v11, %v6495_v18  ;;  %v5499_v13 = vld [vmem:[%s6410_s23] ss:$0 sm:$0xff] }
 0xeb9   : > { %v2431_v17 = vsel %vm980_vm3, %v2430_v16, -inf  ;;  %v2597_v19 = vadd.f32 %v6513_v35, %v2596_v14 }
 0xeba   : > { %2432 = vmax.xlane.f32.xlu1 %v2431_v17 }
 0xebb   : > { %v2598_v20 = vsel %vm980_vm3, %v2597_v19, -inf }
 0xebc   : > { %2599 = vmax.xlane.f32.xlu0 %v2598_v20 }
 0xf47   : > { %v2433_v21 = vpop.xlane.xlu1 %2432 }
 0xf48   : > { %v2434_v22 = vsub.f32 %v2430_v16, %v2433_v21 }
 0xf49   : > { %v2600_v23 = vpop.xlane.xlu0 %2599 }
 0xf4a   : > { %v2435_v24 = vmul.f32 1.442695, %v2434_v22  ;;  %v2601_v25 = vsub.f32 %v2597_v19, %v2600_v23 }
 0xf4c   : > { %6147 = vpow2.f32 %v2435_v24  ;;  %v2602_v26 = vmul.f32 1.442695, %v2601_v25  ;;  %v5494_v25 = vld [vmem:[%s6434_s5] ss:$0 sm:$0xff] }
 0xf4e   : > { %6149 = vpow2.f32 %v2602_v26 }
 0xf56   : > { %v6148_v27 = vpop.eup %6147 }
 0xf57   : > { %v2437_v28 = vsel %vm980_vm3, %v6148_v27, 0.0 }
 0xf58   : > { %v6150_v18 = vpop.eup %6149  ;;  %2438 = vadd.xlane.f32.xlu0 %v2437_v28 }
 0xf59   : > { %v2604_v29 = vsel %vm980_vm3, %v6150_v18, 0.0 }
 0xf5a   : > { %2605 = vadd.xlane.f32.xlu1 %v2604_v29  ;;  %v5495_v29 = vld [vmem:[%s6439_s28] ss:$0 sm:$0xff] }
 0xf6b   : > { %2609 = vrot.lane.b32.xlu1 %v2349_v58, %s6255_s18 }
 0xf6e   : > { %2442 = vrot.lane.b32.xlu0 %v2346_v54, %s6255_s18  ;;  %v5493_v54 = vld [vmem:[%s7070_s9] ss:$0 sm:$0xff]  ;;  %s7071_s18 = sld [smem:[#allocation13_spill]] }
 0xf74   : > { %v6700_v23 = vld [vmem:[%s7071_s18] sm:$0xff]  }
 0xfe5   : > { %v2439_v35 = vpop.xlane.xlu0 %2438 }
 0xfe6   : > { %6151 = vrcp.f32 %v2439_v35 }
 0xfe7   : > { %v2606_v30 = vpop.xlane.xlu1 %2605 }
 0xfe8   : > { %6153 = vrcp.f32 %v2606_v30 }
 0xfe9   : > { %v2443_v31 = vpop.permute.xlu0 %2442 }
 0xfea   : > { %5842 = vmatpush3.msra.mxu1 %v2443_v31 }
 0xfeb   : > { %5851 = vmatprep.subr.mxu1 %v6253_v3  ;;  %v2610_v36 = vpop.permute.xlu1 %2609 }
 0xff0   : > { %v6152_v32 = vpop.eup %6151 }
 0xff1   : > { %v2441_v33 = vmul.f32 %v6152_v32, %v6148_v27 }
 0xff2   : > { %v6154_v34 = vpop.eup %6153 }
 0xff3   : > { %5844 = vmatmul.mubr.msk.f32.vlgmr.msra.gmra.mrb[32].mxu1 %vm980_vm3, %v2441_v33  ;;  %v2608_v37 = vmul.f32 %v6154_v34, %v6150_v18 }
 0xff4   : > { %5852 = vmatpush3.msra.mxu1 %v2610_v36  ;;  %5853 = vmatprep.mubr.msk.f32.mxu1 %vm6254_vm1, %v6253_v3 }
 0xff5   : > { %5862 = vmatprep.subr.bf16.mxu1 %v6253_v3 }
 0xff7   : > { %5854 = vmatmul.mubr.msk.f32.vlgmr.msra.gmra.mrb[34].mxu1 %vm980_vm3, %v2608_v37 }
 0xff8   : > { %5866 = vmatprep.mubr.msk.bf16.mxu1 %vm6254_vm1, %v6253_v3  ;;  %5863 = vmatpush3.bf16.msra.mxu1 %v6104_v63 }
 0xff9   : > { %5864 = vmatprep.subr.bf16.mxu1 %v6253_v3 }
 0xffc   : > { %5865 = vmatpush3.bf16.msra.mxu1 %v6105_v0 }
 0xffd   : > { %5878 = vmatprep.subr.mxu1 %v6253_v3 }
0x10c6   : > { %v2514_v40 = vpop.f32.mrb[32].mxu1 }
0x10c7   : > { %2518 = vst.msk [vmem:[#allocation2] sm:$0xff] %vm980_vm3, %v2514_v40  ;;  %v5845_v41 = vpop.f32.mrb[33].mxu1 }
0x10ca   : > { %v2681_v42 = vpop.f32.mrb[34].mxu1 }
0x10cb   : > { %2685 = vst.msk [vmem:[#allocation2 + $0x8] sm:$0xff] %vm980_vm3, %v2681_v42  ;;  %v5855_v43 = vpop.f32.mrb[35].mxu1 }
0x10ce   : > { %v2688_v44 = vld [vmem:[#allocation2] sm:$0xff] }
0x10d2   : > { %v2689_v45 = vld [vmem:[#allocation2 + $0x8] sm:$0xff] }
0x10d3   : > { %v2690_v46 = vpack.c.bf16 %v2689_v45, %v2688_v44 }
0x10d5   : > { %5859 = vmatmul.mubr.msk.bf16.vlgmr.msra.gmra.mrb[24].mxu0 %vm980_vm3, %v2690_v46 }
0x10d6   : > { %5874 = vmatprep.mubr.msk.bf16.mxu0 %vm6254_vm1, %v6253_v3 }
0x11a8   : > { %v2733_v48 = vpop.f32.mrb[24].mxu0 }
0x11a9   : > { %v2740_v49 = vadd.f32 %v2733_v48, %v2686_v47  ;;  %v5860_v50 = vpop.f32.mrb[25].mxu0  ;;  %v6734_v48 = vld [vmem:[%s7072_s21] ss:$0 sm:$0xff] }
0x11aa   : > { %v2736_v52 = vpop.f32.mrb[26].mxu0 }
0x11ab   : > { %2742 = vst.msk [vmem:[#allocation3] sm:$0xff] %vm907_vm2, %v2740_v49  ;;  %v2741_v7 = vadd.f32 %v2736_v52, %v2687_v51  ;;  %v5861_v53 = vpop.f32.mrb[27].mxu0 }
0x11ad   : > { %2743 = vst.msk [vmem:[#allocation3 + $0x8] sm:$0xff] %vm907_vm2, %v2741_v7  ;;  %v6740_v7 = vld [vmem:[%s7072_s21 + $0x1] ss:$0 sm:$0xff] }
0x11b2   : > { %v2744_v55 = vld [vmem:[#allocation3] sm:$0xff] }
0x11b3   : > { %v2753_v56 = vadd.f32 %v5493_v54, %v2744_v55  ;;  %2818 = vst.msk [vmem:[#allocation3] sm:$0xff] %vm907_vm2, %v6253_v3 }
0x11b4   : > { %v2745_v57 = vld [vmem:[#allocation3 + $0x8] sm:$0xff] }
0x11b5   : > { %v2755_v58 = vadd.f32 %v2753_v56, %v6463_v5  ;;  %v2754_v59 = vadd.f32 %v5493_v54, %v2745_v57  ;;  %2819 = vst.msk [vmem:[#allocation3 + $0x8] sm:$0xff] %vm907_vm2, %v6253_v3 }
0x11b7   : > { %v2759_v60 = vsel %vm907_vm2, %v2755_v58, 0.0  ;;  %v2756_v61 = vadd.f32 %v2754_v59, %v6465_v6 }
0x11b8   : > { %2760 = vadd.xlane.f32.xlu1 %v2759_v60 }
0x11b9   : > { %v2762_v62 = vsel %vm907_vm2, %v2756_v61, 0.0 }
0x11ba   : > { %2763 = vadd.xlane.f32.xlu0 %v2762_v62 }
0x1245   : > { %v2761_v5 = vpop.xlane.xlu1 %2760 }
0x1246   : > { %v2766_v1 = vmul.f32 0.03125, %v2761_v5 }
0x1247   : > { %v2764_v2 = vpop.xlane.xlu0 %2763 }
0x1248   : > { %v2768_v4 = vsub.f32 %v2755_v58, %v2766_v1  ;;  %v2767_v8 = vmul.f32 0.03125, %v2764_v2 }
0x124a   : > { %v2769_v9 = vsub.f32 %v2756_v61, %v2767_v8  ;;  %v2770_v6 = vmul.f32 %v2768_v4, %v2768_v4  ;;  %v6107_v8 = vld [vmem:[%s6405_s22 + $0x10] sm:$0xff]  }
0x124c   : > { %v2772_v10 = vsel %vm907_vm2, %v2770_v6, 0.0  ;;  %v2771_v11 = vmul.f32 %v2769_v9, %v2769_v9 }
0x124d   : > { %2773 = vadd.xlane.f32.xlu0 %v2772_v10 }
0x124e   : > { %v2775_v12 = vsel %vm907_vm2, %v2771_v11, 0.0 }
0x124f   : > { %2776 = vadd.xlane.f32.xlu1 %v2775_v12 }
0x1260   : > { %2894 = vrot.lane.b32.xlu1 %v6105_v0, %s6256_s24 }
0x1263   : > { %2892 = vrot.lane.b32.xlu0 %v6104_v63, %s6256_s24 }
0x1264   : > { %2898 = vrot.lane.b32.xlu1 %v5499_v13, %s6256_s24 }
0x12da   : > { %v2774_v14 = vpop.xlane.xlu0 %2773 }
0x12db   : > { %v2778_v15 = vmul.f32 0.03125, %v2774_v14 }
0x12dc   : > { %v2777_v16 = vpop.xlane.xlu1 %2776 }
0x12dd   : > { %v2780_v17 = vadd.f32 1e-05, %v2778_v15  ;;  %v2779_v19 = vmul.f32 0.03125, %v2777_v16  ;;  %v5517_v16 = vld [vmem:[%s6410_s23 + $0x1] ss:$0 sm:$0xff] }
0x12de   : > { %v2893_v20 = vpop.permute.xlu0 %2892 }
0x12df   : > { %6155 = vrsqrt.f32 %v2780_v17  ;;  %v2781_v21 = vadd.f32 1e-05, %v2779_v19  ;;  %5871 = vmatpush3.bf16.msra.mxu0 %v2893_v20  ;;  %v3282_v17 = vld [vmem:[%s6415_s30] sm:$0xf] }
0x12e0   : > { %v2895_v22 = vpop.permute.xlu1 %2894  ;;  %5872 = vmatprep.subr.bf16.mxu0 %v6253_v3  ;;  %v3287_v19 = vsel %vm1321_vm4, %v3282_v17, 0 }
0x12e1   : > { %6157 = vrsqrt.f32 %v2781_v21 }
0x12e3   : > { %5873 = vmatpush3.bf16.msra.mxu0 %v2895_v22 }
0x12e4   : > { %5883 = vmatprep.subr.mxu0 %v6253_v3  ;;  %v2899_v33 = vpop.permute.xlu1 %2898 }
0x12e6   : > { %5875 = vmatmul.mubr.msk.bf16.vlgmr.msra.gmra.mrb[28].mxu0 %vm907_vm2, %v6700_v23 }
0x12e7   : > { %5885 = vmatprep.mubr.msk.f32.mxu0 %vm6254_vm1, %v6253_v3 }
0x12e9   : > { %v6156_v24 = vpop.eup %6155 }
0x12ea   : > { %v2784_v26 = vmul.f32 %v6156_v24, %v2768_v4 }
0x12eb   : > { %v6158_v27 = vpop.eup %6157 }
0x12ec   : > { %v2792_v28 = vmul.f32 %v5494_v25, %v2784_v26  ;;  %v2785_v18 = vmul.f32 %v6158_v27, %v2769_v9  ;;  %v6108_v9 = vld [vmem:[%s6405_s22 + $0x18] sm:$0xff]  }
0x12ee   : > { %v2793_v35 = vmul.f32 %v5494_v25, %v2785_v18  ;;  %v6709_v30 = vadd.f32 %v5495_v29, %v2792_v28 }
0x12f0   : > { %v6711_v31 = vadd.f32 %v5495_v29, %v2793_v35 }
0x12f2   : > { %v6715_v32 = vpack.c.bf16 %v6711_v31, %v6709_v30 }
0x12f4   : > { %5867 = vmatmul.mubr.msk.bf16.vlgmr.msra.gmra.mrb[36].mxu1 %vm907_vm2, %v6715_v32 }
0x12f5   : > { %5880 = vmatprep.mubr.msk.f32.mxu1 %vm6254_vm1, %v6253_v3 }
0x13b9   : > { %v2938_v34 = vpop.f32.mrb[28].mxu0 }
0x13ba   : > { %v5876_v36 = vpop.f32.mrb[29].mxu0  ;;  %v2939_v37 = vadd.f32 %v2938_v34, %v2899_v33 }
0x13bb   : > { %v2941_v38 = vpop.f32.mrb[30].mxu0  ;;  %v3277_v36 = vld [vmem:[#allocation3] sm:$0xff] }
0x13bc   : > { %v5877_v39 = vpop.f32.mrb[31].mxu0  ;;  %5879 = vmatpush3.xpose.msk.msra.mxu1 %vm980_vm3, %v2939_v37  ;;  %v2942_v43 = vadd.f32 %v2941_v38, %v2899_v33  ;;  %v3278_v38 = vld [vmem:[#allocation3 + $0x8] sm:$0xff] }
0x13bd   : > { %5888 = vmatprep.subr.mxu1 %v6253_v3 }
0x13c7   : > { %v2880_v40 = vpop.f32.mrb[36].mxu1 }
0x13c8   : > { %v2881_v41 = vadd.f32 %v5499_v13, %v2880_v40  ;;  %v5868_v42 = vpop.f32.mrb[37].mxu1 }
0x13c9   : > { %v2883_v44 = vpop.f32.mrb[38].mxu1 }
0x13ca   : > { %v5869_v45 = vpop.f32.mrb[39].mxu1  ;;  %5881 = vmatmul.mubr.msk.f32.vlgmr.msra.gmra.mrb[40].mxu1 %vm980_vm3, %v2881_v41  ;;  %v2884_v46 = vadd.f32 %v5499_v13, %v2883_v44 }
0x13cb   : > { %5889 = vmatpush3.xpose.msk.msra.mxu1 %vm980_vm3, %v2942_v43  ;;  %5890 = vmatprep.mubr.msk.f32.mxu1 %vm6254_vm1, %v6253_v3 }
0x13cc   : > { %5898 = vmatprep.subr.bf16.mxu1 %v6253_v3 }
0x13ce   : > { %5891 = vmatmul.mubr.msk.f32.vlgmr.msra.gmra.mrb[42].mxu1 %vm980_vm3, %v2884_v46 }
0x13cf   : > { %5900 = vmatprep.mubr.msk.bf16.mxu1 %vm6254_vm1, %v6253_v3  ;;  %5899 = vmatpush3.bf16.msra.mxu1 %v3287_v19 }
0x13d0   : > { %5912 = vmatprep.subr.bf16.mxu1 %v6253_v3 }
0x149d   : > { %v3017_v47 = vpop.f32.mrb[40].mxu1 }
0x149e   : > { %v3021_v49 = vmul.f32 0.35355338, %v3017_v47  ;;  %v5882_v50 = vpop.f32.mrb[41].mxu1 }
0x14a0   : > { %v3022_v51 = vadd.f32 %v6734_v48, %v3021_v49 }
0x14a1   : > { %v3183_v52 = vpop.f32.mrb[42].mxu1 }
0x14a2   : > { %v3187_v53 = vmul.f32 0.35355338, %v3183_v52  ;;  %v5892_v54 = vpop.f32.mrb[43].mxu1  ;;  %v3023_v55 = vsel %vm980_vm3, %v3022_v51, -inf }
0x14a3   : > { %3024 = vmax.xlane.f32.xlu0 %v3023_v55 }
0x14a4   : > { %v3188_v56 = vadd.f32 %v6740_v7, %v3187_v53 }
0x14a6   : > { %v3189_v57 = vsel %vm980_vm3, %v3188_v56, -inf }
0x14a7   : > { %3190 = vmax.xlane.f32.xlu1 %v3189_v57 }
0x14b8   : > { %3034 = vrot.lane.b32.xlu1 %v2939_v37, %s6256_s24 }
0x14bc   : > { %3400 = vrot.lane.b32.xlu1 %v6107_v8, %s6256_s24 }
0x14c0   : > { %3402 = vrot.lane.b32.xlu1 %v6108_v9, %s6256_s24 }
0x1530   : > { %v3025_v58 = vpop.xlane.xlu0 %3024 }
0x1531   : > { %v3026_v59 = vsub.f32 %v3022_v51, %v3025_v58 }
0x1533   : > { %v3027_v60 = vmul.f32 1.442695, %v3026_v59 }
0x1534   : > { %v3191_v61 = vpop.xlane.xlu1 %3190 }
0x1535   : > { %6159 = vpow2.f32 %v3027_v60  ;;  %v3192_v62 = vsub.f32 %v3188_v56, %v3191_v61 }
0x1537   : > { %v3193_v63 = vmul.f32 1.442695, %v3192_v62 }
0x1538   : > { %v3035_v0 = vpop.permute.xlu1 %3034 }
0x1539   : > { %6161 = vpow2.f32 %v3193_v63  ;;  %5884 = vmatpush3.msra.mxu0 %v3035_v0 }
0x153a   : > { %5893 = vmatprep.subr.mxu0 %v6253_v3 }
0x153c   : > { %v3401_v25 = vpop.permute.xlu1 %3400 }
0x153f   : > { %v6160_v5 = vpop.eup %6159 }
0x1540   : > { %v3029_v1 = vsel %vm980_vm3, %v6160_v5, 0.0  ;;  %v3403_v34 = vpop.permute.xlu1 %3402 }
0x1541   : > { %3030 = vadd.xlane.f32.xlu0 %v3029_v1 }
0x1543   : > { %v6162_v2 = vpop.eup %6161 }
0x1544   : > { %v3195_v4 = vsel %vm980_vm3, %v6162_v2, 0.0 }
0x1545   : > { %3196 = vadd.xlane.f32.xlu0 %v3195_v4 }
0x155b   : > { %3200 = vrot.lane.b32.xlu0 %v2942_v43, %s6256_s24 }
0x155f   : > { %3406 = vrot.lane.b32.xlu0 %v5517_v16, %s6256_s24 }
0x15ce   : > { %v3031_v6 = vpop.xlane.xlu0 %3030 }
0x15cf   : > { %6163 = vrcp.f32 %v3031_v6 }
0x15d2   : > { %v3197_v10 = vpop.xlane.xlu0 %3196 }
0x15d3   : > { %6165 = vrcp.f32 %v3197_v10 }
0x15d6   : > { %v3201_v13 = vpop.permute.xlu0 %3200 }
0x15d9   : > { %v6164_v11 = vpop.eup %6163 }
0x15da   : > { %v3033_v12 = vmul.f32 %v6164_v11, %v6160_v5  ;;  %v3407_v44 = vpop.permute.xlu0 %3406 }
0x15dc   : > { %5886 = vmatmul.mubr.msk.f32.vlgmr.msra.gmra.mrb[32].mxu0 %vm980_vm3, %v3033_v12  ;;  %v6109_v12 = vld [vmem:[%s6405_s22 + $0x20] sm:$0xff]  }
0x15dd   : > { %v6166_v14 = vpop.eup %6165  ;;  %5894 = vmatpush3.msra.mxu0 %v3201_v13  ;;  %5895 = vmatprep.mubr.msk.f32.mxu0 %vm6254_vm1, %v6253_v3  ;;  %v6110_v13 = vld [vmem:[%s6405_s22 + $0x28] sm:$0xff]  }
0x15de   : > { %v3199_v15 = vmul.f32 %v6166_v14, %v6162_v2  ;;  %5904 = vmatprep.subr.bf16.mxu0 %v6253_v3 }
0x15e0   : > { %5896 = vmatmul.mubr.msk.f32.vlgmr.msra.gmra.mrb[34].mxu0 %vm980_vm3, %v3199_v15 }
0x15e1   : > { %5905 = vmatpush3.bf16.msra.mxu0 %v6107_v8  ;;  %5908 = vmatprep.mubr.msk.bf16.mxu0 %vm6254_vm1, %v6253_v3 }
0x15e2   : > { %5906 = vmatprep.subr.bf16.mxu0 %v6253_v3 }
0x15e5   : > { %5907 = vmatpush3.bf16.msra.mxu0 %v6108_v9 }
0x15e6   : > { %5920 = vmatprep.subr.mxu0 %v6253_v3 }
0x15e8   : > { %5909 = vmatmul.mubr.msk.bf16.vlgmr.msra.gmra.mrb[36].mxu0 %vm907_vm2, %v6715_v32 }
0x15e9   : > { %5922 = vmatprep.mubr.msk.f32.mxu0 %vm6254_vm1, %v6253_v3 }
0x16af   : > { %v3106_v20 = vpop.f32.mrb[32].mxu0 }
0x16b0   : > { %3110 = vst.msk [vmem:[#allocation2] sm:$0xff] %vm980_vm3, %v3106_v20  ;;  %v5887_v21 = vpop.f32.mrb[33].mxu0 }
0x16b3   : > { %v3272_v22 = vpop.f32.mrb[34].mxu0 }
0x16b4   : > { %3276 = vst.msk [vmem:[#allocation2 + $0x8] sm:$0xff] %vm980_vm3, %v3272_v22  ;;  %v5897_v24 = vpop.f32.mrb[35].mxu0 }
0x16b5   : > { %v5535_v24 = vld [vmem:[%s6410_s23 + $0x2] ss:$0 sm:$0xff] }
0x16b7   : > { %v3279_v27 = vld [vmem:[#allocation2] sm:$0xff] }
0x16bb   : > { %v3393_v26 = vpop.f32.mrb[36].mxu0  ;;  %v3280_v28 = vld [vmem:[#allocation2 + $0x8] sm:$0xff] }
0x16bc   : > { %v5910_v18 = vpop.f32.mrb[37].mxu0  ;;  %v3281_v29 = vpack.c.bf16 %v3280_v28, %v3279_v27  ;;  %v3394_v51 = vadd.f32 %v5517_v16, %v3393_v26 }
0x16bd   : > { %v3396_v35 = vpop.f32.mrb[38].mxu0 }
0x16be   : > { %v5911_v33 = vpop.f32.mrb[39].mxu0  ;;  %5901 = vmatmul.mubr.msk.bf16.vlgmr.msra.gmra.mrb[44].mxu1 %vm980_vm3, %v3281_v29  ;;  %v3397_v53 = vadd.f32 %v5517_v16, %v3396_v35 }
0x16bf   : > { %5913 = vmatpush3.bf16.msra.mxu1 %v3401_v25  ;;  %5916 = vmatprep.mubr.msk.bf16.mxu1 %vm6254_vm1, %v6253_v3  ;;  %v5528_v25 = vld [vmem:[%s6415_s30 + $0x4] sm:$0xf] }
0x16c0   : > { %5914 = vmatprep.subr.bf16.mxu1 %v6253_v3  ;;  %v3793_v26 = vsel %vm1321_vm4, %v5528_v25, 0 }
0x16c3   : > { %5915 = vmatpush3.bf16.msra.mxu1 %v3403_v34 }
0x16c4   : > { %5925 = vmatprep.subr.mxu1 %v6253_v3 }
0x16c6   : > { %5917 = vmatmul.mubr.msk.bf16.vlgmr.msra.gmra.mrb[48].mxu1 %vm907_vm2, %v6700_v23 }
0x16c7   : > { %5927 = vmatprep.mubr.msk.f32.mxu1 %vm6254_vm1, %v6253_v3 }
0x1791   : > { %v3323_v37 = vpop.f32.mrb[44].mxu1 }
0x1792   : > { %v3330_v39 = vadd.f32 %v3323_v37, %v3277_v36  ;;  %v5902_v40 = vpop.f32.mrb[45].mxu1 }
0x1793   : > { %v3326_v41 = vpop.f32.mrb[46].mxu1 }
0x1794   : > { %3332 = vst.msk [vmem:[#allocation3] sm:$0xff] %vm907_vm2, %v3330_v39  ;;  %v3331_v42 = vadd.f32 %v3326_v41, %v3278_v38  ;;  %v5903_v43 = vpop.f32.mrb[47].mxu1 }
0x1796   : > { %3333 = vst.msk [vmem:[#allocation3 + $0x8] sm:$0xff] %vm907_vm2, %v3331_v42 }
0x1799   : > { %v3443_v45 = vpop.f32.mrb[48].mxu1 }
0x179a   : > { %v3444_v46 = vadd.f32 %v3443_v45, %v3407_v44  ;;  %v5918_v47 = vpop.f32.mrb[49].mxu1 }
0x179b   : > { %v3446_v49 = vpop.f32.mrb[50].mxu1  ;;  %v3782_v42 = vld [vmem:[#allocation3] sm:$0xff] }
0x179c   : > { %v5919_v50 = vpop.f32.mrb[51].mxu1  ;;  %5921 = vmatpush3.xpose.msk.msra.mxu0 %vm980_vm3, %v3444_v46  ;;  %v3447_v52 = vadd.f32 %v3446_v49, %v3407_v44 }
0x179d   : > { %5930 = vmatprep.subr.mxu0 %v6253_v3 }
0x179f   : > { %5923 = vmatmul.mubr.msk.f32.vlgmr.msra.gmra.mrb[40].mxu0 %vm980_vm3, %v3394_v51 }
0x17a0   : > { %5931 = vmatpush3.xpose.msk.msra.mxu0 %vm980_vm3, %v3447_v52  ;;  %5932 = vmatprep.mubr.msk.f32.mxu0 %vm6254_vm1, %v6253_v3 }
0x17a1   : > { %5940 = vmatprep.subr.bf16.mxu0 %v6253_v3 }
0x17a3   : > { %5933 = vmatmul.mubr.msk.f32.vlgmr.msra.gmra.mrb[42].mxu0 %vm980_vm3, %v3397_v53 }
0x17a4   : > { %5942 = vmatprep.mubr.msk.bf16.mxu0 %vm6254_vm1, %v6253_v3  ;;  %5941 = vmatpush3.bf16.msra.mxu0 %v3793_v26 }
0x17a5   : > { %5954 = vmatprep.subr.bf16.mxu0 %v6253_v3 }
0x1872   : > { %v3522_v54 = vpop.f32.mrb[40].mxu0 }
0x1873   : > { %v3526_v55 = vmul.f32 0.35355338, %v3522_v54  ;;  %v5924_v56 = vpop.f32.mrb[41].mxu0 }
0x1875   : > { %v3527_v57 = vadd.f32 %v6734_v48, %v3526_v55 }
0x1876   : > { %v3688_v58 = vpop.f32.mrb[42].mxu0 }
0x1877   : > { %v3692_v59 = vmul.f32 0.35355338, %v3688_v58  ;;  %v5934_v60 = vpop.f32.mrb[43].mxu0  ;;  %v3528_v61 = vsel %vm980_vm3, %v3527_v57, -inf }
0x1878   : > { %3529 = vmax.xlane.f32.xlu1 %v3528_v61 }
0x1879   : > { %v3693_v62 = vadd.f32 %v6740_v7, %v3692_v59 }
0x187b   : > { %v3694_v63 = vsel %vm980_vm3, %v3693_v62, -inf }
0x187c   : > { %3695 = vmax.xlane.f32.xlu0 %v3694_v63 }
0x1905   : > { %v3530_v0 = vpop.xlane.xlu1 %3529 }
0x1906   : > { %v3531_v5 = vsub.f32 %v3527_v57, %v3530_v0 }
0x1908   : > { %v3532_v1 = vmul.f32 1.442695, %v3531_v5 }
0x1909   : > { %v3696_v2 = vpop.xlane.xlu0 %3695 }
0x190a   : > { %6167 = vpow2.f32 %v3532_v1  ;;  %v3697_v4 = vsub.f32 %v3693_v62, %v3696_v2 }
0x190c   : > { %v3698_v8 = vmul.f32 1.442695, %v3697_v4 }
0x190e   : > { %6169 = vpow2.f32 %v3698_v8 }
0x1914   : > { %v6168_v9 = vpop.eup %6167 }
0x1915   : > { %v3534_v6 = vsel %vm980_vm3, %v6168_v9, 0.0 }
0x1916   : > { %3535 = vadd.xlane.f32.xlu0 %v3534_v6 }
0x1918   : > { %v6170_v10 = vpop.eup %6169 }
0x1919   : > { %v3700_v11 = vsel %vm980_vm3, %v6170_v10, 0.0 }
0x191a   : > { %3701 = vadd.xlane.f32.xlu1 %v3700_v11 }
0x192b   : > { %3705 = vrot.lane.b32.xlu1 %v3447_v52, %s6256_s24 }
0x192c   : > { %3539 = vrot.lane.b32.xlu0 %v3444_v46, %s6256_s24  ;;  %v3783_v46 = vld [vmem:[#allocation3 + $0x8] sm:$0xff] }
0x192f   : > { %3906 = vrot.lane.b32.xlu1 %v6109_v12, %s6256_s24 }
0x1930   : > { %3908 = vrot.lane.b32.xlu0 %v6110_v13, %s6256_s24 }
0x1933   : > { %3912 = vrot.lane.b32.xlu1 %v5535_v24, %s6256_s24 }
0x19a3   : > { %v3536_v14 = vpop.xlane.xlu0 %3535 }
0x19a4   : > { %6171 = vrcp.f32 %v3536_v14 }
0x19a7   : > { %v3702_v15 = vpop.xlane.xlu1 %3701  ;;  %v3540_v16 = vpop.permute.xlu0 %3539 }
0x19a8   : > { %6173 = vrcp.f32 %v3702_v15  ;;  %5926 = vmatpush3.msra.mxu1 %v3540_v16 }
0x19a9   : > { %5935 = vmatprep.subr.mxu1 %v6253_v3 }
0x19ab   : > { %v3706_v20 = vpop.permute.xlu1 %3705  ;;  %v3909_v41 = vpop.permute.xlu0 %3908 }
0x19ae   : > { %v6172_v17 = vpop.eup %6171 }
0x19af   : > { %v3538_v19 = vmul.f32 %v6172_v17, %v6168_v9  ;;  %v3907_v37 = vpop.permute.xlu1 %3906 }
0x19b1   : > { %5928 = vmatmul.mubr.msk.f32.vlgmr.msra.gmra.mrb[52].mxu1 %vm980_vm3, %v3538_v19 }
0x19b2   : > { %v6174_v21 = vpop.eup %6173  ;;  %5936 = vmatpush3.msra.mxu1 %v3706_v20  ;;  %5937 = vmatprep.mubr.msk.f32.mxu1 %vm6254_vm1, %v6253_v3  ;;  %v6111_v20 = vld [vmem:[%s6405_s22 + $0x30] sm:$0xff]  }
0x19b3   : > { %v3704_v22 = vmul.f32 %v6174_v21, %v6170_v10  ;;  %5946 = vmatprep.subr.bf16.mxu1 %v6253_v3  ;;  %v3913_v51 = vpop.permute.xlu1 %3912  ;;  %v6112_v21 = vld [vmem:[%s6405_s22 + $0x38] sm:$0xff]  }
0x19b5   : > { %5938 = vmatmul.mubr.msk.f32.vlgmr.msra.gmra.mrb[54].mxu1 %vm980_vm3, %v3704_v22 }
0x19b6   : > { %5947 = vmatpush3.bf16.msra.mxu1 %v6109_v12  ;;  %5950 = vmatprep.mubr.msk.bf16.mxu1 %vm6254_vm1, %v6253_v3 }
0x19b7   : > { %5948 = vmatprep.subr.bf16.mxu1 %v6253_v3 }
0x19ba   : > { %5949 = vmatpush3.bf16.msra.mxu1 %v6110_v13 }
0x19bb   : > { %5962 = vmatprep.subr.mxu1 %v6253_v3 }
0x19bd   : > { %5951 = vmatmul.mubr.msk.bf16.vlgmr.msra.gmra.mrb[56].mxu1 %vm907_vm2, %v6715_v32 }
0x19be   : > { %5964 = vmatprep.mubr.msk.f32.mxu1 %vm6254_vm1, %v6253_v3 }
0x1a84   : > { %v3611_v27 = vpop.f32.mrb[52].mxu1 }
0x1a85   : > { %3615 = vst.msk [vmem:[#allocation2] sm:$0xff] %vm980_vm3, %v3611_v27  ;;  %v5929_v28 = vpop.f32.mrb[53].mxu1 }
0x1a88   : > { %v3777_v18 = vpop.f32.mrb[54].mxu1 }
0x1a89   : > { %3781 = vst.msk [vmem:[#allocation2 + $0x8] sm:$0xff] %vm980_vm3, %v3777_v18  ;;  %v5939_v29 = vpop.f32.mrb[55].mxu1 }
0x1a8a   : > { %v5553_v29 = vld [vmem:[%s6410_s23 + $0x3] ss:$0 sm:$0xff] }
0x1a8c   : > { %v3784_v33 = vld [vmem:[#allocation2] sm:$0xff] }
0x1a90   : > { %v3899_v35 = vpop.f32.mrb[56].mxu1  ;;  %v3785_v34 = vld [vmem:[#allocation2 + $0x8] sm:$0xff] }
0x1a91   : > { %v5952_v36 = vpop.f32.mrb[57].mxu1  ;;  %v3786_v38 = vpack.c.bf16 %v3785_v34, %v3784_v33  ;;  %v3900_v57 = vadd.f32 %v5535_v24, %v3899_v35  ;;  %v5546_v35 = vld [vmem:[%s6415_s30 + $0x8] sm:$0xf] }
0x1a92   : > { %v3902_v39 = vpop.f32.mrb[58].mxu1  ;;  %v4299_v33 = vsel %vm1321_vm4, %v5546_v35, 0 }
0x1a93   : > { %v5953_v40 = vpop.f32.mrb[59].mxu1  ;;  %5943 = vmatmul.mubr.msk.bf16.vlgmr.msra.gmra.mrb[44].mxu0 %vm980_vm3, %v3786_v38  ;;  %v3903_v59 = vadd.f32 %v5535_v24, %v3902_v39 }
0x1a94   : > { %5955 = vmatpush3.bf16.msra.mxu0 %v3907_v37  ;;  %5958 = vmatprep.mubr.msk.bf16.mxu0 %vm6254_vm1, %v6253_v3 }
0x1a95   : > { %5956 = vmatprep.subr.bf16.mxu0 %v6253_v3 }
0x1a98   : > { %5957 = vmatpush3.bf16.msra.mxu0 %v3909_v41 }
0x1a99   : > { %5967 = vmatprep.subr.mxu0 %v6253_v3 }
0x1a9b   : > { %5959 = vmatmul.mubr.msk.bf16.vlgmr.msra.gmra.mrb[48].mxu0 %vm907_vm2, %v6700_v23 }
0x1a9c   : > { %5969 = vmatprep.mubr.msk.f32.mxu0 %vm6254_vm1, %v6253_v3 }
0x1b66   : > { %v3829_v43 = vpop.f32.mrb[44].mxu0 }
0x1b67   : > { %v3836_v44 = vadd.f32 %v3829_v43, %v3782_v42  ;;  %v5944_v45 = vpop.f32.mrb[45].mxu0 }
0x1b68   : > { %v3832_v47 = vpop.f32.mrb[46].mxu0 }
0x1b69   : > { %3838 = vst.msk [vmem:[#allocation3] sm:$0xff] %vm907_vm2, %v3836_v44  ;;  %v3837_v49 = vadd.f32 %v3832_v47, %v3783_v46  ;;  %v5945_v50 = vpop.f32.mrb[47].mxu0 }
0x1b6b   : > { %3839 = vst.msk [vmem:[#allocation3 + $0x8] sm:$0xff] %vm907_vm2, %v3837_v49 }
0x1b6e   : > { %v3949_v52 = vpop.f32.mrb[48].mxu0 }
0x1b6f   : > { %v3950_v53 = vadd.f32 %v3949_v52, %v3913_v51  ;;  %v5960_v54 = vpop.f32.mrb[49].mxu0 }
0x1b70   : > { %v3952_v55 = vpop.f32.mrb[50].mxu0  ;;  %v4288_v47 = vld [vmem:[#allocation3] sm:$0xff] }
0x1b71   : > { %v5961_v56 = vpop.f32.mrb[51].mxu0  ;;  %5963 = vmatpush3.xpose.msk.msra.mxu1 %vm980_vm3, %v3950_v53  ;;  %v3953_v58 = vadd.f32 %v3952_v55, %v3913_v51 }
0x1b72   : > { %5972 = vmatprep.subr.mxu1 %v6253_v3  ;;  %v4289_v52 = vld [vmem:[#allocation3 + $0x8] sm:$0xff] }
0x1b74   : > { %5965 = vmatmul.mubr.msk.f32.vlgmr.msra.gmra.mrb[60].mxu1 %vm980_vm3, %v3900_v57 }
0x1b75   : > { %5973 = vmatpush3.xpose.msk.msra.mxu1 %vm980_vm3, %v3953_v58  ;;  %5974 = vmatprep.mubr.msk.f32.mxu1 %vm6254_vm1, %v6253_v3 }
0x1b76   : > { %5982 = vmatprep.subr.bf16.mxu1 %v6253_v3 }
0x1b78   : > { %5975 = vmatmul.mubr.msk.f32.vlgmr.msra.gmra.mrb[62].mxu1 %vm980_vm3, %v3903_v59 }
0x1b79   : > { %5984 = vmatprep.mubr.msk.bf16.mxu1 %vm6254_vm1, %v6253_v3  ;;  %5983 = vmatpush3.bf16.msra.mxu1 %v4299_v33 }
0x1b7a   : > { %5996 = vmatprep.subr.bf16.mxu1 %v6253_v3 }
0x1c47   : > { %v4028_v60 = vpop.f32.mrb[60].mxu1 }
0x1c48   : > { %v4032_v61 = vmul.f32 0.35355338, %v4028_v60  ;;  %v5966_v62 = vpop.f32.mrb[61].mxu1 }
0x1c4a   : > { %v4033_v63 = vadd.f32 %v6734_v48, %v4032_v61 }
0x1c4b   : > { %v4194_v0 = vpop.f32.mrb[62].mxu1 }
0x1c4c   : > { %v4198_v5 = vmul.f32 0.35355338, %v4194_v0  ;;  %v5976_v1 = vpop.f32.mrb[63].mxu1  ;;  %v4034_v2 = vsel %vm980_vm3, %v4033_v63, -inf }
0x1c4d   : > { %4035 = vmax.xlane.f32.xlu0 %v4034_v2 }
0x1c4e   : > { %v4199_v4 = vadd.f32 %v6740_v7, %v4198_v5 }
0x1c50   : > { %v4200_v8 = vsel %vm980_vm3, %v4199_v4, -inf }
0x1c51   : > { %4201 = vmax.xlane.f32.xlu1 %v4200_v8 }
0x1c62   : > { %4045 = vrot.lane.b32.xlu1 %v3950_v53, %s6256_s24 }
0x1c66   : > { %4412 = vrot.lane.b32.xlu1 %v6111_v20, %s6256_s24 }
0x1c6a   : > { %4414 = vrot.lane.b32.xlu1 %v6112_v21, %s6256_s24 }
0x1cda   : > { %v4036_v9 = vpop.xlane.xlu0 %4035 }
0x1cdb   : > { %v4037_v6 = vsub.f32 %v4033_v63, %v4036_v9 }
0x1cdd   : > { %v4038_v10 = vmul.f32 1.442695, %v4037_v6 }
0x1cde   : > { %v4202_v11 = vpop.xlane.xlu1 %4201 }
0x1cdf   : > { %6175 = vpow2.f32 %v4038_v10  ;;  %v4203_v12 = vsub.f32 %v4199_v4, %v4202_v11 }
0x1ce1   : > { %v4204_v13 = vmul.f32 1.442695, %v4203_v12 }
0x1ce2   : > { %v4046_v14 = vpop.permute.xlu1 %4045 }
0x1ce3   : > { %6177 = vpow2.f32 %v4204_v13  ;;  %5968 = vmatpush3.msra.mxu0 %v4046_v14 }
0x1ce4   : > { %5977 = vmatprep.subr.mxu0 %v6253_v3 }
0x1ce6   : > { %v4413_v38 = vpop.permute.xlu1 %4412 }
0x1ce9   : > { %v6176_v15 = vpop.eup %6175 }
0x1cea   : > { %v4040_v16 = vsel %vm980_vm3, %v6176_v15, 0.0  ;;  %v4415_v46 = vpop.permute.xlu1 %4414 }
0x1ceb   : > { %4041 = vadd.xlane.f32.xlu0 %v4040_v16 }
0x1ced   : > { %v6178_v17 = vpop.eup %6177 }
0x1cee   : > { %v4206_v19 = vsel %vm980_vm3, %v6178_v17, 0.0 }
0x1cef   : > { %4207 = vadd.xlane.f32.xlu0 %v4206_v19 }
0x1d05   : > { %4211 = vrot.lane.b32.xlu0 %v3953_v58, %s6256_s24 }
0x1d09   : > { %4418 = vrot.lane.b32.xlu0 %v5553_v29, %s6256_s24 }
0x1d78   : > { %v4042_v22 = vpop.xlane.xlu0 %4041 }
0x1d79   : > { %6179 = vrcp.f32 %v4042_v22 }
0x1d7c   : > { %v4208_v24 = vpop.xlane.xlu0 %4207 }
0x1d7d   : > { %6181 = vrcp.f32 %v4208_v24 }
0x1d80   : > { %v4212_v27 = vpop.permute.xlu0 %4211 }
0x1d83   : > { %v6180_v25 = vpop.eup %6179 }
0x1d84   : > { %v4044_v26 = vmul.f32 %v6180_v25, %v6176_v15  ;;  %v4419_v56 = vpop.permute.xlu0 %4418 }
0x1d86   : > { %5970 = vmatmul.mubr.msk.f32.vlgmr.msra.gmra.mrb[52].mxu0 %vm980_vm3, %v4044_v26 }
0x1d87   : > { %v6182_v28 = vpop.eup %6181  ;;  %5978 = vmatpush3.msra.mxu0 %v4212_v27  ;;  %5979 = vmatprep.mubr.msk.f32.mxu0 %vm6254_vm1, %v6253_v3 }
0x1d88   : > { %v4210_v18 = vmul.f32 %v6182_v28, %v6178_v17  ;;  %5988 = vmatprep.subr.bf16.mxu0 %v6253_v3 }
0x1d8a   : > { %5980 = vmatmul.mubr.msk.f32.vlgmr.msra.gmra.mrb[54].mxu0 %vm980_vm3, %v4210_v18 }
0x1d8b   : > { %5989 = vmatpush3.bf16.msra.mxu0 %v6111_v20  ;;  %5992 = vmatprep.mubr.msk.bf16.mxu0 %vm6254_vm1, %v6253_v3 }
0x1d8c   : > { %5990 = vmatprep.subr.bf16.mxu0 %v6253_v3 }
0x1d8f   : > { %5991 = vmatpush3.bf16.msra.mxu0 %v6112_v21 }
0x1d90   : > { %6004 = vmatprep.subr.mxu0 %v6253_v3 }
0x1d92   : > { %5993 = vmatmul.mubr.msk.bf16.vlgmr.msra.gmra.mrb[56].mxu0 %vm907_vm2, %v6715_v32 }
0x1d93   : > { %6006 = vmatprep.mubr.msk.f32.mxu0 %vm6254_vm1, %v6253_v3 }
0x1e59   : > { %v4117_v34 = vpop.f32.mrb[52].mxu0 }
0x1e5a   : > { %4121 = vst.msk [vmem:[#allocation2] sm:$0xff] %vm980_vm3, %v4117_v34  ;;  %v5971_v36 = vpop.f32.mrb[53].mxu0 }
0x1e5d   : > { %v4283_v37 = vpop.f32.mrb[54].mxu0 }
0x1e5e   : > { %4287 = vst.msk [vmem:[#allocation2 + $0x8] sm:$0xff] %vm980_vm3, %v4283_v37  ;;  %v5981_v32 = vpop.f32.mrb[55].mxu0 }
0x1e61   : > { %v4290_v40 = vld [vmem:[#allocation2] sm:$0xff] }
0x1e65   : > { %v4405_v39 = vpop.f32.mrb[56].mxu0  ;;  %v4291_v41 = vld [vmem:[#allocation2 + $0x8] sm:$0xff] }
0x1e66   : > { %v5994_v42 = vpop.f32.mrb[57].mxu0  ;;  %v4292_v43 = vpack.c.bf16 %v4291_v41, %v4290_v40  ;;  %v4406_v61 = vadd.f32 %v5553_v29, %v4405_v39 }
0x1e67   : > { %v4408_v44 = vpop.f32.mrb[58].mxu0 }
0x1e68   : > { %v5995_v45 = vpop.f32.mrb[59].mxu0  ;;  %5985 = vmatmul.mubr.msk.bf16.vlgmr.msra.gmra.mrb[64].mxu1 %vm980_vm3, %v4292_v43  ;;  %v4409_v63 = vadd.f32 %v5553_v29, %v4408_v44  ;;  %v5564_v29 = vld [vmem:[%s6415_s30 + $0xc] sm:$0xf]  ;;  %s7073_s30 = scalar_lea.vmem %s7027_s11, %s6378_s19  ;;  %s7075_s19 = sld [smem:[#allocation9_spill]] }
0x1e69   : > { %5997 = vmatpush3.bf16.msra.mxu1 %v4413_v38  ;;  %6000 = vmatprep.mubr.msk.bf16.mxu1 %vm6254_vm1, %v6253_v3  ;;  %v4805_v35 = vsel %vm1321_vm4, %v5564_v29, 0  ;;  %v5571_v29 = vld [vmem:[%s7074_s25] ss:$0 sm:$0xff] }
0x1e6a   : > { %5998 = vmatprep.subr.bf16.mxu1 %v6253_v3 }
0x1e6d   : > { %5999 = vmatpush3.bf16.msra.mxu1 %v4415_v46 }
0x1e6e   : > { %6009 = vmatprep.subr.mxu1 %v6253_v3  ;;  %s7076_s29 = sadd.s32 4294967295, %s7075_s19  }
0x1e6f   : > { %p6979_p6 = scmp.eq.s32.totalorder %s7076_s29, 1 }
0x1e70   : > { %6001 = vmatmul.mubr.msk.bf16.vlgmr.msra.gmra.mrb[68].mxu1 %vm907_vm2, %v6700_v23 }
0x1e71   : > { %6011 = vmatprep.mubr.msk.f32.mxu1 %vm6254_vm1, %v6253_v3 }
0x1f3b   : > { %v4335_v49 = vpop.f32.mrb[64].mxu1 }
0x1f3c   : > { %v4342_v50 = vadd.f32 %v4335_v49, %v4288_v47  ;;  %v5986_v51 = vpop.f32.mrb[65].mxu1  ;;  %v5566_v49 = vld [vmem:[%s7073_s30] ss:$0 sm:$0xff] }
0x1f3d   : > { %v4338_v53 = vpop.f32.mrb[66].mxu1 }
0x1f3e   : > { %4344 = vst.msk [vmem:[#allocation3] sm:$0xff] %vm907_vm2, %v4342_v50  ;;  %v4343_v54 = vadd.f32 %v4338_v53, %v4289_v52  ;;  %v5987_v55 = vpop.f32.mrb[67].mxu1 }
0x1f40   : > { %4345 = vst.msk [vmem:[#allocation3 + $0x8] sm:$0xff] %vm907_vm2, %v4343_v54 }
0x1f43   : > { %v4455_v57 = vpop.f32.mrb[68].mxu1 }
0x1f44   : > { %v4456_v58 = vadd.f32 %v4455_v57, %v4419_v56  ;;  %v6002_v59 = vpop.f32.mrb[69].mxu1 }
0x1f45   : > { %v4458_v23 = vpop.f32.mrb[70].mxu1  ;;  %v4794_v40 = vld [vmem:[#allocation3] sm:$0xff] }
0x1f46   : > { %v6003_v60 = vpop.f32.mrb[71].mxu1  ;;  %6005 = vmatpush3.xpose.msk.msra.mxu0 %vm980_vm3, %v4456_v58  ;;  %v4459_v62 = vadd.f32 %v4458_v23, %v4419_v56 }
0x1f47   : > { %6014 = vmatprep.subr.mxu0 %v6253_v3  ;;  %v4795_v44 = vld [vmem:[#allocation3 + $0x8] sm:$0xff] }
0x1f49   : > { %6007 = vmatmul.mubr.msk.f32.vlgmr.msra.gmra.mrb[60].mxu0 %vm980_vm3, %v4406_v61 }
0x1f4a   : > { %6015 = vmatpush3.xpose.msk.msra.mxu0 %vm980_vm3, %v4459_v62  ;;  %6016 = vmatprep.mubr.msk.f32.mxu0 %vm6254_vm1, %v6253_v3 }
0x1f4b   : > { %6024 = vmatprep.subr.bf16.mxu0 %v6253_v3 }
0x1f4d   : > { %6017 = vmatmul.mubr.msk.f32.vlgmr.msra.gmra.mrb[62].mxu0 %vm980_vm3, %v4409_v63 }
0x1f4e   : > { %6026 = vmatprep.mubr.msk.bf16.mxu0 %vm6254_vm1, %v6253_v3  ;;  %6025 = vmatpush3.bf16.msra.mxu0 %v4805_v35 }
0x1f4f   : > { %6038 = vmatprep.subr.bf16.mxu0 %v6253_v3 }
0x201c   : > { %v4534_v0 = vpop.f32.mrb[60].mxu0 }
0x201d   : > { %v4538_v5 = vmul.f32 0.35355338, %v4534_v0  ;;  %v6008_v1 = vpop.f32.mrb[61].mxu0 }
0x201e   : > { %v6114_v1 = vld [vmem:[%s6425_s27 + $0x8] sm:$0xff]  }
0x201f   : > { %v4539_v2 = vadd.f32 %v6734_v48, %v4538_v5  ;;  %v6113_v5 = vld [vmem:[%s6425_s27] sm:$0xff]  }
0x2020   : > { %v4700_v4 = vpop.f32.mrb[62].mxu0 }
0x2021   : > { %v4704_v8 = vmul.f32 0.35355338, %v4700_v4  ;;  %v6018_v9 = vpop.f32.mrb[63].mxu0  ;;  %v4540_v6 = vsel %vm980_vm3, %v4539_v2, -inf  ;;  %v6116_v4 = vld [vmem:[%s6444_s6 + $0x8] sm:$0xff]  }
0x2022   : > { %4541 = vmax.xlane.f32.xlu1 %v4540_v6  ;;  %v6118_v9 = vld [vmem:[%s6444_s6 + $0x18] sm:$0xff]   ;;  %v6119_v6 = vld [vmem:[%s6444_s6 + $0x20] sm:$0xff]  }
0x2023   : > { %v4705_v10 = vadd.f32 %v6740_v7, %v4704_v8  ;;  %v6117_v8 = vld [vmem:[%s6444_s6 + $0x10] sm:$0xff]  }
0x2025   : > { %v4706_v11 = vsel %vm980_vm3, %v4705_v10, -inf }
0x2026   : > { %4707 = vmax.xlane.f32.xlu0 %v4706_v11 }
0x20af   : > { %v4542_v12 = vpop.xlane.xlu1 %4541 }
0x20b0   : > { %v4543_v13 = vsub.f32 %v4539_v2, %v4542_v12  ;;  %v6115_v2 = vld [vmem:[%s6444_s6] sm:$0xff]  }
0x20b2   : > { %v4544_v14 = vmul.f32 1.442695, %v4543_v13 }
0x20b3   : > { %v4708_v15 = vpop.xlane.xlu0 %4707 }
0x20b4   : > { %6183 = vpow2.f32 %v4544_v14  ;;  %v4709_v16 = vsub.f32 %v4705_v10, %v4708_v15  ;;  %v6120_v10 = vld [vmem:[%s6444_s6 + $0x28] sm:$0xff]  }
0x20b6   : > { %v4710_v17 = vmul.f32 1.442695, %v4709_v16 }
0x20b8   : > { %6185 = vpow2.f32 %v4710_v17 }
0x20be   : > { %v6184_v48 = vpop.eup %6183 }
0x20bf   : > { %v4546_v19 = vsel %vm980_vm3, %v6184_v48, 0.0 }
0x20c0   : > { %4547 = vadd.xlane.f32.xlu0 %v4546_v19 }
0x20c2   : > { %v6186_v20 = vpop.eup %6185 }
0x20c3   : > { %v4712_v21 = vsel %vm980_vm3, %v6186_v20, 0.0 }
0x20c4   : > { %4713 = vadd.xlane.f32.xlu1 %v4712_v21 }
0x20d5   : > { %4717 = vrot.lane.b32.xlu1 %v4459_v62, %s6256_s24 }
0x20d6   : > { %4551 = vrot.lane.b32.xlu0 %v4456_v58, %s6256_s24 }
0x214d   : > { %v4548_v7 = vpop.xlane.xlu0 %4547 }
0x214e   : > { %6187 = vrcp.f32 %v4548_v7 }
0x2151   : > { %v4714_v22 = vpop.xlane.xlu1 %4713  ;;  %v4552_v24 = vpop.permute.xlu0 %4551 }
0x2152   : > { %6189 = vrcp.f32 %v4714_v22  ;;  %6010 = vmatpush3.msra.mxu1 %v4552_v24  ;;  %v5570_v22 = vld [vmem:[%s6439_s28 + $0x1] ss:$0 sm:$0xff] }
0x2153   : > { %6019 = vmatprep.subr.mxu1 %v6253_v3 }
0x2155   : > { %v4718_v27 = vpop.permute.xlu1 %4717 }
0x2158   : > { %v6188_v25 = vpop.eup %6187 }
0x2159   : > { %v4550_v26 = vmul.f32 %v6188_v25, %v6184_v48  ;;  %v5569_v48 = vld [vmem:[%s6434_s5 + $0x1] ss:$0 sm:$0xff] }
0x215b   : > { %6012 = vmatmul.mubr.msk.f32.vlgmr.msra.gmra.mrb[72].mxu1 %vm980_vm3, %v4550_v26 }
0x215c   : > { %v6190_v28 = vpop.eup %6189  ;;  %6020 = vmatpush3.msra.mxu1 %v4718_v27  ;;  %6021 = vmatprep.mubr.msk.f32.mxu1 %vm6254_vm1, %v6253_v3 }
0x215d   : > { %v4716_v18 = vmul.f32 %v6190_v28, %v6186_v20  ;;  %6030 = vmatprep.subr.bf16.mxu1 %v6253_v3  ;;  %v6121_v28 = vld [vmem:[%s6444_s6 + $0x30] sm:$0xff]  }
0x215f   : > { %6022 = vmatmul.mubr.msk.f32.vlgmr.msra.gmra.mrb[74].mxu1 %vm980_vm3, %v4716_v18  ;;  %v6122_v18 = vld [vmem:[%s6444_s6 + $0x38] sm:$0xff]   ;;  %s6257_s6 = smov [#allocation4]  }
0x2160   : > { %6034 = vmatprep.mubr.msk.bf16.mxu1 %vm6254_vm1, %v6253_v3  ;;  %6031 = vmatpush3.bf16.msra.mxu1 %v6113_v5 }
0x2161   : > { %6032 = vmatprep.subr.bf16.mxu1 %v6253_v3 }
0x2164   : > { %6033 = vmatpush3.bf16.msra.mxu1 %v6114_v1  ;;  %v5586_v1 = vld [vmem:[%s6434_s5 + $0x2] ss:$0 sm:$0xff] }
0x222e   : > { %v4623_v33 = vpop.f32.mrb[72].mxu1 }
0x222f   : > { %4627 = vst.msk [vmem:[#allocation2] sm:$0xff] %vm980_vm3, %v4623_v33  ;;  %v6013_v34 = vpop.f32.mrb[73].mxu1 }
0x2232   : > { %v4789_v36 = vpop.f32.mrb[74].mxu1 }
0x2233   : > { %4793 = vst.msk [vmem:[#allocation2 + $0x8] sm:$0xff] %vm980_vm3, %v4789_v36  ;;  %v6023_v37 = vpop.f32.mrb[75].mxu1 }
0x2236   : > { %v4796_v32 = vld [vmem:[#allocation2] sm:$0xff] }
0x223a   : > { %v4797_v38 = vld [vmem:[#allocation2 + $0x8] sm:$0xff] }
0x223b   : > { %v4798_v39 = vpack.c.bf16 %v4797_v38, %v4796_v32 }
0x223d   : > { %6027 = vmatmul.mubr.msk.bf16.vlgmr.msra.gmra.mrb[64].mxu0 %vm980_vm3, %v4798_v39 }
0x223e   : > { %6054 = vmatprep.mubr.msk.bf16.mxu0 %vm6254_vm1, %v6253_v3  ;;  %6039 = vmatpush3.bf16.msra.mxu0 %v6115_v2 }
0x223f   : > { %6040 = vmatprep.subr.bf16.mxu0 %v6253_v3 }
0x2242   : > { %6041 = vmatpush3.bf16.msra.mxu0 %v6116_v4 }
0x2243   : > { %6042 = vmatprep.subr.bf16.mxu0 %v6253_v3 }
0x2246   : > { %6043 = vmatpush3.bf16.msra.mxu0 %v6117_v8  ;;  %v5587_v8 = vld [vmem:[%s6439_s28 + $0x2] ss:$0 sm:$0xff] }
0x2247   : > { %6044 = vmatprep.subr.bf16.mxu0 %v6253_v3 }
0x224a   : > { %6045 = vmatpush3.bf16.msra.mxu0 %v6118_v9 }
0x224b   : > { %6046 = vmatprep.subr.bf16.mxu0 %v6253_v3 }
0x224e   : > { %6047 = vmatpush3.bf16.msra.mxu0 %v6119_v6 }
0x224f   : > { %6048 = vmatprep.subr.bf16.mxu0 %v6253_v3 }
0x2252   : > { %6049 = vmatpush3.bf16.msra.mxu0 %v6120_v10 }
0x2253   : > { %6050 = vmatprep.subr.bf16.mxu0 %v6253_v3 }
0x2256   : > { %6051 = vmatpush3.bf16.msra.mxu0 %v6121_v28 }
0x2257   : > { %6052 = vmatprep.subr.bf16.mxu0 %v6253_v3  ;;  %v5575_v3 = vld [vmem:[%s887_s8] ss:$0 sm:$0xff]  ;;  %s5153_s8 = sshll.u32 %s6257_s6, 4  ;;  %s5154_s8 = int_to_ptr.vmem [resolvable:$true] %s5153_s8 }
0x2258   : > { %s6199_s5 = scalar_lea.vmem %s5154_s8, 256  ;;  %p6206_p10 = scmp.lt.s32.totalorder %s5154_s8, %s5154_s8 }
0x2259   : > { %p6200_p7 = scmp.ne.s32.totalorder %s5154_s8, %s6199_s5  ;;  %p6207_p11 = scmp.lt.s32.totalorder %s6199_s5, %s6199_s5 }
0x225a   : > { %6053 = vmatpush3.bf16.msra.mxu0 %v6122_v18 }
0x225b   : > { %p6201_p8 = pnand %p6200_p7, %p6979_p6  ;;  %p6208_p12 = por %p6207_p11, %p6206_p10 }
0x225d   : > { %p6202_p9 = pneg %p6201_p8 }
0x225f   : > { %p6209_p13 = pnand %p6208_p12, %p6202_p9 }
0x2310   : > { %v4841_v41 = vpop.f32.mrb[64].mxu0 }
0x2311   : > { %v4848_v42 = vadd.f32 %v4841_v41, %v4794_v40  ;;  %v6028_v43 = vpop.f32.mrb[65].mxu0 }
0x2312   : > { %v4844_v45 = vpop.f32.mrb[66].mxu0 }
0x2313   : > { %4850 = vst.msk [vmem:[#allocation3] sm:$0xff] %vm907_vm2, %v4848_v42  ;;  %v4849_v46 = vadd.f32 %v4844_v45, %v4795_v44  ;;  %v6029_v47 = vpop.f32.mrb[67].mxu0 }
0x2315   : > { %4851 = vst.msk [vmem:[#allocation3 + $0x8] sm:$0xff] %vm907_vm2, %v4849_v46 }
0x231a   : > { %v4852_v50 = vld [vmem:[#allocation3] sm:$0xff] }
0x231b   : > { %v4861_v51 = vadd.f32 %v5566_v49, %v4852_v50 }
0x231c   : > { %v4853_v52 = vld [vmem:[#allocation3 + $0x8] sm:$0xff] }
0x231d   : > { %v4863_v53 = vadd.f32 %v4861_v51, %v6709_v30  ;;  %v4862_v54 = vadd.f32 %v5566_v49, %v4853_v52 }
0x231f   : > { %v4869_v55 = vsel %vm907_vm2, %v4863_v53, 0.0  ;;  %v4864_v56 = vadd.f32 %v4862_v54, %v6711_v31 }
0x2320   : > { %4870 = vadd.xlane.f32.xlu1 %v4869_v55 }
0x2321   : > { %v4872_v57 = vsel %vm907_vm2, %v4864_v56, 0.0 }
0x2322   : > { %4873 = vadd.xlane.f32.xlu0 %v4872_v57 }
0x23ad   : > { %v4871_v58 = vpop.xlane.xlu1 %4870 }
0x23ae   : > { %v4875_v59 = vmul.f32 0.03125, %v4871_v58 }
0x23af   : > { %v4874_v23 = vpop.xlane.xlu0 %4873 }
0x23b0   : > { %v4877_v60 = vsub.f32 %v4863_v53, %v4875_v59  ;;  %v4876_v61 = vmul.f32 0.03125, %v4874_v23 }
0x23b2   : > { %v4878_v62 = vsub.f32 %v4864_v56, %v4876_v61  ;;  %v4879_v30 = vmul.f32 %v4877_v60, %v4877_v60 }
0x23b4   : > { %v4881_v63 = vsel %vm907_vm2, %v4879_v30, 0.0  ;;  %v4880_v0 = vmul.f32 %v4878_v62, %v4878_v62 }
0x23b5   : > { %4882 = vadd.xlane.f32.xlu0 %v4881_v63 }
0x23b6   : > { %v4884_v31 = vsel %vm907_vm2, %v4880_v0, 0.0 }
0x23b7   : > { %4885 = vadd.xlane.f32.xlu1 %v4884_v31 }
0x2442   : > { %v4883_v11 = vpop.xlane.xlu0 %4882 }
0x2443   : > { %v4887_v12 = vmul.f32 0.03125, %v4883_v11 }
0x2444   : > { %v4886_v13 = vpop.xlane.xlu1 %4885 }
0x2445   : > { %v4889_v14 = vadd.f32 1e-05, %v4887_v12  ;;  %v4888_v15 = vmul.f32 0.03125, %v4886_v13 }
0x2447   : > { %6191 = vrsqrt.f32 %v4889_v14  ;;  %v4890_v16 = vadd.f32 1e-05, %v4888_v15 }
0x2449   : > { %6193 = vrsqrt.f32 %v4890_v16 }
0x2451   : > { %v6192_v17 = vpop.eup %6191 }
0x2452   : > { %v4893_v19 = vmul.f32 %v6192_v17, %v4877_v60 }
0x2453   : > { %v6194_v20 = vpop.eup %6193 }
0x2454   : > { %v4901_v21 = vmul.f32 %v5569_v48, %v4893_v19  ;;  %v4894_v7 = vmul.f32 %v6194_v20, %v4878_v62 }
0x2456   : > { %v4902_v24 = vmul.f32 %v5569_v48, %v4894_v7  ;;  %v4909_v25 = vadd.f32 %v5570_v22, %v4901_v21 }
0x2458   : > { %v4910_v26 = vadd.f32 %v5570_v22, %v4902_v24 }
0x245a   : > { %v4911_v27 = vpack.c.bf16 %v4910_v26, %v4909_v25 }
0x245c   : > { %6035 = vmatmul.mubr.msk.bf16.vlgmr.msra.gmra.mrb[76].mxu1 %vm907_vm2, %v4911_v27 }
0x252f   : > { %v4972_v35 = vpop.f32.mrb[76].mxu1 }
0x2530   : > { %v4973_v33 = vadd.f32 %v5571_v29, %v4972_v35  ;;  %v6036_v34 = vpop.f32.mrb[77].mxu1 }
0x2531   : > { %v4975_v36 = vpop.f32.mrb[78].mxu1 }
0x2532   : > { %v4976_v37 = vadd.f32 %v5571_v29, %v4975_v36  ;;  %v6037_v32 = vpop.f32.mrb[79].mxu1  ;;  %v4979_v38 = vmax.f32 %v4973_v33, 0.0 }
0x2534   : > { %v4980_v39 = vmax.f32 %v4976_v37, 0.0 }
0x2536   : > { %v4981_v40 = vpack.c.bf16 %v4980_v39, %v4979_v38 }
0x2538   : > { %6055 = vmatmul.mubr.bf16.vlgmr.msra.gmra.mrb[68].mxu0 %v4981_v40 }
0x260b   : > { %v5087_v41 = vpop.f32.mrb[68].mxu0 }
0x260c   : > { %v5088_v42 = vadd.f32 %v5575_v3, %v5087_v41  ;;  %v6056_v43 = vpop.f32.mrb[69].mxu0 }
0x260d   : > { %v5090_v44 = vpop.f32.mrb[70].mxu0 }
0x260e   : > { %v5091_v45 = vadd.f32 %v5575_v3, %v5090_v44  ;;  %v6057_v46 = vpop.f32.mrb[71].mxu0  ;;  %v5094_v47 = vadd.f32 %v5088_v42, %v4909_v25 }
0x2610   : > { %v5100_v49 = vsel %vm907_vm2, %v5094_v47, 0.0  ;;  %v5095_v50 = vadd.f32 %v5091_v45, %v4910_v26 }
0x2611   : > { %5101 = vadd.xlane.f32.xlu0 %v5100_v49 }
0x2612   : > { %v5103_v51 = vsel %vm907_vm2, %v5095_v50, 0.0 }
0x2613   : > { %5104 = vadd.xlane.f32.xlu1 %v5103_v51 }
0x269e   : > { %v5102_v52 = vpop.xlane.xlu0 %5101 }
0x269f   : > { %v5106_v53 = vmul.f32 0.03125, %v5102_v52 }
0x26a0   : > { %v5105_v54 = vpop.xlane.xlu1 %5104 }
0x26a1   : > { %v5108_v55 = vsub.f32 %v5094_v47, %v5106_v53  ;;  %v5107_v56 = vmul.f32 0.03125, %v5105_v54 }
0x26a3   : > { %v5109_v57 = vsub.f32 %v5095_v50, %v5107_v56  ;;  %v5110_v58 = vmul.f32 %v5108_v55, %v5108_v55 }
0x26a5   : > { %v5112_v59 = vsel %vm907_vm2, %v5110_v58, 0.0  ;;  %v5111_v23 = vmul.f32 %v5109_v57, %v5109_v57 }
0x26a6   : > { %5113 = vadd.xlane.f32.xlu0 %v5112_v59 }
0x26a7   : > { %v5115_v60 = vsel %vm907_vm2, %v5111_v23, 0.0 }
0x26a8   : > { %5116 = vadd.xlane.f32.xlu1 %v5115_v60 }
0x2733   : > { %v5114_v61 = vpop.xlane.xlu0 %5113 }
0x2734   : > { %v5118_v62 = vmul.f32 0.03125, %v5114_v61 }
0x2735   : > { %v5117_v30 = vpop.xlane.xlu1 %5116 }
0x2736   : > { %v5120_v63 = vadd.f32 1e-05, %v5118_v62  ;;  %v5119_v0 = vmul.f32 0.03125, %v5117_v30 }
0x2738   : > { %6195 = vrsqrt.f32 %v5120_v63  ;;  %v5121_v31 = vadd.f32 1e-05, %v5119_v0 }
0x273a   : > { %6197 = vrsqrt.f32 %v5121_v31 }
0x2742   : > { %v6196_v5 = vpop.eup %6195 }
0x2743   : > { %v5124_v2 = vmul.f32 %v6196_v5, %v5108_v55 }
0x2744   : > { %v6198_v4 = vpop.eup %6197 }
0x2745   : > { %v5132_v9 = vmul.f32 %v5586_v1, %v5124_v2  ;;  %v5125_v6 = vmul.f32 %v6198_v4, %v5109_v57 }
0x2747   : > { %v5133_v10 = vmul.f32 %v5586_v1, %v5125_v6  ;;  %v5140_v11 = vadd.f32 %v5587_v8, %v5132_v9 }
0x2749   : > { %v5141_v12 = vadd.f32 %v5587_v8, %v5133_v10  ;;  %5142 = vst.msk [vmem:[#allocation4] sm:$0xff] %vm907_vm2, %v5140_v11 }
0x274b   : > { %5143 = vst.msk [vmem:[#allocation4 + $0x8] sm:$0xff] %vm907_vm2, %v5141_v12 }
0x274c   : > { %6212 = shalt.err (!%p6209_p13)
}
0x274d   : > { %s7078_s0 = sld [smem:[#allocation22_spill]] }
0x2753   : > { %s6213_s7 = scalar_lea.hbm %s7078_s0, 256 }
0x2754   : > { %p6214_p0 = scmp.ne.s32.totalorder %s7078_s0, %s6213_s7  ;;  %p6219_p3 = scmp.lt.u32.totalorder %s6213_s7, %s7078_s0 }
0x2756   : > { %p6215_p1 = pnand %p6214_p0, %p6979_p6 }
0x2758   : > { %p6216_p2 = pneg %p6215_p1 }
0x275a   : > { %p6221_p4 = pnand %p6219_p3, %p6216_p2 }
0x275c   : > { %6224 = shalt.err (!%p6221_p4)
}
0x275d   : > { %s6258_s30 = smov 128   ;;  %s6259_s27 = smov 8  }
0x275e   : > { %6060 = dma.vmem_to_hbm [thread:$0]  (%p6979_p6), %s5154_s8, 256, %s7078_s0, [#allocation5], %s6258_s30, %s6258_s30, %s6259_s27  }
0x275f   : > { %6238 = dma.done.wait (%p6979_p6), [#allocation5], 256  }
0x2760   : > { %6240 = vsyncadd (%p6979_p6), [#allocation5], 4294967040 }
0x2761 PF: > { %s7079_s2 = sld [smem:[#allocation9_spill]]  ;;  %s7080_s27 = sld [smem:[#allocation8_spill]] }
0x2762   : > { %s7081_s28 = sld [smem:[#allocation10_spill]] }
0x2767   : > { %s29_s29 = sadd.s32 1, %s7079_s2  }
0x2768   : > { %p26_p5 = scmp.ge.s32.totalorder %s29_s29, 4  }
0x276a   :  { %28 = sbr.rel (!%p26_p5) target bundleno = 14 (0xe), region = 199 }
0x2771   :  { %5169 = vsyncpa [#allocation5], 1 }
0x2772   :  { %5171 = vsyncpa [#allocation5 + $0x1], 1 }

</bundles_post_ra>
